<compile_context>
chip_gen: v5e
topology: v5e:2x2
jax: 0.10.0
libtpu: 0.0.40
codegen_flags: <defaults>
</compile_context>

<pallas_src>
import functools

import jax
import jax.numpy as jnp
from jax.experimental import pallas as pl
from jax.experimental.pallas import tpu as pltpu

# ---- model hyper-params (from the PyTorch script) --------------------------
INPUT_DIM = 8
HIDDEN_DIM = 50
OUTPUT_DIM = 6
NUM_LAYERS = 3

HP = 64            # hidden dim padded to an aligned width (50 -> 64)
G = 4 * HP         # fused gate width (256 lanes)
OUT_P = 128        # lane-dense padded fc output width (6 -> 128)


# ---------------------------------------------------------------------------
# Pallas kernel: full 3-layer LSTM over the sequence + final linear layer.
#
# Padding correctness: padded gate columns (H..HP within each gate block) have
# zero weights and zero bias, so for those lanes tanh(0)=0 -> i=f=o=0.5, g=0,
# hence c stays 0 and h stays exactly 0; padded hidden rows of W_ih / W_hh are
# zero, so padded lanes never contaminate the real ones.  Padded batch rows
# (B..BP) do receive the real bias and compute nonzero junk, but rows are
# independent and sliced off by the wrapper (wasted lanes, not a bug).
# ---------------------------------------------------------------------------
def _lstm_kernel(x_ref,      # (T*BP, HP) bf16  padded, time-major, flattened input
                 wih_ref,    # (L, HP, G) bf16  fused input->gate weights (transposed, pre-scaled)
                 whh_ref,    # (L, HP, G) bf16  fused hidden->gate weights (transposed, pre-scaled)
                 b_ref,      # (L, 1, G)  f32   combined biases (b_ih + b_hh, pre-scaled)
                 wfc_ref,    # (HP, OUT_P) bf16 fc weight (transposed, padded)
                 bfc_ref,    # (1, OUT_P)  f32  fc bias (padded)
                 out_ref,    # (BP, OUT_P) f32
                 seq_ref,    # scratch (T*BP, HP) bf16: current layer's output sequence
                 xg_ref,     # scratch (T*BP, G)  f32: hoisted input-gate pre-activations
                 *, T, BP):
    h_bf = jnp.zeros((BP, HP), jnp.bfloat16)

    for layer in range(NUM_LAYERS):                      # static (3 layers)
        # Hoisted input projection + bias for ALL timesteps at once:
        #   (T*BP, HP) @ (HP, 4*HP) -> one MXU-friendly matmul per layer.
        # Layer 0 reads the kernel input directly; layers 1/2 read the bf16
        # sequence written by the previous layer.
        src = x_ref if layer == 0 else seq_ref
        xg_ref[...] = (jnp.dot(src[...], wih_ref[layer],
                               preferred_element_type=jnp.float32)
                       + b_ref[layer])

        w_hh = whh_ref[layer]                            # (HP, G) bf16, loaded once
        h_bf = jnp.zeros((BP, HP), jnp.bfloat16)
        c = jnp.zeros((BP, HP), jnp.float32)
        last_layer = layer == NUM_LAYERS - 1
        for t in range(T):                               # statically unrolled recurrence
            xg = xg_ref[pl.ds(t * BP, BP), :]            # (BP, G) f32
            if t == 0:
                gates = xg                               # h == 0: skip the matmul
            else:
                gates = xg + jnp.dot(h_bf, w_hh,
                                     preferred_element_type=jnp.float32)
            # Single full-width tanh; the 0.5 sigmoid input scale was folded
            # into the packed weights/bias (sigmoid(z) = 0.5*tanh(z/2) + 0.5).
            tg = jnp.tanh(gates)                         # (BP, G) f32, one EUP issue
            i_g = 0.5 * tg[:, 0 * HP:1 * HP] + 0.5       # PyTorch gate order: i, f, g, o
            f_g = 0.5 * tg[:, 1 * HP:2 * HP] + 0.5
            g_g = tg[:, 2 * HP:3 * HP]
            o_g = 0.5 * tg[:, 3 * HP:4 * HP] + 0.5
            c = f_g * c + i_g * g_g
            h = o_g * jnp.tanh(c)
            h_bf = h.astype(jnp.bfloat16)                # reused by matmul + seq store
            if not last_layer:                           # becomes next layer's input
                seq_ref[pl.ds(t * BP, BP), :] = h_bf

    # fc head on the last timestep of the top layer (bf16 MXU, lane-dense out).
    out_ref[...] = (jnp.dot(h_bf, wfc_ref[...], preferred_element_type=jnp.float32)
                    + bfc_ref[...])


# ---------------------------------------------------------------------------
# Parameter construction (deterministic, PyTorch-style uniform init).
# ---------------------------------------------------------------------------
def init_params(key):
    params = {}
    bound = 1.0 / jnp.sqrt(jnp.float32(HIDDEN_DIM))
    for l in range(NUM_LAYERS):
        d_in = INPUT_DIM if l == 0 else HIDDEN_DIM
        key, k1, k2, k3, k4 = jax.random.split(key, 5)
        params[f"w_ih_{l}"] = jax.random.uniform(
            k1, (4 * HIDDEN_DIM, d_in), jnp.float32, -bound, bound)
        params[f"w_hh_{l}"] = jax.random.uniform(
            k2, (4 * HIDDEN_DIM, HIDDEN_DIM), jnp.float32, -bound, bound)
        params[f"b_ih_{l}"] = jax.random.uniform(
            k3, (4 * HIDDEN_DIM,), jnp.float32, -bound, bound)
        params[f"b_hh_{l}"] = jax.random.uniform(
            k4, (4 * HIDDEN_DIM,), jnp.float32, -bound, bound)
    key, k5, k6 = jax.random.split(key, 3)
    params["w_fc"] = jax.random.uniform(
        k5, (OUTPUT_DIM, HIDDEN_DIM), jnp.float32, -bound, bound)
    params["b_fc"] = jax.random.uniform(
        k6, (OUTPUT_DIM,), jnp.float32, -bound, bound)
    return params


def pack_params(params):
    """Pad / split / fuse / transpose / pre-scale raw PyTorch-shaped params.

    Runs ONCE at init (outside the per-call jit path).  Gate columns for the
    sigmoid gates (i, f, o) are pre-scaled by 0.5 so the kernel can use one
    full-width tanh per step.  Padded rows/columns stay exactly zero (required
    for the padded-lane correctness argument in the kernel).
    """
    H = HIDDEN_DIM
    gate_scale = (0.5, 0.5, 1.0, 0.5)                    # gate order: i, f, g, o
    wih_l, whh_l, b_l = [], [], []
    for l in range(NUM_LAYERS):
        w_ih = params[f"w_ih_{l}"]                       # (4H, d_in)
        w_hh = params[f"w_hh_{l}"]                       # (4H, H)
        b = params[f"b_ih_{l}"] + params[f"b_hh_{l}"]    # (4H,)
        d_in = w_ih.shape[1]
        wih_p = jnp.zeros((HP, G), jnp.float32)
        whh_p = jnp.zeros((HP, G), jnp.float32)
        b_p = jnp.zeros((1, G), jnp.float32)
        for k, s in enumerate(gate_scale):
            wih_p = wih_p.at[:d_in, k * HP:k * HP + H].set(s * w_ih[k * H:(k + 1) * H, :].T)
            whh_p = whh_p.at[:H, k * HP:k * HP + H].set(s * w_hh[k * H:(k + 1) * H, :].T)
            b_p = b_p.at[0, k * HP:k * HP + H].set(s * b[k * H:(k + 1) * H])
        wih_l.append(wih_p)
        whh_l.append(whh_p)
        b_l.append(b_p)
    wih = jnp.stack(wih_l).astype(jnp.bfloat16)          # (L, HP, G)
    whh = jnp.stack(whh_l).astype(jnp.bfloat16)          # (L, HP, G)
    bias = jnp.stack(b_l)                                # (L, 1, G) f32
    w_fc = (jnp.zeros((HP, OUT_P), jnp.float32)
            .at[:H, :OUTPUT_DIM].set(params["w_fc"].T)).astype(jnp.bfloat16)
    b_fc = jnp.zeros((1, OUT_P), jnp.float32).at[0, :OUTPUT_DIM].set(params["b_fc"])
    return wih, whh, bias, w_fc, b_fc


# ---------------------------------------------------------------------------
# Wrapper: PyTorch-equivalent forward.  Takes the PRE-PACKED params.
# ---------------------------------------------------------------------------
@jax.jit
def lstm_model_forward(x, packed):
    """x: (B, T, INPUT_DIM) float32 (batch_first). Returns (B, OUTPUT_DIM)."""
    B, T, D = x.shape
    BP = max(8, ((B + 7) // 8) * 8)                      # sublane-aligned batch
    wih, whh, bias, w_fc, b_fc = packed

    # time-major, pad batch -> BP and features -> HP, flatten to (T*BP, HP) bf16.
    x_tm = jnp.transpose(x, (1, 0, 2))                   # (T, B, D)
    x_pad = jnp.zeros((T, BP, HP), jnp.float32).at[:, :B, :D].set(x_tm)
    x_flat = x_pad.reshape(T * BP, HP).astype(jnp.bfloat16)

    kernel = functools.partial(_lstm_kernel, T=T, BP=BP)
    vmem = pl.BlockSpec(memory_space=pltpu.MemorySpace.VMEM)
    out = pl.pallas_call(
        kernel,
        out_shape=jax.ShapeDtypeStruct((BP, OUT_P), jnp.float32),
        in_specs=[vmem] * 6,
        out_specs=vmem,
        scratch_shapes=[pltpu.VMEM((T * BP, HP), jnp.bfloat16),
                        pltpu.VMEM((T * BP, G), jnp.float32)],
    )(x_flat, wih, whh, bias, w_fc, b_fc)
    return out[:B, :OUTPUT_DIM]


# ---------------------------------------------------------------------------
# Pure-JAX reference (mirrors torch.nn.LSTM + Linear semantics) for checking.
# ---------------------------------------------------------------------------
def reference_forward(x, params):
    B, T, _ = x.shape
    H = HIDDEN_DIM
    layer_in = x
    for l in range(NUM_LAYERS):
        w_ih = params[f"w_ih_{l}"]
        w_hh = params[f"w_hh_{l}"]
        b = params[f"b_ih_{l}"] + params[f"b_hh_{l}"]
        h = jnp.zeros((B, H), jnp.float32)
        c = jnp.zeros((B, H), jnp.float32)
        outs = []
        for t in range(T):
            gates = layer_in[:, t, :] @ w_ih.T + h @ w_hh.T + b
            i_g = jax.nn.sigmoid(gates[:, 0 * H:1 * H])
            f_g = jax.nn.sigmoid(gates[:, 1 * H:2 * H])
            g_g = jnp.tanh(gates[:, 2 * H:3 * H])
            o_g = jax.nn.sigmoid(gates[:, 3 * H:4 * H])
            c = f_g * c + i_g * g_g
            h = o_g * jnp.tanh(c)
            outs.append(h)
        layer_in = jnp.stack(outs, axis=1)
    last = layer_in[:, -1, :]
    return last @ params["w_fc"].T + params["b_fc"]


if __name__ == "__main__":
    key = jax.random.PRNGKey(0)
    pkey, xkey = jax.random.split(key)
    params = init_params(pkey)
    packed = pack_params(params)                          # packed ONCE, outside jit

    B, T = 2, 8
    x = jax.random.normal(xkey, (B, T, INPUT_DIM), jnp.float32)

    out = jax.block_until_ready(lstm_model_forward(x, packed))
    ref = reference_forward(x, params)

    assert out.shape == (B, OUTPUT_DIM)
    err = float(jnp.max(jnp.abs(out - ref)))
    # bf16 matmul operands (f32 accumulation) -> relaxed tolerance vs f32 reference.
    assert jnp.allclose(out, ref, rtol=5e-2, atol=5e-2), f"max abs err = {err}"
    print("KERNEL_OK")
</pallas_src>

<mosaic_0001>
module attributes {stable_mosaic.version = 11 : i64} {
  func.func @_lstm_kernel(%arg0: memref<64x64xbf16, #tpu.memory_space<vmem>>, %arg1: memref<3x64x256xbf16, #tpu.memory_space<vmem>>, %arg2: memref<3x64x256xbf16, #tpu.memory_space<vmem>>, %arg3: memref<3x1x256xf32, #tpu.memory_space<vmem>>, %arg4: memref<64x128xbf16, #tpu.memory_space<vmem>>, %arg5: memref<1x128xf32, #tpu.memory_space<vmem>>, %arg6: memref<8x128xf32, #tpu.memory_space<vmem>>, %arg7: memref<64x64xbf16, #tpu.memory_space<vmem>>, %arg8: memref<64x256xf32, #tpu.memory_space<vmem>>) attributes {dimension_semantics = [], scalar_prefetch = 0 : i64, scratch_operands = 2 : i64, tpu.core_type = #tpu.core_type<tc>} {
    %c0 = arith.constant 0 : index
    %c0_0 = arith.constant 0 : index
    %0 = vector.load %arg0[%c0, %c0_0] : memref<64x64xbf16, #tpu.memory_space<vmem>>, vector<64x64xbf16>
    %c0_1 = arith.constant 0 : index
    %c0_2 = arith.constant 0 : index
    %c0_3 = arith.constant 0 : index
    %1 = vector.load %arg1[%c0_1, %c0_2, %c0_3] : memref<3x64x256xbf16, #tpu.memory_space<vmem>>, vector<1x64x256xbf16>
    %2 = vector.shape_cast %1 : vector<1x64x256xbf16> to vector<64x256xbf16>
    %cst = arith.constant dense<0.000000e+00> : vector<64x256xf32>
    %3 = tpu.matmul %0, %2, %cst {dimension_numbers = #tpu.dot_dimension_numbers<[1], [0], [0], [1], [0, 0, 1, 1], [], []>} : vector<64x64xbf16>, vector<64x256xbf16>, vector<64x256xf32> -> vector<64x256xf32>
    %c0_4 = arith.constant 0 : index
    %c0_5 = arith.constant 0 : index
    %c0_6 = arith.constant 0 : index
    %4 = vector.load %arg3[%c0_4, %c0_5, %c0_6] : memref<3x1x256xf32, #tpu.memory_space<vmem>>, vector<1x1x256xf32>
    %5 = vector.shape_cast %4 : vector<1x1x256xf32> to vector<1x256xf32>
    %6 = vector.broadcast %5 : vector<1x256xf32> to vector<64x256xf32>
    %7 = arith.addf %3, %6 : vector<64x256xf32>
    %c0_7 = arith.constant 0 : index
    %c0_8 = arith.constant 0 : index
    %8 = vector.load %arg8[%c0_7, %c0_8] : memref<64x256xf32, #tpu.memory_space<vmem>>, vector<64x256xf32>
    tpu.vector_store %arg8[%c0_7, %c0_8], %7 {strides = array<i32>} : memref<64x256xf32, #tpu.memory_space<vmem>>, vector<64x256xf32>,
    %c0_9 = arith.constant 0 : index
    %c0_10 = arith.constant 0 : index
    %c0_11 = arith.constant 0 : index
    %9 = vector.load %arg2[%c0_9, %c0_10, %c0_11] : memref<3x64x256xbf16, #tpu.memory_space<vmem>>, vector<1x64x256xbf16>
    %10 = vector.shape_cast %9 : vector<1x64x256xbf16> to vector<64x256xbf16>
    %cst_12 = arith.constant 0.000000e+00 : f32
    %11 = vector.broadcast %cst_12 : f32 to vector<8x64xf32>
    %c0_13 = arith.constant 0 : index
    %c0_14 = arith.constant 0 : index
    %12 = vector.load %arg8[%c0_13, %c0_14] : memref<64x256xf32, #tpu.memory_space<vmem>>, vector<8x256xf32>
    %13 = math.tanh %12 : vector<8x256xf32>
    %14 = vector.extract_strided_slice %13 {offsets = [0, 0], sizes = [8, 64], strides = [1, 1]} : vector<8x256xf32> to vector<8x64xf32>
    %cst_15 = arith.constant 5.000000e-01 : f32
    %15 = vector.broadcast %cst_15 : f32 to vector<8x64xf32>
    %16 = arith.mulf %15, %14 : vector<8x64xf32>
    %cst_16 = arith.constant 5.000000e-01 : f32
    %17 = vector.broadcast %cst_16 : f32 to vector<8x64xf32>
    %18 = arith.addf %16, %17 : vector<8x64xf32>
    %19 = vector.extract_strided_slice %13 {offsets = [0, 64], sizes = [8, 64], strides = [1, 1]} : vector<8x256xf32> to vector<8x64xf32>
    %cst_17 = arith.constant 5.000000e-01 : f32
    %20 = vector.broadcast %cst_17 : f32 to vector<8x64xf32>
    %21 = arith.mulf %20, %19 : vector<8x64xf32>
    %cst_18 = arith.constant 5.000000e-01 : f32
    %22 = vector.broadcast %cst_18 : f32 to vector<8x64xf32>
    %23 = arith.addf %21, %22 : vector<8x64xf32>
    %24 = vector.extract_strided_slice %13 {offsets = [0, 128], sizes = [8, 64], strides = [1, 1]} : vector<8x256xf32> to vector<8x64xf32>
    %25 = vector.extract_strided_slice %13 {offsets = [0, 192], sizes = [8, 64], strides = [1, 1]} : vector<8x256xf32> to vector<8x64xf32>
    %cst_19 = arith.constant 5.000000e-01 : f32
    %26 = vector.broadcast %cst_19 : f32 to vector<8x64xf32>
    %27 = arith.mulf %26, %25 : vector<8x64xf32>
    %cst_20 = arith.constant 5.000000e-01 : f32
    %28 = vector.broadcast %cst_20 : f32 to vector<8x64xf32>
    %29 = arith.addf %27, %28 : vector<8x64xf32>
    %30 = arith.mulf %23, %11 : vector<8x64xf32>
    %31 = arith.mulf %18, %24 : vector<8x64xf32>
    %32 = arith.addf %30, %31 : vector<8x64xf32>
    %33 = math.tanh %32 : vector<8x64xf32>
    %34 = arith.mulf %29, %33 : vector<8x64xf32>
    %35 = arith.truncf %34 : vector<8x64xf32> to vector<8x64xbf16>
    %c0_21 = arith.constant 0 : index
    %c0_22 = arith.constant 0 : index
    %36 = vector.load %arg7[%c0_21, %c0_22] : memref<64x64xbf16, #tpu.memory_space<vmem>>, vector<8x64xbf16>
    tpu.vector_store %arg7[%c0_21, %c0_22], %35 {strides = array<i32>} : memref<64x64xbf16, #tpu.memory_space<vmem>>, vector<8x64xbf16>,
    %c8 = arith.constant 8 : index
    %c0_23 = arith.constant 0 : index
    %37 = vector.load %arg8[%c8, %c0_23] : memref<64x256xf32, #tpu.memory_space<vmem>>, vector<8x256xf32>
    %cst_24 = arith.constant dense<0.000000e+00> : vector<8x256xf32>
    %38 = tpu.matmul %35, %10, %cst_24 {dimension_numbers = #tpu.dot_dimension_numbers<[1], [0], [0], [1], [0, 0, 1, 1], [], []>} : vector<8x64xbf16>, vector<64x256xbf16>, vector<8x256xf32> -> vector<8x256xf32>
    %39 = arith.addf %37, %38 : vector<8x256xf32>
    %40 = math.tanh %39 : vector<8x256xf32>
    %41 = vector.extract_strided_slice %40 {offsets = [0, 0], sizes = [8, 64], strides = [1, 1]} : vector<8x256xf32> to vector<8x64xf32>
    %cst_25 = arith.constant 5.000000e-01 : f32
    %42 = vector.broadcast %cst_25 : f32 to vector<8x64xf32>
    %43 = arith.mulf %42, %41 : vector<8x64xf32>
    %cst_26 = arith.constant 5.000000e-01 : f32
    %44 = vector.broadcast %cst_26 : f32 to vector<8x64xf32>
    %45 = arith.addf %43, %44 : vector<8x64xf32>
    %46 = vector.extract_strided_slice %40 {offsets = [0, 64], sizes = [8, 64], strides = [1, 1]} : vector<8x256xf32> to vector<8x64xf32>
    %cst_27 = arith.constant 5.000000e-01 : f32
    %47 = vector.broadcast %cst_27 : f32 to vector<8x64xf32>
    %48 = arith.mulf %47, %46 : vector<8x64xf32>
    %cst_28 = arith.constant 5.000000e-01 : f32
    %49 = vector.broadcast %cst_28 : f32 to vector<8x64xf32>
    %50 = arith.addf %48, %49 : vector<8x64xf32>
    %51 = vector.extract_strided_slice %40 {offsets = [0, 128], sizes = [8, 64], strides = [1, 1]} : vector<8x256xf32> to vector<8x64xf32>
    %52 = vector.extract_strided_slice %40 {offsets = [0, 192], sizes = [8, 64], strides = [1, 1]} : vector<8x256xf32> to vector<8x64xf32>
    %cst_29 = arith.constant 5.000000e-01 : f32
    %53 = vector.broadcast %cst_29 : f32 to vector<8x64xf32>
    %54 = arith.mulf %53, %52 : vector<8x64xf32>
    %cst_30 = arith.constant 5.000000e-01 : f32
    %55 = vector.broadcast %cst_30 : f32 to vector<8x64xf32>
    %56 = arith.addf %54, %55 : vector<8x64xf32>
    %57 = arith.mulf %50, %32 : vector<8x64xf32>
    %58 = arith.mulf %45, %51 : vector<8x64xf32>
    %59 = arith.addf %57, %58 : vector<8x64xf32>
    %60 = math.tanh %59 : vector<8x64xf32>
    %61 = arith.mulf %56, %60 : vector<8x64xf32>
    %62 = arith.truncf %61 : vector<8x64xf32> to vector<8x64xbf16>
    %c8_31 = arith.constant 8 : index
    %c0_32 = arith.constant 0 : index
    %63 = vector.load %arg7[%c8_31, %c0_32] : memref<64x64xbf16, #tpu.memory_space<vmem>>, vector<8x64xbf16>
    tpu.vector_store %arg7[%c8_31, %c0_32], %62 {strides = array<i32>} : memref<64x64xbf16, #tpu.memory_space<vmem>>, vector<8x64xbf16>,
    %c16 = arith.constant 16 : index
    %c0_33 = arith.constant 0 : index
    %64 = vector.load %arg8[%c16, %c0_33] : memref<64x256xf32, #tpu.memory_space<vmem>>, vector<8x256xf32>
    %cst_34 = arith.constant dense<0.000000e+00> : vector<8x256xf32>
    %65 = tpu.matmul %62, %10, %cst_34 {dimension_numbers = #tpu.dot_dimension_numbers<[1], [0], [0], [1], [0, 0, 1, 1], [], []>} : vector<8x64xbf16>, vector<64x256xbf16>, vector<8x256xf32> -> vector<8x256xf32>
    %66 = arith.addf %64, %65 : vector<8x256xf32>
    %67 = math.tanh %66 : vector<8x256xf32>
    %68 = vector.extract_strided_slice %67 {offsets = [0, 0], sizes = [8, 64], strides = [1, 1]} : vector<8x256xf32> to vector<8x64xf32>
    %cst_35 = arith.constant 5.000000e-01 : f32
    %69 = vector.broadcast %cst_35 : f32 to vector<8x64xf32>
    %70 = arith.mulf %69, %68 : vector<8x64xf32>
    %cst_36 = arith.constant 5.000000e-01 : f32
    %71 = vector.broadcast %cst_36 : f32 to vector<8x64xf32>
    %72 = arith.addf %70, %71 : vector<8x64xf32>
    %73 = vector.extract_strided_slice %67 {offsets = [0, 64], sizes = [8, 64], strides = [1, 1]} : vector<8x256xf32> to vector<8x64xf32>
    %cst_37 = arith.constant 5.000000e-01 : f32
    %74 = vector.broadcast %cst_37 : f32 to vector<8x64xf32>
    %75 = arith.mulf %74, %73 : vector<8x64xf32>
    %cst_38 = arith.constant 5.000000e-01 : f32
    %76 = vector.broadcast %cst_38 : f32 to vector<8x64xf32>
    %77 = arith.addf %75, %76 : vector<8x64xf32>
    %78 = vector.extract_strided_slice %67 {offsets = [0, 128], sizes = [8, 64], strides = [1, 1]} : vector<8x256xf32> to vector<8x64xf32>
    %79 = vector.extract_strided_slice %67 {offsets = [0, 192], sizes = [8, 64], strides = [1, 1]} : vector<8x256xf32> to vector<8x64xf32>
    %cst_39 = arith.constant 5.000000e-01 : f32
    %80 = vector.broadcast %cst_39 : f32 to vector<8x64xf32>
    %81 = arith.mulf %80, %79 : vector<8x64xf32>
    %cst_40 = arith.constant 5.000000e-01 : f32
    %82 = vector.broadcast %cst_40 : f32 to vector<8x64xf32>
    %83 = arith.addf %81, %82 : vector<8x64xf32>
    %84 = arith.mulf %77, %59 : vector<8x64xf32>
    %85 = arith.mulf %72, %78 : vector<8x64xf32>
    %86 = arith.addf %84, %85 : vector<8x64xf32>
    %87 = math.tanh %86 : vector<8x64xf32>
    %88 = arith.mulf %83, %87 : vector<8x64xf32>
    %89 = arith.truncf %88 : vector<8x64xf32> to vector<8x64xbf16>
    %c16_41 = arith.constant 16 : index
    %c0_42 = arith.constant 0 : index
    %90 = vector.load %arg7[%c16_41, %c0_42] : memref<64x64xbf16, #tpu.memory_space<vmem>>, vector<8x64xbf16>
    tpu.vector_store %arg7[%c16_41, %c0_42], %89 {strides = array<i32>} : memref<64x64xbf16, #tpu.memory_space<vmem>>, vector<8x64xbf16>,
    %c24 = arith.constant 24 : index
    %c0_43 = arith.constant 0 : index
    %91 = vector.load %arg8[%c24, %c0_43] : memref<64x256xf32, #tpu.memory_space<vmem>>, vector<8x256xf32>
    %cst_44 = arith.constant dense<0.000000e+00> : vector<8x256xf32>
    %92 = tpu.matmul %89, %10, %cst_44 {dimension_numbers = #tpu.dot_dimension_numbers<[1], [0], [0], [1], [0, 0, 1, 1], [], []>} : vector<8x64xbf16>, vector<64x256xbf16>, vector<8x256xf32> -> vector<8x256xf32>
    %93 = arith.addf %91, %92 : vector<8x256xf32>
    %94 = math.tanh %93 : vector<8x256xf32>
    %95 = vector.extract_strided_slice %94 {offsets = [0, 0], sizes = [8, 64], strides = [1, 1]} : vector<8x256xf32> to vector<8x64xf32>
    %cst_45 = arith.constant 5.000000e-01 : f32
    %96 = vector.broadcast %cst_45 : f32 to vector<8x64xf32>
    %97 = arith.mulf %96, %95 : vector<8x64xf32>
    %cst_46 = arith.constant 5.000000e-01 : f32
    %98 = vector.broadcast %cst_46 : f32 to vector<8x64xf32>
    %99 = arith.addf %97, %98 : vector<8x64xf32>
    %100 = vector.extract_strided_slice %94 {offsets = [0, 64], sizes = [8, 64], strides = [1, 1]} : vector<8x256xf32> to vector<8x64xf32>
    %cst_47 = arith.constant 5.000000e-01 : f32
    %101 = vector.broadcast %cst_47 : f32 to vector<8x64xf32>
    %102 = arith.mulf %101, %100 : vector<8x64xf32>
    %cst_48 = arith.constant 5.000000e-01 : f32
    %103 = vector.broadcast %cst_48 : f32 to vector<8x64xf32>
    %104 = arith.addf %102, %103 : vector<8x64xf32>
    %105 = vector.extract_strided_slice %94 {offsets = [0, 128], sizes = [8, 64], strides = [1, 1]} : vector<8x256xf32> to vector<8x64xf32>
    %106 = vector.extract_strided_slice %94 {offsets = [0, 192], sizes = [8, 64], strides = [1, 1]} : vector<8x256xf32> to vector<8x64xf32>
    %cst_49 = arith.constant 5.000000e-01 : f32
    %107 = vector.broadcast %cst_49 : f32 to vector<8x64xf32>
    %108 = arith.mulf %107, %106 : vector<8x64xf32>
    %cst_50 = arith.constant 5.000000e-01 : f32
    %109 = vector.broadcast %cst_50 : f32 to vector<8x64xf32>
    %110 = arith.addf %108, %109 : vector<8x64xf32>
    %111 = arith.mulf %104, %86 : vector<8x64xf32>
    %112 = arith.mulf %99, %105 : vector<8x64xf32>
    %113 = arith.addf %111, %112 : vector<8x64xf32>
    %114 = math.tanh %113 : vector<8x64xf32>
    %115 = arith.mulf %110, %114 : vector<8x64xf32>
    %116 = arith.truncf %115 : vector<8x64xf32> to vector<8x64xbf16>
    %c24_51 = arith.constant 24 : index
    %c0_52 = arith.constant 0 : index
    %117 = vector.load %arg7[%c24_51, %c0_52] : memref<64x64xbf16, #tpu.memory_space<vmem>>, vector<8x64xbf16>
    tpu.vector_store %arg7[%c24_51, %c0_52], %116 {strides = array<i32>} : memref<64x64xbf16, #tpu.memory_space<vmem>>, vector<8x64xbf16>,
    %c32 = arith.constant 32 : index
    %c0_53 = arith.constant 0 : index
    %118 = vector.load %arg8[%c32, %c0_53] : memref<64x256xf32, #tpu.memory_space<vmem>>, vector<8x256xf32>
    %cst_54 = arith.constant dense<0.000000e+00> : vector<8x256xf32>
    %119 = tpu.matmul %116, %10, %cst_54 {dimension_numbers = #tpu.dot_dimension_numbers<[1], [0], [0], [1], [0, 0, 1, 1], [], []>} : vector<8x64xbf16>, vector<64x256xbf16>, vector<8x256xf32> -> vector<8x256xf32>
    %120 = arith.addf %118, %119 : vector<8x256xf32>
    %121 = math.tanh %120 : vector<8x256xf32>
    %122 = vector.extract_strided_slice %121 {offsets = [0, 0], sizes = [8, 64], strides = [1, 1]} : vector<8x256xf32> to vector<8x64xf32>
    %cst_55 = arith.constant 5.000000e-01 : f32
    %123 = vector.broadcast %cst_55 : f32 to vector<8x64xf32>
    %124 = arith.mulf %123, %122 : vector<8x64xf32>
    %cst_56 = arith.constant 5.000000e-01 : f32
    %125 = vector.broadcast %cst_56 : f32 to vector<8x64xf32>
    %126 = arith.addf %124, %125 : vector<8x64xf32>
    %127 = vector.extract_strided_slice %121 {offsets = [0, 64], sizes = [8, 64], strides = [1, 1]} : vector<8x256xf32> to vector<8x64xf32>
    %cst_57 = arith.constant 5.000000e-01 : f32
    %128 = vector.broadcast %cst_57 : f32 to vector<8x64xf32>
    %129 = arith.mulf %128, %127 : vector<8x64xf32>
    %cst_58 = arith.constant 5.000000e-01 : f32
    %130 = vector.broadcast %cst_58 : f32 to vector<8x64xf32>
    %131 = arith.addf %129, %130 : vector<8x64xf32>
    %132 = vector.extract_strided_slice %121 {offsets = [0, 128], sizes = [8, 64], strides = [1, 1]} : vector<8x256xf32> to vector<8x64xf32>
    %133 = vector.extract_strided_slice %121 {offsets = [0, 192], sizes = [8, 64], strides = [1, 1]} : vector<8x256xf32> to vector<8x64xf32>
    %cst_59 = arith.constant 5.000000e-01 : f32
    %134 = vector.broadcast %cst_59 : f32 to vector<8x64xf32>
    %135 = arith.mulf %134, %133 : vector<8x64xf32>
    %cst_60 = arith.constant 5.000000e-01 : f32
    %136 = vector.broadcast %cst_60 : f32 to vector<8x64xf32>
    %137 = arith.addf %135, %136 : vector<8x64xf32>
    %138 = arith.mulf %131, %113 : vector<8x64xf32>
    %139 = arith.mulf %126, %132 : vector<8x64xf32>
    %140 = arith.addf %138, %139 : vector<8x64xf32>
    %141 = math.tanh %140 : vector<8x64xf32>
    %142 = arith.mulf %137, %141 : vector<8x64xf32>
    %143 = arith.truncf %142 : vector<8x64xf32> to vector<8x64xbf16>
    %c32_61 = arith.constant 32 : index
    %c0_62 = arith.constant 0 : index
    %144 = vector.load %arg7[%c32_61, %c0_62] : memref<64x64xbf16, #tpu.memory_space<vmem>>, vector<8x64xbf16>
    tpu.vector_store %arg7[%c32_61, %c0_62], %143 {strides = array<i32>} : memref<64x64xbf16, #tpu.memory_space<vmem>>, vector<8x64xbf16>,
    %c40 = arith.constant 40 : index
    %c0_63 = arith.constant 0 : index
    %145 = vector.load %arg8[%c40, %c0_63] : memref<64x256xf32, #tpu.memory_space<vmem>>, vector<8x256xf32>
    %cst_64 = arith.constant dense<0.000000e+00> : vector<8x256xf32>
    %146 = tpu.matmul %143, %10, %cst_64 {dimension_numbers = #tpu.dot_dimension_numbers<[1], [0], [0], [1], [0, 0, 1, 1], [], []>} : vector<8x64xbf16>, vector<64x256xbf16>, vector<8x256xf32> -> vector<8x256xf32>
    %147 = arith.addf %145, %146 : vector<8x256xf32>
    %148 = math.tanh %147 : vector<8x256xf32>
    %149 = vector.extract_strided_slice %148 {offsets = [0, 0], sizes = [8, 64], strides = [1, 1]} : vector<8x256xf32> to vector<8x64xf32>
    %cst_65 = arith.constant 5.000000e-01 : f32
    %150 = vector.broadcast %cst_65 : f32 to vector<8x64xf32>
    %151 = arith.mulf %150, %149 : vector<8x64xf32>
    %cst_66 = arith.constant 5.000000e-01 : f32
    %152 = vector.broadcast %cst_66 : f32 to vector<8x64xf32>
    %153 = arith.addf %151, %152 : vector<8x64xf32>
    %154 = vector.extract_strided_slice %148 {offsets = [0, 64], sizes = [8, 64], strides = [1, 1]} : vector<8x256xf32> to vector<8x64xf32>
    %cst_67 = arith.constant 5.000000e-01 : f32
    %155 = vector.broadcast %cst_67 : f32 to vector<8x64xf32>
    %156 = arith.mulf %155, %154 : vector<8x64xf32>
    %cst_68 = arith.constant 5.000000e-01 : f32
    %157 = vector.broadcast %cst_68 : f32 to vector<8x64xf32>
    %158 = arith.addf %156, %157 : vector<8x64xf32>
    %159 = vector.extract_strided_slice %148 {offsets = [0, 128], sizes = [8, 64], strides = [1, 1]} : vector<8x256xf32> to vector<8x64xf32>
    %160 = vector.extract_strided_slice %148 {offsets = [0, 192], sizes = [8, 64], strides = [1, 1]} : vector<8x256xf32> to vector<8x64xf32>
    %cst_69 = arith.constant 5.000000e-01 : f32
    %161 = vector.broadcast %cst_69 : f32 to vector<8x64xf32>
    %162 = arith.mulf %161, %160 : vector<8x64xf32>
    %cst_70 = arith.constant 5.000000e-01 : f32
    %163 = vector.broadcast %cst_70 : f32 to vector<8x64xf32>
    %164 = arith.addf %162, %163 : vector<8x64xf32>
    %165 = arith.mulf %158, %140 : vector<8x64xf32>
    %166 = arith.mulf %153, %159 : vector<8x64xf32>
    %167 = arith.addf %165, %166 : vector<8x64xf32>
    %168 = math.tanh %167 : vector<8x64xf32>
    %169 = arith.mulf %164, %168 : vector<8x64xf32>
    %170 = arith.truncf %169 : vector<8x64xf32> to vector<8x64xbf16>
    %c40_71 = arith.constant 40 : index
    %c0_72 = arith.constant 0 : index
    %171 = vector.load %arg7[%c40_71, %c0_72] : memref<64x64xbf16, #tpu.memory_space<vmem>>, vector<8x64xbf16>
    tpu.vector_store %arg7[%c40_71, %c0_72], %170 {strides = array<i32>} : memref<64x64xbf16, #tpu.memory_space<vmem>>, vector<8x64xbf16>,
    %c48 = arith.constant 48 : index
    %c0_73 = arith.constant 0 : index
    %172 = vector.load %arg8[%c48, %c0_73] : memref<64x256xf32, #tpu.memory_space<vmem>>, vector<8x256xf32>
    %cst_74 = arith.constant dense<0.000000e+00> : vector<8x256xf32>
    %173 = tpu.matmul %170, %10, %cst_74 {dimension_numbers = #tpu.dot_dimension_numbers<[1], [0], [0], [1], [0, 0, 1, 1], [], []>} : vector<8x64xbf16>, vector<64x256xbf16>, vector<8x256xf32> -> vector<8x256xf32>
    %174 = arith.addf %172, %173 : vector<8x256xf32>
    %175 = math.tanh %174 : vector<8x256xf32>
    %176 = vector.extract_strided_slice %175 {offsets = [0, 0], sizes = [8, 64], strides = [1, 1]} : vector<8x256xf32> to vector<8x64xf32>
    %cst_75 = arith.constant 5.000000e-01 : f32
    %177 = vector.broadcast %cst_75 : f32 to vector<8x64xf32>
    %178 = arith.mulf %177, %176 : vector<8x64xf32>
    %cst_76 = arith.constant 5.000000e-01 : f32
    %179 = vector.broadcast %cst_76 : f32 to vector<8x64xf32>
    %180 = arith.addf %178, %179 : vector<8x64xf32>
    %181 = vector.extract_strided_slice %175 {offsets = [0, 64], sizes = [8, 64], strides = [1, 1]} : vector<8x256xf32> to vector<8x64xf32>
    %cst_77 = arith.constant 5.000000e-01 : f32
    %182 = vector.broadcast %cst_77 : f32 to vector<8x64xf32>
    %183 = arith.mulf %182, %181 : vector<8x64xf32>
    %cst_78 = arith.constant 5.000000e-01 : f32
    %184 = vector.broadcast %cst_78 : f32 to vector<8x64xf32>
    %185 = arith.addf %183, %184 : vector<8x64xf32>
    %186 = vector.extract_strided_slice %175 {offsets = [0, 128], sizes = [8, 64], strides = [1, 1]} : vector<8x256xf32> to vector<8x64xf32>
    %187 = vector.extract_strided_slice %175 {offsets = [0, 192], sizes = [8, 64], strides = [1, 1]} : vector<8x256xf32> to vector<8x64xf32>
    %cst_79 = arith.constant 5.000000e-01 : f32
    %188 = vector.broadcast %cst_79 : f32 to vector<8x64xf32>
    %189 = arith.mulf %188, %187 : vector<8x64xf32>
    %cst_80 = arith.constant 5.000000e-01 : f32
    %190 = vector.broadcast %cst_80 : f32 to vector<8x64xf32>
    %191 = arith.addf %189, %190 : vector<8x64xf32>
    %192 = arith.mulf %185, %167 : vector<8x64xf32>
    %193 = arith.mulf %180, %186 : vector<8x64xf32>
    %194 = arith.addf %192, %193 : vector<8x64xf32>
    %195 = math.tanh %194 : vector<8x64xf32>
    %196 = arith.mulf %191, %195 : vector<8x64xf32>
    %197 = arith.truncf %196 : vector<8x64xf32> to vector<8x64xbf16>
    %c48_81 = arith.constant 48 : index
    %c0_82 = arith.constant 0 : index
    %198 = vector.load %arg7[%c48_81, %c0_82] : memref<64x64xbf16, #tpu.memory_space<vmem>>, vector<8x64xbf16>
    tpu.vector_store %arg7[%c48_81, %c0_82], %197 {strides = array<i32>} : memref<64x64xbf16, #tpu.memory_space<vmem>>, vector<8x64xbf16>,
    %c56 = arith.constant 56 : index
    %c0_83 = arith.constant 0 : index
    %199 = vector.load %arg8[%c56, %c0_83] : memref<64x256xf32, #tpu.memory_space<vmem>>, vector<8x256xf32>
    %cst_84 = arith.constant dense<0.000000e+00> : vector<8x256xf32>
    %200 = tpu.matmul %197, %10, %cst_84 {dimension_numbers = #tpu.dot_dimension_numbers<[1], [0], [0], [1], [0, 0, 1, 1], [], []>} : vector<8x64xbf16>, vector<64x256xbf16>, vector<8x256xf32> -> vector<8x256xf32>
    %201 = arith.addf %199, %200 : vector<8x256xf32>
    %202 = math.tanh %201 : vector<8x256xf32>
    %203 = vector.extract_strided_slice %202 {offsets = [0, 0], sizes = [8, 64], strides = [1, 1]} : vector<8x256xf32> to vector<8x64xf32>
    %cst_85 = arith.constant 5.000000e-01 : f32
    %204 = vector.broadcast %cst_85 : f32 to vector<8x64xf32>
    %205 = arith.mulf %204, %203 : vector<8x64xf32>
    %cst_86 = arith.constant 5.000000e-01 : f32
    %206 = vector.broadcast %cst_86 : f32 to vector<8x64xf32>
    %207 = arith.addf %205, %206 : vector<8x64xf32>
    %208 = vector.extract_strided_slice %202 {offsets = [0, 64], sizes = [8, 64], strides = [1, 1]} : vector<8x256xf32> to vector<8x64xf32>
    %cst_87 = arith.constant 5.000000e-01 : f32
    %209 = vector.broadcast %cst_87 : f32 to vector<8x64xf32>
    %210 = arith.mulf %209, %208 : vector<8x64xf32>
    %cst_88 = arith.constant 5.000000e-01 : f32
    %211 = vector.broadcast %cst_88 : f32 to vector<8x64xf32>
    %212 = arith.addf %210, %211 : vector<8x64xf32>
    %213 = vector.extract_strided_slice %202 {offsets = [0, 128], sizes = [8, 64], strides = [1, 1]} : vector<8x256xf32> to vector<8x64xf32>
    %214 = vector.extract_strided_slice %202 {offsets = [0, 192], sizes = [8, 64], strides = [1, 1]} : vector<8x256xf32> to vector<8x64xf32>
    %cst_89 = arith.constant 5.000000e-01 : f32
    %215 = vector.broadcast %cst_89 : f32 to vector<8x64xf32>
    %216 = arith.mulf %215, %214 : vector<8x64xf32>
    %cst_90 = arith.constant 5.000000e-01 : f32
    %217 = vector.broadcast %cst_90 : f32 to vector<8x64xf32>
    %218 = arith.addf %216, %217 : vector<8x64xf32>
    %219 = arith.mulf %212, %194 : vector<8x64xf32>
    %220 = arith.mulf %207, %213 : vector<8x64xf32>
    %221 = arith.addf %219, %220 : vector<8x64xf32>
    %222 = math.tanh %221 : vector<8x64xf32>
    %223 = arith.mulf %218, %222 : vector<8x64xf32>
    %224 = arith.truncf %223 : vector<8x64xf32> to vector<8x64xbf16>
    %c56_91 = arith.constant 56 : index
    %c0_92 = arith.constant 0 : index
    %225 = vector.load %arg7[%c56_91, %c0_92] : memref<64x64xbf16, #tpu.memory_space<vmem>>, vector<8x64xbf16>
    tpu.vector_store %arg7[%c56_91, %c0_92], %224 {strides = array<i32>} : memref<64x64xbf16, #tpu.memory_space<vmem>>, vector<8x64xbf16>,
    %c0_93 = arith.constant 0 : index
    %c0_94 = arith.constant 0 : index
    %226 = vector.load %arg7[%c0_93, %c0_94] : memref<64x64xbf16, #tpu.memory_space<vmem>>, vector<64x64xbf16>
    %c1 = arith.constant 1 : index
    %c0_95 = arith.constant 0 : index
    %c0_96 = arith.constant 0 : index
    %227 = vector.load %arg1[%c1, %c0_95, %c0_96] : memref<3x64x256xbf16, #tpu.memory_space<vmem>>, vector<1x64x256xbf16>
    %228 = vector.shape_cast %227 : vector<1x64x256xbf16> to vector<64x256xbf16>
    %cst_97 = arith.constant dense<0.000000e+00> : vector<64x256xf32>
    %229 = tpu.matmul %226, %228, %cst_97 {dimension_numbers = #tpu.dot_dimension_numbers<[1], [0], [0], [1], [0, 0, 1, 1], [], []>} : vector<64x64xbf16>, vector<64x256xbf16>, vector<64x256xf32> -> vector<64x256xf32>
    %c1_98 = arith.constant 1 : index
    %c0_99 = arith.constant 0 : index
    %c0_100 = arith.constant 0 : index
    %230 = vector.load %arg3[%c1_98, %c0_99, %c0_100] : memref<3x1x256xf32, #tpu.memory_space<vmem>>, vector<1x1x256xf32>
    %231 = vector.shape_cast %230 : vector<1x1x256xf32> to vector<1x256xf32>
    %232 = vector.broadcast %231 : vector<1x256xf32> to vector<64x256xf32>
    %233 = arith.addf %229, %232 : vector<64x256xf32>
    %c0_101 = arith.constant 0 : index
    %c0_102 = arith.constant 0 : index
    %234 = vector.load %arg8[%c0_101, %c0_102] : memref<64x256xf32, #tpu.memory_space<vmem>>, vector<64x256xf32>
    tpu.vector_store %arg8[%c0_101, %c0_102], %233 {strides = array<i32>} : memref<64x256xf32, #tpu.memory_space<vmem>>, vector<64x256xf32>,
    %c1_103 = arith.constant 1 : index
    %c0_104 = arith.constant 0 : index
    %c0_105 = arith.constant 0 : index
    %235 = vector.load %arg2[%c1_103, %c0_104, %c0_105] : memref<3x64x256xbf16, #tpu.memory_space<vmem>>, vector<1x64x256xbf16>
    %236 = vector.shape_cast %235 : vector<1x64x256xbf16> to vector<64x256xbf16>
    %cst_106 = arith.constant 0.000000e+00 : f32
    %237 = vector.broadcast %cst_106 : f32 to vector<8x64xf32>
    %c0_107 = arith.constant 0 : index
    %c0_108 = arith.constant 0 : index
    %238 = vector.load %arg8[%c0_107, %c0_108] : memref<64x256xf32, #tpu.memory_space<vmem>>, vector<8x256xf32>
    %239 = math.tanh %238 : vector<8x256xf32>
    %240 = vector.extract_strided_slice %239 {offsets = [0, 0], sizes = [8, 64], strides = [1, 1]} : vector<8x256xf32> to vector<8x64xf32>
    %cst_109 = arith.constant 5.000000e-01 : f32
    %241 = vector.broadcast %cst_109 : f32 to vector<8x64xf32>
    %242 = arith.mulf %241, %240 : vector<8x64xf32>
    %cst_110 = arith.constant 5.000000e-01 : f32
    %243 = vector.broadcast %cst_110 : f32 to vector<8x64xf32>
    %244 = arith.addf %242, %243 : vector<8x64xf32>
    %245 = vector.extract_strided_slice %239 {offsets = [0, 64], sizes = [8, 64], strides = [1, 1]} : vector<8x256xf32> to vector<8x64xf32>
    %cst_111 = arith.constant 5.000000e-01 : f32
    %246 = vector.broadcast %cst_111 : f32 to vector<8x64xf32>
    %247 = arith.mulf %246, %245 : vector<8x64xf32>
    %cst_112 = arith.constant 5.000000e-01 : f32
    %248 = vector.broadcast %cst_112 : f32 to vector<8x64xf32>
    %249 = arith.addf %247, %248 : vector<8x64xf32>
    %250 = vector.extract_strided_slice %239 {offsets = [0, 128], sizes = [8, 64], strides = [1, 1]} : vector<8x256xf32> to vector<8x64xf32>
    %251 = vector.extract_strided_slice %239 {offsets = [0, 192], sizes = [8, 64], strides = [1, 1]} : vector<8x256xf32> to vector<8x64xf32>
    %cst_113 = arith.constant 5.000000e-01 : f32
    %252 = vector.broadcast %cst_113 : f32 to vector<8x64xf32>
    %253 = arith.mulf %252, %251 : vector<8x64xf32>
    %cst_114 = arith.constant 5.000000e-01 : f32
    %254 = vector.broadcast %cst_114 : f32 to vector<8x64xf32>
    %255 = arith.addf %253, %254 : vector<8x64xf32>
    %256 = arith.mulf %249, %237 : vector<8x64xf32>
    %257 = arith.mulf %244, %250 : vector<8x64xf32>
    %258 = arith.addf %256, %257 : vector<8x64xf32>
    %259 = math.tanh %258 : vector<8x64xf32>
    %260 = arith.mulf %255, %259 : vector<8x64xf32>
    %261 = arith.truncf %260 : vector<8x64xf32> to vector<8x64xbf16>
    %c0_115 = arith.constant 0 : index
    %c0_116 = arith.constant 0 : index
    %262 = vector.load %arg7[%c0_115, %c0_116] : memref<64x64xbf16, #tpu.memory_space<vmem>>, vector<8x64xbf16>
    tpu.vector_store %arg7[%c0_115, %c0_116], %261 {strides = array<i32>} : memref<64x64xbf16, #tpu.memory_space<vmem>>, vector<8x64xbf16>,
    %c8_117 = arith.constant 8 : index
    %c0_118 = arith.constant 0 : index
    %263 = vector.load %arg8[%c8_117, %c0_118] : memref<64x256xf32, #tpu.memory_space<vmem>>, vector<8x256xf32>
    %cst_119 = arith.constant dense<0.000000e+00> : vector<8x256xf32>
    %264 = tpu.matmul %261, %236, %cst_119 {dimension_numbers = #tpu.dot_dimension_numbers<[1], [0], [0], [1], [0, 0, 1, 1], [], []>} : vector<8x64xbf16>, vector<64x256xbf16>, vector<8x256xf32> -> vector<8x256xf32>
    %265 = arith.addf %263, %264 : vector<8x256xf32>
    %266 = math.tanh %265 : vector<8x256xf32>
    %267 = vector.extract_strided_slice %266 {offsets = [0, 0], sizes = [8, 64], strides = [1, 1]} : vector<8x256xf32> to vector<8x64xf32>
    %cst_120 = arith.constant 5.000000e-01 : f32
    %268 = vector.broadcast %cst_120 : f32 to vector<8x64xf32>
    %269 = arith.mulf %268, %267 : vector<8x64xf32>
    %cst_121 = arith.constant 5.000000e-01 : f32
    %270 = vector.broadcast %cst_121 : f32 to vector<8x64xf32>
    %271 = arith.addf %269, %270 : vector<8x64xf32>
    %272 = vector.extract_strided_slice %266 {offsets = [0, 64], sizes = [8, 64], strides = [1, 1]} : vector<8x256xf32> to vector<8x64xf32>
    %cst_122 = arith.constant 5.000000e-01 : f32
    %273 = vector.broadcast %cst_122 : f32 to vector<8x64xf32>
    %274 = arith.mulf %273, %272 : vector<8x64xf32>
    %cst_123 = arith.constant 5.000000e-01 : f32
    %275 = vector.broadcast %cst_123 : f32 to vector<8x64xf32>
    %276 = arith.addf %274, %275 : vector<8x64xf32>
    %277 = vector.extract_strided_slice %266 {offsets = [0, 128], sizes = [8, 64], strides = [1, 1]} : vector<8x256xf32> to vector<8x64xf32>
    %278 = vector.extract_strided_slice %266 {offsets = [0, 192], sizes = [8, 64], strides = [1, 1]} : vector<8x256xf32> to vector<8x64xf32>
    %cst_124 = arith.constant 5.000000e-01 : f32
    %279 = vector.broadcast %cst_124 : f32 to vector<8x64xf32>
    %280 = arith.mulf %279, %278 : vector<8x64xf32>
    %cst_125 = arith.constant 5.000000e-01 : f32
    %281 = vector.broadcast %cst_125 : f32 to vector<8x64xf32>
    %282 = arith.addf %280, %281 : vector<8x64xf32>
    %283 = arith.mulf %276, %258 : vector<8x64xf32>
    %284 = arith.mulf %271, %277 : vector<8x64xf32>
    %285 = arith.addf %283, %284 : vector<8x64xf32>
    %286 = math.tanh %285 : vector<8x64xf32>
    %287 = arith.mulf %282, %286 : vector<8x64xf32>
    %288 = arith.truncf %287 : vector<8x64xf32> to vector<8x64xbf16>
    %c8_126 = arith.constant 8 : index
    %c0_127 = arith.constant 0 : index
    %289 = vector.load %arg7[%c8_126, %c0_127] : memref<64x64xbf16, #tpu.memory_space<vmem>>, vector<8x64xbf16>
    tpu.vector_store %arg7[%c8_126, %c0_127], %288 {strides = array<i32>} : memref<64x64xbf16, #tpu.memory_space<vmem>>, vector<8x64xbf16>,
    %c16_128 = arith.constant 16 : index
    %c0_129 = arith.constant 0 : index
    %290 = vector.load %arg8[%c16_128, %c0_129] : memref<64x256xf32, #tpu.memory_space<vmem>>, vector<8x256xf32>
    %cst_130 = arith.constant dense<0.000000e+00> : vector<8x256xf32>
    %291 = tpu.matmul %288, %236, %cst_130 {dimension_numbers = #tpu.dot_dimension_numbers<[1], [0], [0], [1], [0, 0, 1, 1], [], []>} : vector<8x64xbf16>, vector<64x256xbf16>, vector<8x256xf32> -> vector<8x256xf32>
    %292 = arith.addf %290, %291 : vector<8x256xf32>
    %293 = math.tanh %292 : vector<8x256xf32>
    %294 = vector.extract_strided_slice %293 {offsets = [0, 0], sizes = [8, 64], strides = [1, 1]} : vector<8x256xf32> to vector<8x64xf32>
    %cst_131 = arith.constant 5.000000e-01 : f32
    %295 = vector.broadcast %cst_131 : f32 to vector<8x64xf32>
    %296 = arith.mulf %295, %294 : vector<8x64xf32>
    %cst_132 = arith.constant 5.000000e-01 : f32
    %297 = vector.broadcast %cst_132 : f32 to vector<8x64xf32>
    %298 = arith.addf %296, %297 : vector<8x64xf32>
    %299 = vector.extract_strided_slice %293 {offsets = [0, 64], sizes = [8, 64], strides = [1, 1]} : vector<8x256xf32> to vector<8x64xf32>
    %cst_133 = arith.constant 5.000000e-01 : f32
    %300 = vector.broadcast %cst_133 : f32 to vector<8x64xf32>
    %301 = arith.mulf %300, %299 : vector<8x64xf32>
    %cst_134 = arith.constant 5.000000e-01 : f32
    %302 = vector.broadcast %cst_134 : f32 to vector<8x64xf32>
    %303 = arith.addf %301, %302 : vector<8x64xf32>
    %304 = vector.extract_strided_slice %293 {offsets = [0, 128], sizes = [8, 64], strides = [1, 1]} : vector<8x256xf32> to vector<8x64xf32>
    %305 = vector.extract_strided_slice %293 {offsets = [0, 192], sizes = [8, 64], strides = [1, 1]} : vector<8x256xf32> to vector<8x64xf32>
    %cst_135 = arith.constant 5.000000e-01 : f32
    %306 = vector.broadcast %cst_135 : f32 to vector<8x64xf32>
    %307 = arith.mulf %306, %305 : vector<8x64xf32>
    %cst_136 = arith.constant 5.000000e-01 : f32
    %308 = vector.broadcast %cst_136 : f32 to vector<8x64xf32>
    %309 = arith.addf %307, %308 : vector<8x64xf32>
    %310 = arith.mulf %303, %285 : vector<8x64xf32>
    %311 = arith.mulf %298, %304 : vector<8x64xf32>
    %312 = arith.addf %310, %311 : vector<8x64xf32>
    %313 = math.tanh %312 : vector<8x64xf32>
    %314 = arith.mulf %309, %313 : vector<8x64xf32>
    %315 = arith.truncf %314 : vector<8x64xf32> to vector<8x64xbf16>
    %c16_137 = arith.constant 16 : index
    %c0_138 = arith.constant 0 : index
    %316 = vector.load %arg7[%c16_137, %c0_138] : memref<64x64xbf16, #tpu.memory_space<vmem>>, vector<8x64xbf16>
    tpu.vector_store %arg7[%c16_137, %c0_138], %315 {strides = array<i32>} : memref<64x64xbf16, #tpu.memory_space<vmem>>, vector<8x64xbf16>,
    %c24_139 = arith.constant 24 : index
    %c0_140 = arith.constant 0 : index
    %317 = vector.load %arg8[%c24_139, %c0_140] : memref<64x256xf32, #tpu.memory_space<vmem>>, vector<8x256xf32>
    %cst_141 = arith.constant dense<0.000000e+00> : vector<8x256xf32>
    %318 = tpu.matmul %315, %236, %cst_141 {dimension_numbers = #tpu.dot_dimension_numbers<[1], [0], [0], [1], [0, 0, 1, 1], [], []>} : vector<8x64xbf16>, vector<64x256xbf16>, vector<8x256xf32> -> vector<8x256xf32>
    %319 = arith.addf %317, %318 : vector<8x256xf32>
    %320 = math.tanh %319 : vector<8x256xf32>
    %321 = vector.extract_strided_slice %320 {offsets = [0, 0], sizes = [8, 64], strides = [1, 1]} : vector<8x256xf32> to vector<8x64xf32>
    %cst_142 = arith.constant 5.000000e-01 : f32
    %322 = vector.broadcast %cst_142 : f32 to vector<8x64xf32>
    %323 = arith.mulf %322, %321 : vector<8x64xf32>
    %cst_143 = arith.constant 5.000000e-01 : f32
    %324 = vector.broadcast %cst_143 : f32 to vector<8x64xf32>
    %325 = arith.addf %323, %324 : vector<8x64xf32>
    %326 = vector.extract_strided_slice %320 {offsets = [0, 64], sizes = [8, 64], strides = [1, 1]} : vector<8x256xf32> to vector<8x64xf32>
    %cst_144 = arith.constant 5.000000e-01 : f32
    %327 = vector.broadcast %cst_144 : f32 to vector<8x64xf32>
    %328 = arith.mulf %327, %326 : vector<8x64xf32>
    %cst_145 = arith.constant 5.000000e-01 : f32
    %329 = vector.broadcast %cst_145 : f32 to vector<8x64xf32>
    %330 = arith.addf %328, %329 : vector<8x64xf32>
    %331 = vector.extract_strided_slice %320 {offsets = [0, 128], sizes = [8, 64], strides = [1, 1]} : vector<8x256xf32> to vector<8x64xf32>
    %332 = vector.extract_strided_slice %320 {offsets = [0, 192], sizes = [8, 64], strides = [1, 1]} : vector<8x256xf32> to vector<8x64xf32>
    %cst_146 = arith.constant 5.000000e-01 : f32
    %333 = vector.broadcast %cst_146 : f32 to vector<8x64xf32>
    %334 = arith.mulf %333, %332 : vector<8x64xf32>
    %cst_147 = arith.constant 5.000000e-01 : f32
    %335 = vector.broadcast %cst_147 : f32 to vector<8x64xf32>
    %336 = arith.addf %334, %335 : vector<8x64xf32>
    %337 = arith.mulf %330, %312 : vector<8x64xf32>
    %338 = arith.mulf %325, %331 : vector<8x64xf32>
    %339 = arith.addf %337, %338 : vector<8x64xf32>
    %340 = math.tanh %339 : vector<8x64xf32>
    %341 = arith.mulf %336, %340 : vector<8x64xf32>
    %342 = arith.truncf %341 : vector<8x64xf32> to vector<8x64xbf16>
    %c24_148 = arith.constant 24 : index
    %c0_149 = arith.constant 0 : index
    %343 = vector.load %arg7[%c24_148, %c0_149] : memref<64x64xbf16, #tpu.memory_space<vmem>>, vector<8x64xbf16>
    tpu.vector_store %arg7[%c24_148, %c0_149], %342 {strides = array<i32>} : memref<64x64xbf16, #tpu.memory_space<vmem>>, vector<8x64xbf16>,
    %c32_150 = arith.constant 32 : index
    %c0_151 = arith.constant 0 : index
    %344 = vector.load %arg8[%c32_150, %c0_151] : memref<64x256xf32, #tpu.memory_space<vmem>>, vector<8x256xf32>
    %cst_152 = arith.constant dense<0.000000e+00> : vector<8x256xf32>
    %345 = tpu.matmul %342, %236, %cst_152 {dimension_numbers = #tpu.dot_dimension_numbers<[1], [0], [0], [1], [0, 0, 1, 1], [], []>} : vector<8x64xbf16>, vector<64x256xbf16>, vector<8x256xf32> -> vector<8x256xf32>
    %346 = arith.addf %344, %345 : vector<8x256xf32>
    %347 = math.tanh %346 : vector<8x256xf32>
    %348 = vector.extract_strided_slice %347 {offsets = [0, 0], sizes = [8, 64], strides = [1, 1]} : vector<8x256xf32> to vector<8x64xf32>
    %cst_153 = arith.constant 5.000000e-01 : f32
    %349 = vector.broadcast %cst_153 : f32 to vector<8x64xf32>
    %350 = arith.mulf %349, %348 : vector<8x64xf32>
    %cst_154 = arith.constant 5.000000e-01 : f32
    %351 = vector.broadcast %cst_154 : f32 to vector<8x64xf32>
    %352 = arith.addf %350, %351 : vector<8x64xf32>
    %353 = vector.extract_strided_slice %347 {offsets = [0, 64], sizes = [8, 64], strides = [1, 1]} : vector<8x256xf32> to vector<8x64xf32>
    %cst_155 = arith.constant 5.000000e-01 : f32
    %354 = vector.broadcast %cst_155 : f32 to vector<8x64xf32>
    %355 = arith.mulf %354, %353 : vector<8x64xf32>
    %cst_156 = arith.constant 5.000000e-01 : f32
    %356 = vector.broadcast %cst_156 : f32 to vector<8x64xf32>
    %357 = arith.addf %355, %356 : vector<8x64xf32>
    %358 = vector.extract_strided_slice %347 {offsets = [0, 128], sizes = [8, 64], strides = [1, 1]} : vector<8x256xf32> to vector<8x64xf32>
    %359 = vector.extract_strided_slice %347 {offsets = [0, 192], sizes = [8, 64], strides = [1, 1]} : vector<8x256xf32> to vector<8x64xf32>
    %cst_157 = arith.constant 5.000000e-01 : f32
    %360 = vector.broadcast %cst_157 : f32 to vector<8x64xf32>
    %361 = arith.mulf %360, %359 : vector<8x64xf32>
    %cst_158 = arith.constant 5.000000e-01 : f32
    %362 = vector.broadcast %cst_158 : f32 to vector<8x64xf32>
    %363 = arith.addf %361, %362 : vector<8x64xf32>
    %364 = arith.mulf %357, %339 : vector<8x64xf32>
    %365 = arith.mulf %352, %358 : vector<8x64xf32>
    %366 = arith.addf %364, %365 : vector<8x64xf32>
    %367 = math.tanh %366 : vector<8x64xf32>
    %368 = arith.mulf %363, %367 : vector<8x64xf32>
    %369 = arith.truncf %368 : vector<8x64xf32> to vector<8x64xbf16>
    %c32_159 = arith.constant 32 : index
    %c0_160 = arith.constant 0 : index
    %370 = vector.load %arg7[%c32_159, %c0_160] : memref<64x64xbf16, #tpu.memory_space<vmem>>, vector<8x64xbf16>
    tpu.vector_store %arg7[%c32_159, %c0_160], %369 {strides = array<i32>} : memref<64x64xbf16, #tpu.memory_space<vmem>>, vector<8x64xbf16>,
    %c40_161 = arith.constant 40 : index
    %c0_162 = arith.constant 0 : index
    %371 = vector.load %arg8[%c40_161, %c0_162] : memref<64x256xf32, #tpu.memory_space<vmem>>, vector<8x256xf32>
    %cst_163 = arith.constant dense<0.000000e+00> : vector<8x256xf32>
    %372 = tpu.matmul %369, %236, %cst_163 {dimension_numbers = #tpu.dot_dimension_numbers<[1], [0], [0], [1], [0, 0, 1, 1], [], []>} : vector<8x64xbf16>, vector<64x256xbf16>, vector<8x256xf32> -> vector<8x256xf32>
    %373 = arith.addf %371, %372 : vector<8x256xf32>
    %374 = math.tanh %373 : vector<8x256xf32>
    %375 = vector.extract_strided_slice %374 {offsets = [0, 0], sizes = [8, 64], strides = [1, 1]} : vector<8x256xf32> to vector<8x64xf32>
    %cst_164 = arith.constant 5.000000e-01 : f32
    %376 = vector.broadcast %cst_164 : f32 to vector<8x64xf32>
    %377 = arith.mulf %376, %375 : vector<8x64xf32>
    %cst_165 = arith.constant 5.000000e-01 : f32
    %378 = vector.broadcast %cst_165 : f32 to vector<8x64xf32>
    %379 = arith.addf %377, %378 : vector<8x64xf32>
    %380 = vector.extract_strided_slice %374 {offsets = [0, 64], sizes = [8, 64], strides = [1, 1]} : vector<8x256xf32> to vector<8x64xf32>
    %cst_166 = arith.constant 5.000000e-01 : f32
    %381 = vector.broadcast %cst_166 : f32 to vector<8x64xf32>
    %382 = arith.mulf %381, %380 : vector<8x64xf32>
    %cst_167 = arith.constant 5.000000e-01 : f32
    %383 = vector.broadcast %cst_167 : f32 to vector<8x64xf32>
    %384 = arith.addf %382, %383 : vector<8x64xf32>
    %385 = vector.extract_strided_slice %374 {offsets = [0, 128], sizes = [8, 64], strides = [1, 1]} : vector<8x256xf32> to vector<8x64xf32>
    %386 = vector.extract_strided_slice %374 {offsets = [0, 192], sizes = [8, 64], strides = [1, 1]} : vector<8x256xf32> to vector<8x64xf32>
    %cst_168 = arith.constant 5.000000e-01 : f32
    %387 = vector.broadcast %cst_168 : f32 to vector<8x64xf32>
    %388 = arith.mulf %387, %386 : vector<8x64xf32>
    %cst_169 = arith.constant 5.000000e-01 : f32
    %389 = vector.broadcast %cst_169 : f32 to vector<8x64xf32>
    %390 = arith.addf %388, %389 : vector<8x64xf32>
    %391 = arith.mulf %384, %366 : vector<8x64xf32>
    %392 = arith.mulf %379, %385 : vector<8x64xf32>
    %393 = arith.addf %391, %392 : vector<8x64xf32>
    %394 = math.tanh %393 : vector<8x64xf32>
    %395 = arith.mulf %390, %394 : vector<8x64xf32>
    %396 = arith.truncf %395 : vector<8x64xf32> to vector<8x64xbf16>
    %c40_170 = arith.constant 40 : index
    %c0_171 = arith.constant 0 : index
    %397 = vector.load %arg7[%c40_170, %c0_171] : memref<64x64xbf16, #tpu.memory_space<vmem>>, vector<8x64xbf16>
    tpu.vector_store %arg7[%c40_170, %c0_171], %396 {strides = array<i32>} : memref<64x64xbf16, #tpu.memory_space<vmem>>, vector<8x64xbf16>,
    %c48_172 = arith.constant 48 : index
    %c0_173 = arith.constant 0 : index
    %398 = vector.load %arg8[%c48_172, %c0_173] : memref<64x256xf32, #tpu.memory_space<vmem>>, vector<8x256xf32>
    %cst_174 = arith.constant dense<0.000000e+00> : vector<8x256xf32>
    %399 = tpu.matmul %396, %236, %cst_174 {dimension_numbers = #tpu.dot_dimension_numbers<[1], [0], [0], [1], [0, 0, 1, 1], [], []>} : vector<8x64xbf16>, vector<64x256xbf16>, vector<8x256xf32> -> vector<8x256xf32>
    %400 = arith.addf %398, %399 : vector<8x256xf32>
    %401 = math.tanh %400 : vector<8x256xf32>
    %402 = vector.extract_strided_slice %401 {offsets = [0, 0], sizes = [8, 64], strides = [1, 1]} : vector<8x256xf32> to vector<8x64xf32>
    %cst_175 = arith.constant 5.000000e-01 : f32
    %403 = vector.broadcast %cst_175 : f32 to vector<8x64xf32>
    %404 = arith.mulf %403, %402 : vector<8x64xf32>
    %cst_176 = arith.constant 5.000000e-01 : f32
    %405 = vector.broadcast %cst_176 : f32 to vector<8x64xf32>
    %406 = arith.addf %404, %405 : vector<8x64xf32>
    %407 = vector.extract_strided_slice %401 {offsets = [0, 64], sizes = [8, 64], strides = [1, 1]} : vector<8x256xf32> to vector<8x64xf32>
    %cst_177 = arith.constant 5.000000e-01 : f32
    %408 = vector.broadcast %cst_177 : f32 to vector<8x64xf32>
    %409 = arith.mulf %408, %407 : vector<8x64xf32>
    %cst_178 = arith.constant 5.000000e-01 : f32
    %410 = vector.broadcast %cst_178 : f32 to vector<8x64xf32>
    %411 = arith.addf %409, %410 : vector<8x64xf32>
    %412 = vector.extract_strided_slice %401 {offsets = [0, 128], sizes = [8, 64], strides = [1, 1]} : vector<8x256xf32> to vector<8x64xf32>
    %413 = vector.extract_strided_slice %401 {offsets = [0, 192], sizes = [8, 64], strides = [1, 1]} : vector<8x256xf32> to vector<8x64xf32>
    %cst_179 = arith.constant 5.000000e-01 : f32
    %414 = vector.broadcast %cst_179 : f32 to vector<8x64xf32>
    %415 = arith.mulf %414, %413 : vector<8x64xf32>
    %cst_180 = arith.constant 5.000000e-01 : f32
    %416 = vector.broadcast %cst_180 : f32 to vector<8x64xf32>
    %417 = arith.addf %415, %416 : vector<8x64xf32>
    %418 = arith.mulf %411, %393 : vector<8x64xf32>
    %419 = arith.mulf %406, %412 : vector<8x64xf32>
    %420 = arith.addf %418, %419 : vector<8x64xf32>
    %421 = math.tanh %420 : vector<8x64xf32>
    %422 = arith.mulf %417, %421 : vector<8x64xf32>
    %423 = arith.truncf %422 : vector<8x64xf32> to vector<8x64xbf16>
    %c48_181 = arith.constant 48 : index
    %c0_182 = arith.constant 0 : index
    %424 = vector.load %arg7[%c48_181, %c0_182] : memref<64x64xbf16, #tpu.memory_space<vmem>>, vector<8x64xbf16>
    tpu.vector_store %arg7[%c48_181, %c0_182], %423 {strides = array<i32>} : memref<64x64xbf16, #tpu.memory_space<vmem>>, vector<8x64xbf16>,
    %c56_183 = arith.constant 56 : index
    %c0_184 = arith.constant 0 : index
    %425 = vector.load %arg8[%c56_183, %c0_184] : memref<64x256xf32, #tpu.memory_space<vmem>>, vector<8x256xf32>
    %cst_185 = arith.constant dense<0.000000e+00> : vector<8x256xf32>
    %426 = tpu.matmul %423, %236, %cst_185 {dimension_numbers = #tpu.dot_dimension_numbers<[1], [0], [0], [1], [0, 0, 1, 1], [], []>} : vector<8x64xbf16>, vector<64x256xbf16>, vector<8x256xf32> -> vector<8x256xf32>
    %427 = arith.addf %425, %426 : vector<8x256xf32>
    %428 = math.tanh %427 : vector<8x256xf32>
    %429 = vector.extract_strided_slice %428 {offsets = [0, 0], sizes = [8, 64], strides = [1, 1]} : vector<8x256xf32> to vector<8x64xf32>
    %cst_186 = arith.constant 5.000000e-01 : f32
    %430 = vector.broadcast %cst_186 : f32 to vector<8x64xf32>
    %431 = arith.mulf %430, %429 : vector<8x64xf32>
    %cst_187 = arith.constant 5.000000e-01 : f32
    %432 = vector.broadcast %cst_187 : f32 to vector<8x64xf32>
    %433 = arith.addf %431, %432 : vector<8x64xf32>
    %434 = vector.extract_strided_slice %428 {offsets = [0, 64], sizes = [8, 64], strides = [1, 1]} : vector<8x256xf32> to vector<8x64xf32>
    %cst_188 = arith.constant 5.000000e-01 : f32
    %435 = vector.broadcast %cst_188 : f32 to vector<8x64xf32>
    %436 = arith.mulf %435, %434 : vector<8x64xf32>
    %cst_189 = arith.constant 5.000000e-01 : f32
    %437 = vector.broadcast %cst_189 : f32 to vector<8x64xf32>
    %438 = arith.addf %436, %437 : vector<8x64xf32>
    %439 = vector.extract_strided_slice %428 {offsets = [0, 128], sizes = [8, 64], strides = [1, 1]} : vector<8x256xf32> to vector<8x64xf32>
    %440 = vector.extract_strided_slice %428 {offsets = [0, 192], sizes = [8, 64], strides = [1, 1]} : vector<8x256xf32> to vector<8x64xf32>
    %cst_190 = arith.constant 5.000000e-01 : f32
    %441 = vector.broadcast %cst_190 : f32 to vector<8x64xf32>
    %442 = arith.mulf %441, %440 : vector<8x64xf32>
    %cst_191 = arith.constant 5.000000e-01 : f32
    %443 = vector.broadcast %cst_191 : f32 to vector<8x64xf32>
    %444 = arith.addf %442, %443 : vector<8x64xf32>
    %445 = arith.mulf %438, %420 : vector<8x64xf32>
    %446 = arith.mulf %433, %439 : vector<8x64xf32>
    %447 = arith.addf %445, %446 : vector<8x64xf32>
    %448 = math.tanh %447 : vector<8x64xf32>
    %449 = arith.mulf %444, %448 : vector<8x64xf32>
    %450 = arith.truncf %449 : vector<8x64xf32> to vector<8x64xbf16>
    %c56_192 = arith.constant 56 : index
    %c0_193 = arith.constant 0 : index
    %451 = vector.load %arg7[%c56_192, %c0_193] : memref<64x64xbf16, #tpu.memory_space<vmem>>, vector<8x64xbf16>
    tpu.vector_store %arg7[%c56_192, %c0_193], %450 {strides = array<i32>} : memref<64x64xbf16, #tpu.memory_space<vmem>>, vector<8x64xbf16>,
    %c0_194 = arith.constant 0 : index
    %c0_195 = arith.constant 0 : index
    %452 = vector.load %arg7[%c0_194, %c0_195] : memref<64x64xbf16, #tpu.memory_space<vmem>>, vector<64x64xbf16>
    %c2 = arith.constant 2 : index
    %c0_196 = arith.constant 0 : index
    %c0_197 = arith.constant 0 : index
    %453 = vector.load %arg1[%c2, %c0_196, %c0_197] : memref<3x64x256xbf16, #tpu.memory_space<vmem>>, vector<1x64x256xbf16>
    %454 = vector.shape_cast %453 : vector<1x64x256xbf16> to vector<64x256xbf16>
    %cst_198 = arith.constant dense<0.000000e+00> : vector<64x256xf32>
    %455 = tpu.matmul %452, %454, %cst_198 {dimension_numbers = #tpu.dot_dimension_numbers<[1], [0], [0], [1], [0, 0, 1, 1], [], []>} : vector<64x64xbf16>, vector<64x256xbf16>, vector<64x256xf32> -> vector<64x256xf32>
    %c2_199 = arith.constant 2 : index
    %c0_200 = arith.constant 0 : index
    %c0_201 = arith.constant 0 : index
    %456 = vector.load %arg3[%c2_199, %c0_200, %c0_201] : memref<3x1x256xf32, #tpu.memory_space<vmem>>, vector<1x1x256xf32>
    %457 = vector.shape_cast %456 : vector<1x1x256xf32> to vector<1x256xf32>
    %458 = vector.broadcast %457 : vector<1x256xf32> to vector<64x256xf32>
    %459 = arith.addf %455, %458 : vector<64x256xf32>
    %c0_202 = arith.constant 0 : index
    %c0_203 = arith.constant 0 : index
    %460 = vector.load %arg8[%c0_202, %c0_203] : memref<64x256xf32, #tpu.memory_space<vmem>>, vector<64x256xf32>
    tpu.vector_store %arg8[%c0_202, %c0_203], %459 {strides = array<i32>} : memref<64x256xf32, #tpu.memory_space<vmem>>, vector<64x256xf32>,
    %c2_204 = arith.constant 2 : index
    %c0_205 = arith.constant 0 : index
    %c0_206 = arith.constant 0 : index
    %461 = vector.load %arg2[%c2_204, %c0_205, %c0_206] : memref<3x64x256xbf16, #tpu.memory_space<vmem>>, vector<1x64x256xbf16>
    %462 = vector.shape_cast %461 : vector<1x64x256xbf16> to vector<64x256xbf16>
    %cst_207 = arith.constant 0.000000e+00 : f32
    %463 = vector.broadcast %cst_207 : f32 to vector<8x64xf32>
    %c0_208 = arith.constant 0 : index
    %c0_209 = arith.constant 0 : index
    %464 = vector.load %arg8[%c0_208, %c0_209] : memref<64x256xf32, #tpu.memory_space<vmem>>, vector<8x256xf32>
    %465 = math.tanh %464 : vector<8x256xf32>
    %466 = vector.extract_strided_slice %465 {offsets = [0, 0], sizes = [8, 64], strides = [1, 1]} : vector<8x256xf32> to vector<8x64xf32>
    %cst_210 = arith.constant 5.000000e-01 : f32
    %467 = vector.broadcast %cst_210 : f32 to vector<8x64xf32>
    %468 = arith.mulf %467, %466 : vector<8x64xf32>
    %cst_211 = arith.constant 5.000000e-01 : f32
    %469 = vector.broadcast %cst_211 : f32 to vector<8x64xf32>
    %470 = arith.addf %468, %469 : vector<8x64xf32>
    %471 = vector.extract_strided_slice %465 {offsets = [0, 64], sizes = [8, 64], strides = [1, 1]} : vector<8x256xf32> to vector<8x64xf32>
    %cst_212 = arith.constant 5.000000e-01 : f32
    %472 = vector.broadcast %cst_212 : f32 to vector<8x64xf32>
    %473 = arith.mulf %472, %471 : vector<8x64xf32>
    %cst_213 = arith.constant 5.000000e-01 : f32
    %474 = vector.broadcast %cst_213 : f32 to vector<8x64xf32>
    %475 = arith.addf %473, %474 : vector<8x64xf32>
    %476 = vector.extract_strided_slice %465 {offsets = [0, 128], sizes = [8, 64], strides = [1, 1]} : vector<8x256xf32> to vector<8x64xf32>
    %477 = vector.extract_strided_slice %465 {offsets = [0, 192], sizes = [8, 64], strides = [1, 1]} : vector<8x256xf32> to vector<8x64xf32>
    %cst_214 = arith.constant 5.000000e-01 : f32
    %478 = vector.broadcast %cst_214 : f32 to vector<8x64xf32>
    %479 = arith.mulf %478, %477 : vector<8x64xf32>
    %cst_215 = arith.constant 5.000000e-01 : f32
    %480 = vector.broadcast %cst_215 : f32 to vector<8x64xf32>
    %481 = arith.addf %479, %480 : vector<8x64xf32>
    %482 = arith.mulf %475, %463 : vector<8x64xf32>
    %483 = arith.mulf %470, %476 : vector<8x64xf32>
    %484 = arith.addf %482, %483 : vector<8x64xf32>
    %485 = math.tanh %484 : vector<8x64xf32>
    %486 = arith.mulf %481, %485 : vector<8x64xf32>
    %487 = arith.truncf %486 : vector<8x64xf32> to vector<8x64xbf16>
    %c8_216 = arith.constant 8 : index
    %c0_217 = arith.constant 0 : index
    %488 = vector.load %arg8[%c8_216, %c0_217] : memref<64x256xf32, #tpu.memory_space<vmem>>, vector<8x256xf32>
    %cst_218 = arith.constant dense<0.000000e+00> : vector<8x256xf32>
    %489 = tpu.matmul %487, %462, %cst_218 {dimension_numbers = #tpu.dot_dimension_numbers<[1], [0], [0], [1], [0, 0, 1, 1], [], []>} : vector<8x64xbf16>, vector<64x256xbf16>, vector<8x256xf32> -> vector<8x256xf32>
    %490 = arith.addf %488, %489 : vector<8x256xf32>
    %491 = math.tanh %490 : vector<8x256xf32>
    %492 = vector.extract_strided_slice %491 {offsets = [0, 0], sizes = [8, 64], strides = [1, 1]} : vector<8x256xf32> to vector<8x64xf32>
    %cst_219 = arith.constant 5.000000e-01 : f32
    %493 = vector.broadcast %cst_219 : f32 to vector<8x64xf32>
    %494 = arith.mulf %493, %492 : vector<8x64xf32>
    %cst_220 = arith.constant 5.000000e-01 : f32
    %495 = vector.broadcast %cst_220 : f32 to vector<8x64xf32>
    %496 = arith.addf %494, %495 : vector<8x64xf32>
    %497 = vector.extract_strided_slice %491 {offsets = [0, 64], sizes = [8, 64], strides = [1, 1]} : vector<8x256xf32> to vector<8x64xf32>
    %cst_221 = arith.constant 5.000000e-01 : f32
    %498 = vector.broadcast %cst_221 : f32 to vector<8x64xf32>
    %499 = arith.mulf %498, %497 : vector<8x64xf32>
    %cst_222 = arith.constant 5.000000e-01 : f32
    %500 = vector.broadcast %cst_222 : f32 to vector<8x64xf32>
    %501 = arith.addf %499, %500 : vector<8x64xf32>
    %502 = vector.extract_strided_slice %491 {offsets = [0, 128], sizes = [8, 64], strides = [1, 1]} : vector<8x256xf32> to vector<8x64xf32>
    %503 = vector.extract_strided_slice %491 {offsets = [0, 192], sizes = [8, 64], strides = [1, 1]} : vector<8x256xf32> to vector<8x64xf32>
    %cst_223 = arith.constant 5.000000e-01 : f32
    %504 = vector.broadcast %cst_223 : f32 to vector<8x64xf32>
    %505 = arith.mulf %504, %503 : vector<8x64xf32>
    %cst_224 = arith.constant 5.000000e-01 : f32
    %506 = vector.broadcast %cst_224 : f32 to vector<8x64xf32>
    %507 = arith.addf %505, %506 : vector<8x64xf32>
    %508 = arith.mulf %501, %484 : vector<8x64xf32>
    %509 = arith.mulf %496, %502 : vector<8x64xf32>
    %510 = arith.addf %508, %509 : vector<8x64xf32>
    %511 = math.tanh %510 : vector<8x64xf32>
    %512 = arith.mulf %507, %511 : vector<8x64xf32>
    %513 = arith.truncf %512 : vector<8x64xf32> to vector<8x64xbf16>
    %c16_225 = arith.constant 16 : index
    %c0_226 = arith.constant 0 : index
    %514 = vector.load %arg8[%c16_225, %c0_226] : memref<64x256xf32, #tpu.memory_space<vmem>>, vector<8x256xf32>
    %cst_227 = arith.constant dense<0.000000e+00> : vector<8x256xf32>
    %515 = tpu.matmul %513, %462, %cst_227 {dimension_numbers = #tpu.dot_dimension_numbers<[1], [0], [0], [1], [0, 0, 1, 1], [], []>} : vector<8x64xbf16>, vector<64x256xbf16>, vector<8x256xf32> -> vector<8x256xf32>
    %516 = arith.addf %514, %515 : vector<8x256xf32>
    %517 = math.tanh %516 : vector<8x256xf32>
    %518 = vector.extract_strided_slice %517 {offsets = [0, 0], sizes = [8, 64], strides = [1, 1]} : vector<8x256xf32> to vector<8x64xf32>
    %cst_228 = arith.constant 5.000000e-01 : f32
    %519 = vector.broadcast %cst_228 : f32 to vector<8x64xf32>
    %520 = arith.mulf %519, %518 : vector<8x64xf32>
    %cst_229 = arith.constant 5.000000e-01 : f32
    %521 = vector.broadcast %cst_229 : f32 to vector<8x64xf32>
    %522 = arith.addf %520, %521 : vector<8x64xf32>
    %523 = vector.extract_strided_slice %517 {offsets = [0, 64], sizes = [8, 64], strides = [1, 1]} : vector<8x256xf32> to vector<8x64xf32>
    %cst_230 = arith.constant 5.000000e-01 : f32
    %524 = vector.broadcast %cst_230 : f32 to vector<8x64xf32>
    %525 = arith.mulf %524, %523 : vector<8x64xf32>
    %cst_231 = arith.constant 5.000000e-01 : f32
    %526 = vector.broadcast %cst_231 : f32 to vector<8x64xf32>
    %527 = arith.addf %525, %526 : vector<8x64xf32>
    %528 = vector.extract_strided_slice %517 {offsets = [0, 128], sizes = [8, 64], strides = [1, 1]} : vector<8x256xf32> to vector<8x64xf32>
    %529 = vector.extract_strided_slice %517 {offsets = [0, 192], sizes = [8, 64], strides = [1, 1]} : vector<8x256xf32> to vector<8x64xf32>
    %cst_232 = arith.constant 5.000000e-01 : f32
    %530 = vector.broadcast %cst_232 : f32 to vector<8x64xf32>
    %531 = arith.mulf %530, %529 : vector<8x64xf32>
    %cst_233 = arith.constant 5.000000e-01 : f32
    %532 = vector.broadcast %cst_233 : f32 to vector<8x64xf32>
    %533 = arith.addf %531, %532 : vector<8x64xf32>
    %534 = arith.mulf %527, %510 : vector<8x64xf32>
    %535 = arith.mulf %522, %528 : vector<8x64xf32>
    %536 = arith.addf %534, %535 : vector<8x64xf32>
    %537 = math.tanh %536 : vector<8x64xf32>
    %538 = arith.mulf %533, %537 : vector<8x64xf32>
    %539 = arith.truncf %538 : vector<8x64xf32> to vector<8x64xbf16>
    %c24_234 = arith.constant 24 : index
    %c0_235 = arith.constant 0 : index
    %540 = vector.load %arg8[%c24_234, %c0_235] : memref<64x256xf32, #tpu.memory_space<vmem>>, vector<8x256xf32>
    %cst_236 = arith.constant dense<0.000000e+00> : vector<8x256xf32>
    %541 = tpu.matmul %539, %462, %cst_236 {dimension_numbers = #tpu.dot_dimension_numbers<[1], [0], [0], [1], [0, 0, 1, 1], [], []>} : vector<8x64xbf16>, vector<64x256xbf16>, vector<8x256xf32> -> vector<8x256xf32>
    %542 = arith.addf %540, %541 : vector<8x256xf32>
    %543 = math.tanh %542 : vector<8x256xf32>
    %544 = vector.extract_strided_slice %543 {offsets = [0, 0], sizes = [8, 64], strides = [1, 1]} : vector<8x256xf32> to vector<8x64xf32>
    %cst_237 = arith.constant 5.000000e-01 : f32
    %545 = vector.broadcast %cst_237 : f32 to vector<8x64xf32>
    %546 = arith.mulf %545, %544 : vector<8x64xf32>
    %cst_238 = arith.constant 5.000000e-01 : f32
    %547 = vector.broadcast %cst_238 : f32 to vector<8x64xf32>
    %548 = arith.addf %546, %547 : vector<8x64xf32>
    %549 = vector.extract_strided_slice %543 {offsets = [0, 64], sizes = [8, 64], strides = [1, 1]} : vector<8x256xf32> to vector<8x64xf32>
    %cst_239 = arith.constant 5.000000e-01 : f32
    %550 = vector.broadcast %cst_239 : f32 to vector<8x64xf32>
    %551 = arith.mulf %550, %549 : vector<8x64xf32>
    %cst_240 = arith.constant 5.000000e-01 : f32
    %552 = vector.broadcast %cst_240 : f32 to vector<8x64xf32>
    %553 = arith.addf %551, %552 : vector<8x64xf32>
    %554 = vector.extract_strided_slice %543 {offsets = [0, 128], sizes = [8, 64], strides = [1, 1]} : vector<8x256xf32> to vector<8x64xf32>
    %555 = vector.extract_strided_slice %543 {offsets = [0, 192], sizes = [8, 64], strides = [1, 1]} : vector<8x256xf32> to vector<8x64xf32>
    %cst_241 = arith.constant 5.000000e-01 : f32
    %556 = vector.broadcast %cst_241 : f32 to vector<8x64xf32>
    %557 = arith.mulf %556, %555 : vector<8x64xf32>
    %cst_242 = arith.constant 5.000000e-01 : f32
    %558 = vector.broadcast %cst_242 : f32 to vector<8x64xf32>
    %559 = arith.addf %557, %558 : vector<8x64xf32>
    %560 = arith.mulf %553, %536 : vector<8x64xf32>
    %561 = arith.mulf %548, %554 : vector<8x64xf32>
    %562 = arith.addf %560, %561 : vector<8x64xf32>
    %563 = math.tanh %562 : vector<8x64xf32>
    %564 = arith.mulf %559, %563 : vector<8x64xf32>
    %565 = arith.truncf %564 : vector<8x64xf32> to vector<8x64xbf16>
    %c32_243 = arith.constant 32 : index
    %c0_244 = arith.constant 0 : index
    %566 = vector.load %arg8[%c32_243, %c0_244] : memref<64x256xf32, #tpu.memory_space<vmem>>, vector<8x256xf32>
    %cst_245 = arith.constant dense<0.000000e+00> : vector<8x256xf32>
    %567 = tpu.matmul %565, %462, %cst_245 {dimension_numbers = #tpu.dot_dimension_numbers<[1], [0], [0], [1], [0, 0, 1, 1], [], []>} : vector<8x64xbf16>, vector<64x256xbf16>, vector<8x256xf32> -> vector<8x256xf32>
    %568 = arith.addf %566, %567 : vector<8x256xf32>
    %569 = math.tanh %568 : vector<8x256xf32>
    %570 = vector.extract_strided_slice %569 {offsets = [0, 0], sizes = [8, 64], strides = [1, 1]} : vector<8x256xf32> to vector<8x64xf32>
    %cst_246 = arith.constant 5.000000e-01 : f32
    %571 = vector.broadcast %cst_246 : f32 to vector<8x64xf32>
    %572 = arith.mulf %571, %570 : vector<8x64xf32>
    %cst_247 = arith.constant 5.000000e-01 : f32
    %573 = vector.broadcast %cst_247 : f32 to vector<8x64xf32>
    %574 = arith.addf %572, %573 : vector<8x64xf32>
    %575 = vector.extract_strided_slice %569 {offsets = [0, 64], sizes = [8, 64], strides = [1, 1]} : vector<8x256xf32> to vector<8x64xf32>
    %cst_248 = arith.constant 5.000000e-01 : f32
    %576 = vector.broadcast %cst_248 : f32 to vector<8x64xf32>
    %577 = arith.mulf %576, %575 : vector<8x64xf32>
    %cst_249 = arith.constant 5.000000e-01 : f32
    %578 = vector.broadcast %cst_249 : f32 to vector<8x64xf32>
    %579 = arith.addf %577, %578 : vector<8x64xf32>
    %580 = vector.extract_strided_slice %569 {offsets = [0, 128], sizes = [8, 64], strides = [1, 1]} : vector<8x256xf32> to vector<8x64xf32>
    %581 = vector.extract_strided_slice %569 {offsets = [0, 192], sizes = [8, 64], strides = [1, 1]} : vector<8x256xf32> to vector<8x64xf32>
    %cst_250 = arith.constant 5.000000e-01 : f32
    %582 = vector.broadcast %cst_250 : f32 to vector<8x64xf32>
    %583 = arith.mulf %582, %581 : vector<8x64xf32>
    %cst_251 = arith.constant 5.000000e-01 : f32
    %584 = vector.broadcast %cst_251 : f32 to vector<8x64xf32>
    %585 = arith.addf %583, %584 : vector<8x64xf32>
    %586 = arith.mulf %579, %562 : vector<8x64xf32>
    %587 = arith.mulf %574, %580 : vector<8x64xf32>
    %588 = arith.addf %586, %587 : vector<8x64xf32>
    %589 = math.tanh %588 : vector<8x64xf32>
    %590 = arith.mulf %585, %589 : vector<8x64xf32>
    %591 = arith.truncf %590 : vector<8x64xf32> to vector<8x64xbf16>
    %c40_252 = arith.constant 40 : index
    %c0_253 = arith.constant 0 : index
    %592 = vector.load %arg8[%c40_252, %c0_253] : memref<64x256xf32, #tpu.memory_space<vmem>>, vector<8x256xf32>
    %cst_254 = arith.constant dense<0.000000e+00> : vector<8x256xf32>
    %593 = tpu.matmul %591, %462, %cst_254 {dimension_numbers = #tpu.dot_dimension_numbers<[1], [0], [0], [1], [0, 0, 1, 1], [], []>} : vector<8x64xbf16>, vector<64x256xbf16>, vector<8x256xf32> -> vector<8x256xf32>
    %594 = arith.addf %592, %593 : vector<8x256xf32>
    %595 = math.tanh %594 : vector<8x256xf32>
    %596 = vector.extract_strided_slice %595 {offsets = [0, 0], sizes = [8, 64], strides = [1, 1]} : vector<8x256xf32> to vector<8x64xf32>
    %cst_255 = arith.constant 5.000000e-01 : f32
    %597 = vector.broadcast %cst_255 : f32 to vector<8x64xf32>
    %598 = arith.mulf %597, %596 : vector<8x64xf32>
    %cst_256 = arith.constant 5.000000e-01 : f32
    %599 = vector.broadcast %cst_256 : f32 to vector<8x64xf32>
    %600 = arith.addf %598, %599 : vector<8x64xf32>
    %601 = vector.extract_strided_slice %595 {offsets = [0, 64], sizes = [8, 64], strides = [1, 1]} : vector<8x256xf32> to vector<8x64xf32>
    %cst_257 = arith.constant 5.000000e-01 : f32
    %602 = vector.broadcast %cst_257 : f32 to vector<8x64xf32>
    %603 = arith.mulf %602, %601 : vector<8x64xf32>
    %cst_258 = arith.constant 5.000000e-01 : f32
    %604 = vector.broadcast %cst_258 : f32 to vector<8x64xf32>
    %605 = arith.addf %603, %604 : vector<8x64xf32>
    %606 = vector.extract_strided_slice %595 {offsets = [0, 128], sizes = [8, 64], strides = [1, 1]} : vector<8x256xf32> to vector<8x64xf32>
    %607 = vector.extract_strided_slice %595 {offsets = [0, 192], sizes = [8, 64], strides = [1, 1]} : vector<8x256xf32> to vector<8x64xf32>
    %cst_259 = arith.constant 5.000000e-01 : f32
    %608 = vector.broadcast %cst_259 : f32 to vector<8x64xf32>
    %609 = arith.mulf %608, %607 : vector<8x64xf32>
    %cst_260 = arith.constant 5.000000e-01 : f32
    %610 = vector.broadcast %cst_260 : f32 to vector<8x64xf32>
    %611 = arith.addf %609, %610 : vector<8x64xf32>
    %612 = arith.mulf %605, %588 : vector<8x64xf32>
    %613 = arith.mulf %600, %606 : vector<8x64xf32>
    %614 = arith.addf %612, %613 : vector<8x64xf32>
    %615 = math.tanh %614 : vector<8x64xf32>
    %616 = arith.mulf %611, %615 : vector<8x64xf32>
    %617 = arith.truncf %616 : vector<8x64xf32> to vector<8x64xbf16>
    %c48_261 = arith.constant 48 : index
    %c0_262 = arith.constant 0 : index
    %618 = vector.load %arg8[%c48_261, %c0_262] : memref<64x256xf32, #tpu.memory_space<vmem>>, vector<8x256xf32>
    %cst_263 = arith.constant dense<0.000000e+00> : vector<8x256xf32>
    %619 = tpu.matmul %617, %462, %cst_263 {dimension_numbers = #tpu.dot_dimension_numbers<[1], [0], [0], [1], [0, 0, 1, 1], [], []>} : vector<8x64xbf16>, vector<64x256xbf16>, vector<8x256xf32> -> vector<8x256xf32>
    %620 = arith.addf %618, %619 : vector<8x256xf32>
    %621 = math.tanh %620 : vector<8x256xf32>
    %622 = vector.extract_strided_slice %621 {offsets = [0, 0], sizes = [8, 64], strides = [1, 1]} : vector<8x256xf32> to vector<8x64xf32>
    %cst_264 = arith.constant 5.000000e-01 : f32
    %623 = vector.broadcast %cst_264 : f32 to vector<8x64xf32>
    %624 = arith.mulf %623, %622 : vector<8x64xf32>
    %cst_265 = arith.constant 5.000000e-01 : f32
    %625 = vector.broadcast %cst_265 : f32 to vector<8x64xf32>
    %626 = arith.addf %624, %625 : vector<8x64xf32>
    %627 = vector.extract_strided_slice %621 {offsets = [0, 64], sizes = [8, 64], strides = [1, 1]} : vector<8x256xf32> to vector<8x64xf32>
    %cst_266 = arith.constant 5.000000e-01 : f32
    %628 = vector.broadcast %cst_266 : f32 to vector<8x64xf32>
    %629 = arith.mulf %628, %627 : vector<8x64xf32>
    %cst_267 = arith.constant 5.000000e-01 : f32
    %630 = vector.broadcast %cst_267 : f32 to vector<8x64xf32>
    %631 = arith.addf %629, %630 : vector<8x64xf32>
    %632 = vector.extract_strided_slice %621 {offsets = [0, 128], sizes = [8, 64], strides = [1, 1]} : vector<8x256xf32> to vector<8x64xf32>
    %633 = vector.extract_strided_slice %621 {offsets = [0, 192], sizes = [8, 64], strides = [1, 1]} : vector<8x256xf32> to vector<8x64xf32>
    %cst_268 = arith.constant 5.000000e-01 : f32
    %634 = vector.broadcast %cst_268 : f32 to vector<8x64xf32>
    %635 = arith.mulf %634, %633 : vector<8x64xf32>
    %cst_269 = arith.constant 5.000000e-01 : f32
    %636 = vector.broadcast %cst_269 : f32 to vector<8x64xf32>
    %637 = arith.addf %635, %636 : vector<8x64xf32>
    %638 = arith.mulf %631, %614 : vector<8x64xf32>
    %639 = arith.mulf %626, %632 : vector<8x64xf32>
    %640 = arith.addf %638, %639 : vector<8x64xf32>
    %641 = math.tanh %640 : vector<8x64xf32>
    %642 = arith.mulf %637, %641 : vector<8x64xf32>
    %643 = arith.truncf %642 : vector<8x64xf32> to vector<8x64xbf16>
    %c56_270 = arith.constant 56 : index
    %c0_271 = arith.constant 0 : index
    %644 = vector.load %arg8[%c56_270, %c0_271] : memref<64x256xf32, #tpu.memory_space<vmem>>, vector<8x256xf32>
    %cst_272 = arith.constant dense<0.000000e+00> : vector<8x256xf32>
    %645 = tpu.matmul %643, %462, %cst_272 {dimension_numbers = #tpu.dot_dimension_numbers<[1], [0], [0], [1], [0, 0, 1, 1], [], []>} : vector<8x64xbf16>, vector<64x256xbf16>, vector<8x256xf32> -> vector<8x256xf32>
    %646 = arith.addf %644, %645 : vector<8x256xf32>
    %647 = math.tanh %646 : vector<8x256xf32>
    %648 = vector.extract_strided_slice %647 {offsets = [0, 0], sizes = [8, 64], strides = [1, 1]} : vector<8x256xf32> to vector<8x64xf32>
    %cst_273 = arith.constant 5.000000e-01 : f32
    %649 = vector.broadcast %cst_273 : f32 to vector<8x64xf32>
    %650 = arith.mulf %649, %648 : vector<8x64xf32>
    %cst_274 = arith.constant 5.000000e-01 : f32
    %651 = vector.broadcast %cst_274 : f32 to vector<8x64xf32>
    %652 = arith.addf %650, %651 : vector<8x64xf32>
    %653 = vector.extract_strided_slice %647 {offsets = [0, 64], sizes = [8, 64], strides = [1, 1]} : vector<8x256xf32> to vector<8x64xf32>
    %cst_275 = arith.constant 5.000000e-01 : f32
    %654 = vector.broadcast %cst_275 : f32 to vector<8x64xf32>
    %655 = arith.mulf %654, %653 : vector<8x64xf32>
    %cst_276 = arith.constant 5.000000e-01 : f32
    %656 = vector.broadcast %cst_276 : f32 to vector<8x64xf32>
    %657 = arith.addf %655, %656 : vector<8x64xf32>
    %658 = vector.extract_strided_slice %647 {offsets = [0, 128], sizes = [8, 64], strides = [1, 1]} : vector<8x256xf32> to vector<8x64xf32>
    %659 = vector.extract_strided_slice %647 {offsets = [0, 192], sizes = [8, 64], strides = [1, 1]} : vector<8x256xf32> to vector<8x64xf32>
    %cst_277 = arith.constant 5.000000e-01 : f32
    %660 = vector.broadcast %cst_277 : f32 to vector<8x64xf32>
    %661 = arith.mulf %660, %659 : vector<8x64xf32>
    %cst_278 = arith.constant 5.000000e-01 : f32
    %662 = vector.broadcast %cst_278 : f32 to vector<8x64xf32>
    %663 = arith.addf %661, %662 : vector<8x64xf32>
    %664 = arith.mulf %657, %640 : vector<8x64xf32>
    %665 = arith.mulf %652, %658 : vector<8x64xf32>
    %666 = arith.addf %664, %665 : vector<8x64xf32>
    %667 = math.tanh %666 : vector<8x64xf32>
    %668 = arith.mulf %663, %667 : vector<8x64xf32>
    %669 = arith.truncf %668 : vector<8x64xf32> to vector<8x64xbf16>
    %c0_279 = arith.constant 0 : index
    %c0_280 = arith.constant 0 : index
    %670 = vector.load %arg4[%c0_279, %c0_280] : memref<64x128xbf16, #tpu.memory_space<vmem>>, vector<64x128xbf16>
    %cst_281 = arith.constant dense<0.000000e+00> : vector<8x128xf32>
    %671 = tpu.matmul %669, %670, %cst_281 {dimension_numbers = #tpu.dot_dimension_numbers<[1], [0], [0], [1], [0, 0, 1, 1], [], []>} : vector<8x64xbf16>, vector<64x128xbf16>, vector<8x128xf32> -> vector<8x128xf32>
    %c0_282 = arith.constant 0 : index
    %c0_283 = arith.constant 0 : index
    %672 = vector.load %arg5[%c0_282, %c0_283] : memref<1x128xf32, #tpu.memory_space<vmem>>, vector<1x128xf32>
    %673 = vector.broadcast %672 : vector<1x128xf32> to vector<8x128xf32>
    %674 = arith.addf %671, %673 : vector<8x128xf32>
    %c0_284 = arith.constant 0 : index
    %c0_285 = arith.constant 0 : index
    %675 = vector.load %arg6[%c0_284, %c0_285] : memref<8x128xf32, #tpu.memory_space<vmem>>, vector<8x128xf32>
    tpu.vector_store %arg6[%c0_284, %c0_285], %674 {strides = array<i32>} : memref<8x128xf32, #tpu.memory_space<vmem>>, vector<8x128xf32>,
    return
  }
}

</mosaic_0001>

<bundles_post_ra>
// kernel: lstm_model_forward.1
= control target key start
LH: loop header
LB: loop body
LE: loop exit
PB: predicated region body
PF: predicated region fallthrough
CT: control target
= control target key end

     0   :  { %11 = vsyncpa [#allocation5], 0  ;;  %s3231_s0 = inlined_call_operand.vmem [shape: bf16[64,64], index: 0, kind: input, shape index: {}]   ;;  %s3232_s1 = inlined_call_operand.hbm [shape: bf16[3,64,256], index: 1, kind: input, shape index: {}]   ;;  %s3233_s2 = inlined_call_operand.hbm [shape: bf16[3,64,256], index: 2, kind: input, shape index: {}]   ;;  %s3234_s3 = inlined_call_operand.vmem [shape: f32[3,1,256], index: 3, kind: input, shape index: {}]   ;;  %s3235_s4 = inlined_call_operand.vmem [shape: bf16[64,128], index: 4, kind: input, shape index: {}]   ;;  %s3236_s5 = inlined_call_operand.vmem [shape: f32[1,128], index: 5, kind: input, shape index: {}]   ;;  %s3237_s6 = inlined_call_operand.vmem [shape: f32[8,128], index: 6, kind: output, shape index: {}]  }
   0x1   :  { %s19_s23 = sshll.u32 %s3232_s1, 4  ;;  %s20_s23 = int_to_ptr.hbm [resolvable:$true] %s19_s23 }
   0x2   :  { %12 = vsyncpa [#allocation7], 0  ;;  %s2605_s24 = smov [#allocation4]   ;;  %s32_s28 = sshll.u32 %s3233_s2, 4  ;;  %s33_s28 = int_to_ptr.hbm [resolvable:$true] %s32_s28 }
   0x3   :  { %s21_s25 = sshll.u32 %s2605_s24, 4  ;;  %s2606_s29 = smov 128   ;;  %s22_s25 = int_to_ptr.vmem [resolvable:$true] %s21_s25 }
   0x4   :  { %s2607_s30 = smov 8   ;;  %s2608_s7 = smov [#allocation6]  }
   0x5   :  { %27 = dma.hbm_to_vmem [thread:$0]  %s20_s23, 3072, %s22_s25, [#allocation5], %s2606_s29, %s2606_s29, %s2607_s30  }
   0x6   :  { %s34_s8 = sshll.u32 %s2608_s7, 4  ;;  %s35_s8 = int_to_ptr.vmem [resolvable:$true] %s34_s8 }
   0x7   :  { %40 = dma.hbm_to_vmem [thread:$0]  %s33_s28, 3072, %s35_s8, [#allocation7], %s2606_s29, %s2606_s29, %s2607_s30  }
   0x8   :  { %2601 = dma.done.wait [#allocation5], 3072  }
   0x9   :  { %2602 = vsyncadd [#allocation5], 4294964224 }
   0xa   :  { %2603 = dma.done.wait [#allocation7], 3072  }
   0xb   :  { %2604 = vsyncadd [#allocation7], 4294964224  ;;  %v2056_v0 = vld [vmem:[#allocation4 + $0x30] sm:$0xf]  ;;  %v2350_v1 = vld [vmem:[#allocation4 + $0x34] sm:$0xf0] }
   0xc   :  { %v2349_v2 = vld [vmem:[#allocation4 + $0x34] sm:$0xf]  ;;  %v2057_v3 = vor.u32 %v2350_v1, %v2056_v0  ;;  %v2058_v4 = vld [vmem:[#allocation4 + $0x38] sm:$0xf0]  ;;  %v2048_v5 = vld [vmem:[#allocation4 + $0x20] sm:$0xf] }
   0xd   :  { %v2348_v6 = vld [vmem:[#allocation4 + $0x24] sm:$0xf0]  ;;  %v2061_v7 = vor.u32 %v2349_v2, %v2058_v4  ;;  %v2347_v8 = vld [vmem:[#allocation4 + $0x24] sm:$0xf]  ;;  %v2050_v9 = vld [vmem:[#allocation4 + $0x28] sm:$0xf0] }
   0xe   :  { %155 = vmatpush.bf16.msra.mxu0 %v2057_v3  ;;  %v2049_v10 = vor.u32 %v2348_v6, %v2048_v5  ;;  %v2053_v11 = vor.u32 %v2347_v8, %v2050_v9  ;;  %v2040_v12 = vld [vmem:[#allocation4 + $0x10] sm:$0xf]  ;;  %v2346_v13 = vld [vmem:[#allocation4 + $0x14] sm:$0xf0]  ;;  %v2345_v14 = vld [vmem:[#allocation4 + $0x14] sm:$0xf] }
   0xf   :  { %184 = vmatpush.bf16.msra.mxu1 %v2061_v7  ;;  %v2042_v15 = vld [vmem:[#allocation4 + $0x18] sm:$0xf0]  ;;  %v2041_v16 = vor.u32 %v2346_v13, %v2040_v12  ;;  %v2032_v18 = vld [vmem:[#allocation4] sm:$0xf]  ;;  %v2344_v19 = vld [vmem:[#allocation4 + $0x4] sm:$0xf0] }
  0x10   :  { %v2045_v17 = vor.u32 %v2345_v14, %v2042_v15  ;;  %v2343_v20 = vld [vmem:[#allocation4 + $0x4] sm:$0xf]  ;;  %v2034_v21 = vld [vmem:[#allocation4 + $0x8] sm:$0xf0]  ;;  %v2033_v22 = vor.u32 %v2344_v19, %v2032_v18  ;;  %vm138_vm0 = vcmask 523264   ;;  %s2609_s11 = smov 64  }
  0x11   :  { %v2037_v23 = vor.u32 %v2343_v20, %v2034_v21  ;;  %v2339_v24 = vld [vmem:[%s3231_s0] sm:$0xff]  ;;  %v2096_v37 = vld [vmem:[#allocation6 + $0x30] sm:$0xf]  ;;  %v2358_v38 = vld [vmem:[#allocation6 + $0x34] sm:$0xf0]  ;;  %vm255_vm1 = vcmask 519168  }
  0x12   :  { %156 = vmatpush.bf16.msra.mxu0 %v2049_v10  ;;  %v72_v25 = vld [vmem:[%s3234_s3] sm:$0x3]  ;;  %v2357_v39 = vld [vmem:[#allocation6 + $0x34] sm:$0xf]  ;;  %v2666_v40 = vor.u32 %v2358_v38, %v2096_v37  ;;  %v2098_v41 = vld [vmem:[#allocation6 + $0x38] sm:$0xf0] }
  0x13   :  { %185 = vmatpush.bf16.msra.mxu1 %v2053_v11  ;;  %v2659_v26 = vperm.slane %v72_v25, 0  ;;  %v2661_v27 = vperm.slane %v72_v25, 1  ;;  %v2088_v42 = vld [vmem:[#allocation6 + $0x20] sm:$0xf]  ;;  %v2356_v43 = vld [vmem:[#allocation6 + $0x24] sm:$0xf0]  ;;  %v2668_v44 = vor.u32 %v2357_v39, %v2098_v41 }
  0x14   :  { %v2355_v45 = vld [vmem:[#allocation6 + $0x24] sm:$0xf]  ;;  %v2090_v46 = vld [vmem:[#allocation6 + $0x28] sm:$0xf0]  ;;  %310 = vmatpush.bf16.msra.mxu2 %v2666_v40  ;;  %v2671_v47 = vor.u32 %v2356_v43, %v2088_v42  ;;  %v2080_v49 = vld [vmem:[#allocation6 + $0x10] sm:$0xf] }
  0x15   :  { %323 = vmatpush.bf16.msra.mxu3 %v2668_v44  ;;  %v2675_v48 = vor.u32 %v2355_v45, %v2090_v46  ;;  %v2354_v50 = vld [vmem:[#allocation6 + $0x14] sm:$0xf0]  ;;  %v2353_v51 = vld [vmem:[#allocation6 + $0x14] sm:$0xf]  ;;  %v2082_v52 = vld [vmem:[#allocation6 + $0x18] sm:$0xf0] }
  0x16   :  { %157 = vmatpush.bf16.msra.mxu0 %v2041_v16  ;;  %v2679_v53 = vor.u32 %v2354_v50, %v2080_v49  ;;  %v2683_v54 = vor.u32 %v2353_v51, %v2082_v52  ;;  %v2072_v55 = vld [vmem:[#allocation6] sm:$0xf]  ;;  %v2352_v56 = vld [vmem:[#allocation6 + $0x4] sm:$0xf0]  ;;  %v2351_v57 = vld [vmem:[#allocation6 + $0x4] sm:$0xf] }
  0x17   :  { %186 = vmatpush.bf16.msra.mxu1 %v2045_v17  ;;  %v2074_v58 = vld [vmem:[#allocation6 + $0x8] sm:$0xf0]  ;;  %v2687_v59 = vor.u32 %v2352_v56, %v2072_v55 }
  0x18   :  { %311 = vmatpush.bf16.msra.mxu2 %v2671_v47  ;;  %v2691_v60 = vor.u32 %v2351_v57, %v2074_v58 }
  0x19   :  { %324 = vmatpush.bf16.msra.mxu3 %v2675_v48 }
  0x1a   :  { %158 = vmatpush.bf16.msra.mxu0 %v2033_v22 }
  0x1b   :  { %187 = vmatpush.bf16.msra.mxu1 %v2037_v23  ;;  %v2340_v23 = vld [vmem:[%s3231_s0 + $0x8] sm:$0xff] }
  0x1c   :  { %312 = vmatpush.bf16.msra.mxu2 %v2679_v53 }
  0x1d   :  { %2062 = vmatmul.msk.bf16.vlgmr.msra.gmra.mxu0 %vm138_vm0, %v2339_v24  ;;  %325 = vmatpush.bf16.msra.mxu3 %v2683_v54 }
  0x1e   :  { %2066 = vmatmul.msk.bf16.vlgmr.msra.gmra.mxu1 %vm138_vm0, %v2339_v24  ;;  %542 = vmatpush.bf16.msrb.mxu0 %v2666_v40 }
  0x1f   :  { %555 = vmatpush.bf16.msrb.mxu1 %v2668_v44 }
  0x20   :  { %313 = vmatpush.bf16.msra.mxu2 %v2687_v59 }
  0x21   :  { %326 = vmatpush.bf16.msra.mxu3 %v2691_v60 }
  0x22   :  { %543 = vmatpush.bf16.msrb.mxu0 %v2671_v47 }
  0x23   :  { %556 = vmatpush.bf16.msrb.mxu1 %v2675_v48 }
  0x24   :  { %368 = vmatpush.bf16.msrb.mxu2 %v2666_v40 }
  0x25   :  { %381 = vmatpush.bf16.msrb.mxu3 %v2668_v44 }
  0x26   :  { %544 = vmatpush.bf16.msrb.mxu0 %v2679_v53 }
  0x27   :  { %557 = vmatpush.bf16.msrb.mxu1 %v2683_v54 }
  0x28   :  { %369 = vmatpush.bf16.msrb.mxu2 %v2671_v47 }
  0x29   :  { %382 = vmatpush.bf16.msrb.mxu3 %v2675_v48 }
  0x2a   :  { %545 = vmatpush.bf16.msrb.mxu0 %v2687_v59 }
  0x2b   :  { %558 = vmatpush.bf16.msrb.mxu1 %v2691_v60 }
  0x2c   :  { %370 = vmatpush.bf16.msrb.mxu2 %v2679_v53 }
  0x2d   :  { %383 = vmatpush.bf16.msrb.mxu3 %v2683_v54  ;;  %2063 = vmatmul.msk.bf16.gmra.mxu0 %vm138_vm0, %v2340_v23 }
  0x2e   :  { %658 = vmatpush.bf16.msra.mxu0 %v2666_v40  ;;  %2067 = vmatmul.msk.bf16.gmra.mxu1 %vm138_vm0, %v2340_v23 }
  0x2f   :  { %671 = vmatpush.bf16.msra.mxu1 %v2668_v44 }
  0x30   :  { %371 = vmatpush.bf16.msrb.mxu2 %v2687_v59 }
  0x31   :  { %384 = vmatpush.bf16.msrb.mxu3 %v2691_v60 }
  0x32   :  { %659 = vmatpush.bf16.msra.mxu0 %v2671_v47 }
  0x33   :  { %672 = vmatpush.bf16.msra.mxu1 %v2675_v48 }
  0x36   :  { %660 = vmatpush.bf16.msra.mxu0 %v2679_v53 }
  0x37   :  { %673 = vmatpush.bf16.msra.mxu1 %v2683_v54 }
  0x3a   :  { %661 = vmatpush.bf16.msra.mxu0 %v2687_v59 }
  0x3b   :  { %674 = vmatpush.bf16.msra.mxu1 %v2691_v60 }
  0x9a   :  { %v160_v28 = vpop.f32.mrf.mxu0 }
  0x9b   :  { %v161_v29 = vadd.f32 %v160_v28, %v2659_v26  ;;  %v189_v30 = vpop.f32.mrf.mxu1 }
  0x9c   :  { %v190_v31 = vadd.f32 %v189_v30, %v2661_v27 }
  0x9d   :  { %2409 = vtanh.f32 %v161_v29 }
  0x9e   :  { %2411 = vtanh.f32 %v190_v31 }
  0xa2   :  { %v162_v8 = vpop.f32.mrf.mxu0 }
  0xa3   :  { %v2410_v32 = vpop.eup %2409  ;;  %v191_v9 = vpop.f32.mrf.mxu1  ;;  %v163_v10 = vadd.f32 %v162_v8, %v2659_v26 }
  0xa4   :  { %v237_v33 = vmul.f32 0.5, %v2410_v32  ;;  %v2412_v34 = vpop.eup %2411  ;;  %v192_v13 = vadd.f32 %v191_v9, %v2661_v27 }
  0xa5   :  { %v239_v0 = vmul.f32 0.5, %v2412_v34 }
  0xa6   :  { %v238_v35 = vadd.f32 0.5, %v237_v33 }
  0xa7   :  { %v240_v1 = vadd.f32 0.5, %v239_v0 }
  0xa8   :  { %v242_v36 = vmul.f32 %v2412_v34, %v238_v35  ;;  %v241_v61 = vmul.f32 0.0, %v238_v35 }
  0xaa   :  { %244 = vrot.lane.b32.xlu0 %v242_v36, %s2609_s11  ;;  %v165_v37 = vpop.f32.mrf.mxu0 }
  0xab   :  { %v166_v38 = vadd.f32 %v165_v37, %v2659_v26  ;;  %v194_v39 = vpop.f32.mrf.mxu1 }
  0xac   :  { %v195_v41 = vadd.f32 %v194_v39, %v2661_v27 }
  0xb2   :  { %v167_v8 = vpop.f32.mrf.mxu0 }
  0xb3   :  { %v196_v9 = vpop.f32.mrf.mxu1 }
 0x11c   :  { %v245_v62 = vpop.permute.xlu0 %244 }
 0x11d   :  { %v247_v63 = vadd.f32 %v245_v62, %v241_v61 }
 0x11f   :  { %2413 = vtanh.f32 %v247_v63 }
 0x125   :  { %v2414_v2 = vpop.eup %2413 }
 0x126   :  { %v249_v3 = vmul.f32 %v2414_v2, %v240_v1 }
 0x128   :  { %v2708_v4 = vpack.c.bf16 %v249_v3, %v249_v3 }
 0x12a   :  { %v259_v5 = vunpack.c.l.b16 %v2708_v4 }
 0x12c   :  { %v260_v6 = vpack.c.b16 %v259_v5, %v259_v5 }
 0x12e   :  { %261 = vrot.lane.b32.xlu0 %v260_v6, %s2609_s11 }
 0x1a0   :  { %v262_v7 = vpop.permute.xlu0 %261 }
 0x1a1   :  { %2102 = vmatmul.msk.bf16.vlgmr.msra.gmra.mxu2 %vm138_vm0, %v262_v7  ;;  %2103 = vmatmul.msk.bf16.vlgmr.msra.gmra.mxu3 %vm138_vm0, %v262_v7 }
 0x1a2   :  { %426 = vmatpush.bf16.msra.mxu2 %v2666_v40  ;;  %439 = vmatpush.bf16.msra.mxu3 %v2668_v44 }
 0x1a6   :  { %427 = vmatpush.bf16.msra.mxu2 %v2671_v47  ;;  %440 = vmatpush.bf16.msra.mxu3 %v2675_v48 }
 0x1aa   :  { %428 = vmatpush.bf16.msra.mxu2 %v2679_v53  ;;  %441 = vmatpush.bf16.msra.mxu3 %v2683_v54 }
 0x1ae   :  { %429 = vmatpush.bf16.msra.mxu2 %v2687_v59  ;;  %442 = vmatpush.bf16.msra.mxu3 %v2691_v60 }
 0x224   :  { %v315_v11 = vpop.f32.mrf.mxu2  ;;  %v328_v12 = vpop.f32.mrf.mxu3 }
 0x225   :  { %v332_v14 = vadd.f32 %v315_v11, %v163_v10  ;;  %v333_v15 = vadd.f32 %v328_v12, %v192_v13  ;;  %v168_v10 = vadd.f32 %v167_v8, %v2659_v26 }
 0x227   :  { %2415 = vtanh.f32 %v332_v14 }
 0x228   :  { %2417 = vtanh.f32 %v333_v15 }
 0x22c   :  { %v317_v16 = vpop.f32.mrf.mxu2  ;;  %v330_v17 = vpop.f32.mrf.mxu3 }
 0x22d   :  { %v2416_v18 = vpop.eup %2415 }
 0x22e   :  { %v336_v19 = vmul.f32 0.5, %v2416_v18  ;;  %v2418_v21 = vpop.eup %2417 }
 0x22f   :  { %v338_v29 = vmul.f32 0.5, %v2418_v21 }
 0x230   :  { %v337_v20 = vadd.f32 0.5, %v336_v19 }
 0x231   :  { %v339_v30 = vadd.f32 0.5, %v338_v29 }
 0x232   :  { %v341_v22 = vmul.f32 %v2418_v21, %v337_v20  ;;  %v340_v24 = vmul.f32 %v337_v20, %v247_v63 }
 0x234   :  { %343 = vrot.lane.b32.xlu1 %v341_v22, %s2609_s11 }
 0x2a6   :  { %v344_v25 = vpop.permute.xlu1 %343 }
 0x2a7   :  { %v346_v28 = vadd.f32 %v344_v25, %v340_v24 }
 0x2a9   :  { %2419 = vtanh.f32 %v346_v28 }
 0x2af   :  { %v2420_v31 = vpop.eup %2419 }
 0x2b0   :  { %v348_v32 = vmul.f32 %v2420_v31, %v339_v30 }
 0x2b2   :  { %v2736_v33 = vpack.c.bf16 %v348_v32, %v348_v32 }
 0x2b4   :  { %v357_v34 = vunpack.c.l.b16 %v2736_v33 }
 0x2b6   :  { %v358_v35 = vpack.c.b16 %v357_v34, %v357_v34 }
 0x2b8   :  { %359 = vrot.lane.b32.xlu1 %v358_v35, %s2609_s11 }
 0x32a   :  { %v360_v36 = vpop.permute.xlu1 %359 }
 0x32b   :  { %2104 = vmatmul.msk.bf16.vlgmr.msrb.gmra.mxu2 %vm138_vm0, %v360_v36  ;;  %2105 = vmatmul.msk.bf16.vlgmr.msrb.gmra.mxu3 %vm138_vm0, %v360_v36 }
 0x32c   :  { %484 = vmatpush.bf16.msrb.mxu2 %v2666_v40  ;;  %497 = vmatpush.bf16.msrb.mxu3 %v2668_v44 }
 0x330   :  { %485 = vmatpush.bf16.msrb.mxu2 %v2671_v47  ;;  %498 = vmatpush.bf16.msrb.mxu3 %v2675_v48 }
 0x334   :  { %486 = vmatpush.bf16.msrb.mxu2 %v2679_v53  ;;  %499 = vmatpush.bf16.msrb.mxu3 %v2683_v54 }
 0x338   :  { %487 = vmatpush.bf16.msrb.mxu2 %v2687_v59  ;;  %500 = vmatpush.bf16.msrb.mxu3 %v2691_v60 }
 0x3ae   :  { %v373_v42 = vpop.f32.mrf.mxu2  ;;  %v386_v43 = vpop.f32.mrf.mxu3 }
 0x3af   :  { %v390_v45 = vadd.f32 %v373_v42, %v166_v38  ;;  %v391_v46 = vadd.f32 %v386_v43, %v195_v41 }
 0x3b1   :  { %2421 = vtanh.f32 %v390_v45 }
 0x3b2   :  { %2423 = vtanh.f32 %v391_v46 }
 0x3b6   :  { %v375_v49 = vpop.f32.mrf.mxu2  ;;  %v388_v50 = vpop.f32.mrf.mxu3 }
 0x3b7   :  { %v2422_v51 = vpop.eup %2421  ;;  %v2342_v49 = vld [vmem:[%s3231_s0 + $0x18] sm:$0xff] }
 0x3b8   :  { %v394_v52 = vmul.f32 0.5, %v2422_v51  ;;  %v2424_v56 = vpop.eup %2423 }
 0x3b9   :  { %v396_v63 = vmul.f32 0.5, %v2424_v56 }
 0x3ba   :  { %v395_v55 = vadd.f32 0.5, %v394_v52 }
 0x3bb   :  { %v397_v0 = vadd.f32 0.5, %v396_v63 }
 0x3bc   :  { %v399_v57 = vmul.f32 %v2424_v56, %v395_v55  ;;  %v398_v58 = vmul.f32 %v395_v55, %v346_v28 }
 0x3be   :  { %401 = vrot.lane.b32.xlu2 %v399_v57, %s2609_s11 }
 0x418   :  { %v402_v61 = vpop.permute.xlu2 %401 }
 0x419   :  { %v404_v62 = vadd.f32 %v402_v61, %v398_v58 }
 0x41b   :  { %2425 = vtanh.f32 %v404_v62 }
 0x421   :  { %v2426_v1 = vpop.eup %2425 }
 0x422   :  { %v406_v2 = vmul.f32 %v2426_v1, %v397_v0 }
 0x424   :  { %v2753_v3 = vpack.c.bf16 %v406_v2, %v406_v2 }
 0x426   :  { %v415_v5 = vunpack.c.l.b16 %v2753_v3 }
 0x428   :  { %v416_v6 = vpack.c.b16 %v415_v5, %v415_v5 }
 0x42a   :  { %417 = vrot.lane.b32.xlu2 %v416_v6, %s2609_s11 }
 0x484   :  { %v418_v7 = vpop.permute.xlu2 %417 }
 0x485   :  { %2106 = vmatmul.msk.bf16.vlgmr.msra.gmra.mxu2 %vm138_vm0, %v418_v7  ;;  %2107 = vmatmul.msk.bf16.vlgmr.msra.gmra.mxu3 %vm138_vm0, %v418_v7 }
 0x486   :  { %600 = vmatpush.bf16.msra.mxu2 %v2666_v40  ;;  %613 = vmatpush.bf16.msra.mxu3 %v2668_v44  ;;  %v197_v44 = vadd.f32 %v196_v9, %v2661_v27 }
 0x48a   :  { %601 = vmatpush.bf16.msra.mxu2 %v2671_v47  ;;  %614 = vmatpush.bf16.msra.mxu3 %v2675_v48 }
 0x48e   :  { %602 = vmatpush.bf16.msra.mxu2 %v2679_v53  ;;  %615 = vmatpush.bf16.msra.mxu3 %v2683_v54 }
 0x492   :  { %603 = vmatpush.bf16.msra.mxu2 %v2687_v59  ;;  %616 = vmatpush.bf16.msra.mxu3 %v2691_v60  ;;  %v2341_v60 = vld [vmem:[%s3231_s0 + $0x10] sm:$0xff] }
 0x493   :  { %2064 = vmatmul.msk.bf16.gmra.mxu0 %vm138_vm0, %v2341_v60  ;;  %2068 = vmatmul.msk.bf16.gmra.mxu1 %vm138_vm0, %v2341_v60 }
 0x4a3   :  { %2065 = vmatmul.msk.bf16.gmra.mxu0 %vm138_vm0, %v2342_v49  ;;  %2069 = vmatmul.msk.bf16.gmra.mxu1 %vm138_vm0, %v2342_v49 }
 0x508   :  { %v431_v11 = vpop.f32.mrf.mxu2  ;;  %v444_v40 = vpop.f32.mrf.mxu3 }
 0x509   :  { %v448_v12 = vadd.f32 %v431_v11, %v168_v10  ;;  %v449_v47 = vadd.f32 %v444_v40, %v197_v44 }
 0x50b   :  { %2427 = vtanh.f32 %v448_v12 }
 0x50c   :  { %2429 = vtanh.f32 %v449_v47 }
 0x510   :  { %v433_v48 = vpop.f32.mrf.mxu2  ;;  %v446_v53 = vpop.f32.mrf.mxu3 }
 0x511   :  { %v2428_v13 = vpop.eup %2427  ;;  %v170_v29 = vpop.f32.mrf.mxu0 }
 0x512   :  { %v452_v54 = vmul.f32 0.5, %v2428_v13  ;;  %v2430_v59 = vpop.eup %2429  ;;  %v171_v30 = vadd.f32 %v170_v29, %v2659_v26  ;;  %v199_v31 = vpop.f32.mrf.mxu1  ;;  %v2369_v29 = vld [vmem:[#allocation4 + $0x74] sm:$0xf] }
 0x513   :  { %v454_v19 = vmul.f32 0.5, %v2430_v59  ;;  %v200_v32 = vadd.f32 %v199_v31, %v2661_v27  ;;  %v2161_v31 = vld [vmem:[#allocation4 + $0x78] sm:$0xf0] }
 0x514   :  { %v453_v14 = vadd.f32 0.5, %v452_v54 }
 0x515   :  { %v455_v20 = vadd.f32 0.5, %v454_v19 }
 0x516   :  { %v457_v15 = vmul.f32 %v2430_v59, %v453_v14  ;;  %v456_v16 = vmul.f32 %v453_v14, %v404_v62 }
 0x518   :  { %459 = vrot.lane.b32.xlu0 %v457_v15, %s2609_s11 }
 0x519   :  { %v172_v2 = vpop.f32.mrf.mxu0 }
 0x51a   :  { %v201_v5 = vpop.f32.mrf.mxu1 }
 0x51b   :  { %v202_v40 = vadd.f32 %v201_v5, %v2661_v27 }
 0x521   :  { %v2798_v6 = vpop.f32.mrf.mxu0 }
 0x522   :  { %v2800_v7 = vpop.f32.mrf.mxu1 }
 0x529   :  { %v2802_v8 = vpop.f32.mrf.mxu0 }
 0x52a   :  { %v2804_v9 = vpop.f32.mrf.mxu1 }
 0x58a   :  { %v460_v17 = vpop.permute.xlu0 %459 }
 0x58b   :  { %v462_v18 = vadd.f32 %v460_v17, %v456_v16 }
 0x58d   :  { %2431 = vtanh.f32 %v462_v18 }
 0x593   :  { %v2432_v21 = vpop.eup %2431 }
 0x594   :  { %v464_v22 = vmul.f32 %v2432_v21, %v455_v20 }
 0x596   :  { %v2775_v23 = vpack.c.bf16 %v464_v22, %v464_v22 }
 0x598   :  { %v473_v24 = vunpack.c.l.b16 %v2775_v23 }
 0x59a   :  { %v474_v25 = vpack.c.b16 %v473_v24, %v473_v24 }
 0x59c   :  { %475 = vrot.lane.b32.xlu1 %v474_v25, %s2609_s11 }
 0x60e   :  { %v476_v28 = vpop.permute.xlu1 %475 }
 0x60f   :  { %2108 = vmatmul.msk.bf16.vlgmr.msrb.gmra.mxu2 %vm138_vm0, %v476_v28  ;;  %2109 = vmatmul.msk.bf16.vlgmr.msrb.gmra.mxu3 %vm138_vm0, %v476_v28  ;;  %v2370_v28 = vld [vmem:[#allocation4 + $0x74] sm:$0xf0] }
 0x692   :  { %v489_v34 = vpop.f32.mrf.mxu2  ;;  %v502_v35 = vpop.f32.mrf.mxu3 }
 0x693   :  { %v506_v36 = vadd.f32 %v489_v34, %v171_v30  ;;  %v507_v37 = vadd.f32 %v502_v35, %v200_v32  ;;  %v2151_v32 = vld [vmem:[#allocation4 + $0x60] sm:$0xf]  ;;  %v2368_v34 = vld [vmem:[#allocation4 + $0x64] sm:$0xf0]  ;;  %v2164_v35 = vor.u32 %v2369_v29, %v2161_v31 }
 0x695   :  { %2433 = vtanh.f32 %v506_v36  ;;  %v2367_v36 = vld [vmem:[#allocation4 + $0x64] sm:$0xf]  ;;  %832 = vmatpush.bf16.msrb.mxu3 %v2164_v35 }
 0x696   :  { %2435 = vtanh.f32 %v507_v37  ;;  %v2153_v37 = vld [vmem:[#allocation4 + $0x68] sm:$0xf0] }
 0x69a   :  { %v491_v38 = vpop.f32.mrf.mxu2  ;;  %v504_v39 = vpop.f32.mrf.mxu3 }
 0x69b   :  { %v2434_v41 = vpop.eup %2433  ;;  %v2152_v38 = vor.u32 %v2368_v34, %v2151_v32  ;;  %v2156_v39 = vor.u32 %v2367_v36, %v2153_v37 }
 0x69c   :  { %v510_v42 = vmul.f32 0.5, %v2434_v41  ;;  %v2436_v45 = vpop.eup %2435  ;;  %v2143_v41 = vld [vmem:[#allocation4 + $0x50] sm:$0xf] }
 0x69d   :  { %v512_v55 = vmul.f32 0.5, %v2436_v45  ;;  %833 = vmatpush.bf16.msrb.mxu3 %v2156_v39 }
 0x69e   :  { %v511_v43 = vadd.f32 0.5, %v510_v42  ;;  %v2366_v42 = vld [vmem:[#allocation4 + $0x54] sm:$0xf0] }
 0x69f   :  { %v513_v56 = vadd.f32 0.5, %v512_v55  ;;  %v2137_v55 = vld [vmem:[#allocation4 + $0x48] sm:$0xf0] }
 0x6a0   :  { %v515_v46 = vmul.f32 %v2436_v45, %v511_v43  ;;  %v514_v50 = vmul.f32 %v511_v43, %v462_v18  ;;  %v2365_v43 = vld [vmem:[#allocation4 + $0x54] sm:$0xf]  ;;  %v2145_v45 = vld [vmem:[#allocation4 + $0x58] sm:$0xf0] }
 0x6a1   :  { %v2148_v49 = vor.u32 %v2365_v43, %v2145_v45  ;;  %v2378_v45 = vld [vmem:[#allocation6 + $0x74] sm:$0xf0] }
 0x6a2   :  { %517 = vrot.lane.b32.xlu2 %v515_v46, %s2609_s11  ;;  %v2144_v46 = vor.u32 %v2366_v42, %v2143_v41 }
 0x6a3   :  { %834 = vmatpush.bf16.msrb.mxu3 %v2148_v49 }
 0x6fc   :  { %v518_v51 = vpop.permute.xlu2 %517 }
 0x6fd   :  { %v520_v52 = vadd.f32 %v518_v51, %v514_v50  ;;  %v2135_v50 = vld [vmem:[#allocation4 + $0x40] sm:$0xf]  ;;  %v2364_v51 = vld [vmem:[#allocation4 + $0x44] sm:$0xf0] }
 0x6ff   :  { %2437 = vtanh.f32 %v520_v52 }
 0x705   :  { %v2438_v57 = vpop.eup %2437 }
 0x706   :  { %v522_v58 = vmul.f32 %v2438_v57, %v513_v56  ;;  %v2136_v56 = vor.u32 %v2364_v51, %v2135_v50  ;;  %v2201_v50 = vld [vmem:[#allocation6 + $0x78] sm:$0xf0]  ;;  %v2191_v51 = vld [vmem:[#allocation6 + $0x60] sm:$0xf] }
 0x708   :  { %v2789_v61 = vpack.c.bf16 %v522_v58, %v522_v58 }
 0x70a   :  { %v531_v62 = vunpack.c.l.b16 %v2789_v61 }
 0x70c   :  { %v532_v63 = vpack.c.b16 %v531_v62, %v531_v62 }
 0x70e   :  { %533 = vrot.lane.b32.xlu0 %v532_v63, %s2609_s11  ;;  %v176_v63 = vadd.f32 %v2798_v6, %v2659_v26 }
 0x716   :  { %252 = vrot.lane.b32.xlu0 %v2708_v4, %s2609_s11  ;;  %v173_v4 = vadd.f32 %v172_v2, %v2659_v26  ;;  %v205_v2 = vadd.f32 %v2800_v7, %v2661_v27 }
 0x780   :  { %v534_v0 = vpop.permute.xlu0 %533 }
 0x781   :  { %2110 = vmatmul.msk.bf16.vlgmr.msrb.gmra.mxu0 %vm138_vm0, %v534_v0  ;;  %2111 = vmatmul.msk.bf16.vlgmr.msrb.gmra.mxu1 %vm138_vm0, %v534_v0 }
 0x788   :  { %v253_v1 = vpop.permute.xlu0 %252 }
 0x789   :  { %256 = vst.msk [vmem:[#allocation2] sm:$0xf] %vm255_vm1, %v253_v1 }
 0x7fe   :  { %v547_v10 = vpop.f32.mrf.mxu0  ;;  %v560_v11 = vpop.f32.mrf.mxu1 }
 0x7ff   :  { %v564_v44 = vadd.f32 %v547_v10, %v173_v4  ;;  %v565_v12 = vadd.f32 %v560_v11, %v202_v40 }
 0x801   :  { %2439 = vtanh.f32 %v564_v44 }
 0x802   :  { %2441 = vtanh.f32 %v565_v12  ;;  %v2116_v12 = vld [vmem:[%s3234_s3 + $0x2] sm:$0x3] }
 0x803   :  { %v2830_v6 = vperm.slane %v2116_v12, 0 }
 0x806   :  { %v549_v47 = vpop.f32.mrf.mxu0  ;;  %v562_v48 = vpop.f32.mrf.mxu1 }
 0x807   :  { %v2440_v53 = vpop.eup %2439 }
 0x808   :  { %v568_v13 = vmul.f32 0.5, %v2440_v53  ;;  %v2442_v14 = vpop.eup %2441 }
 0x809   :  { %v570_v17 = vmul.f32 0.5, %v2442_v14 }
 0x80a   :  { %v569_v54 = vadd.f32 0.5, %v568_v13  ;;  %v2832_v13 = vperm.slane %v2116_v12, 1 }
 0x80b   :  { %v571_v18 = vadd.f32 0.5, %v570_v17 }
 0x80c   :  { %v573_v59 = vmul.f32 %v2442_v14, %v569_v54  ;;  %v572_v15 = vmul.f32 %v569_v54, %v520_v52  ;;  %v2363_v52 = vld [vmem:[#allocation4 + $0x44] sm:$0xf] }
 0x80d   :  { %v2140_v57 = vor.u32 %v2363_v52, %v2137_v55  ;;  %v2376_v52 = vld [vmem:[#allocation6 + $0x64] sm:$0xf0] }
 0x80e   :  { %575 = vrot.lane.b32.xlu1 %v573_v59, %s2609_s11 }
 0x80f   :  { %835 = vmatpush.bf16.msrb.mxu3 %v2140_v57  ;;  %v2193_v57 = vld [vmem:[#allocation6 + $0x68] sm:$0xf0] }
 0x816   :  { %351 = vrot.lane.b32.xlu1 %v2736_v33, %s2609_s11  ;;  %v2159_v33 = vld [vmem:[#allocation4 + $0x70] sm:$0xf] }
 0x817   :  { %v2160_v30 = vor.u32 %v2370_v28, %v2159_v33 }
 0x819   :  { %803 = vmatpush.bf16.msrb.mxu2 %v2160_v30 }
 0x81d   :  { %804 = vmatpush.bf16.msrb.mxu2 %v2152_v38 }
 0x821   :  { %805 = vmatpush.bf16.msrb.mxu2 %v2144_v46  ;;  %v2377_v46 = vld [vmem:[#allocation6 + $0x74] sm:$0xf] }
 0x822   :  { %v2859_v55 = vor.u32 %v2377_v46, %v2201_v50 }
 0x824   :  { %971 = vmatpush.bf16.msrb.mxu1 %v2859_v55 }
 0x825   :  { %806 = vmatpush.bf16.msrb.mxu2 %v2136_v56  ;;  %v2375_v56 = vld [vmem:[#allocation6 + $0x64] sm:$0xf] }
 0x880   :  { %v576_v60 = vpop.permute.xlu1 %575 }
 0x881   :  { %v2811_v16 = vadd.f32 %v576_v60, %v572_v15 }
 0x883   :  { %2443 = vtanh.f32 %v2811_v16 }
 0x888   :  { %v352_v19 = vpop.permute.xlu1 %351 }
 0x889   :  { %v2444_v20 = vpop.eup %2443  ;;  %354 = vst.msk [vmem:[#allocation2 + $0x4] sm:$0xf] %vm255_vm1, %v352_v19 }
 0x88a   :  { %v580_v21 = vmul.f32 %v2444_v20, %v571_v18 }
 0x88c   :  { %v2815_v22 = vpack.c.bf16 %v580_v21, %v580_v21 }
 0x88e   :  { %v589_v24 = vunpack.c.l.b16 %v2815_v22 }
 0x890   :  { %v590_v25 = vpack.c.b16 %v589_v24, %v589_v24  ;;  %v2359_v62 = vld [vmem:[#allocation2] sm:$0xff] }
 0x892   :  { %591 = vrot.lane.b32.xlu2 %v590_v25, %s2609_s11 }
 0x8ec   :  { %v592_v58 = vpop.permute.xlu2 %591 }
 0x8ed   :  { %2112 = vmatmul.msk.bf16.vlgmr.msra.gmra.mxu2 %vm138_vm0, %v592_v58  ;;  %2113 = vmatmul.msk.bf16.vlgmr.msra.gmra.mxu3 %vm138_vm0, %v592_v58  ;;  %v2862_v58 = vor.u32 %v2376_v52, %v2191_v51 }
 0x8ee   :  { %1203 = vmatpush.bf16.msra.mxu3 %v2859_v55 }
 0x8fd   :  { %2165 = vmatmul.msk.bf16.vlgmr.msrb.gmra.mxu2 %vm138_vm0, %v2359_v62  ;;  %2169 = vmatmul.msk.bf16.vlgmr.msrb.gmra.mxu3 %vm138_vm0, %v2359_v62  ;;  %v2183_v62 = vld [vmem:[#allocation6 + $0x50] sm:$0xf] }
 0x970   :  { %v605_v0 = vpop.f32.mrf.mxu2  ;;  %v618_v1 = vpop.f32.mrf.mxu3 }
 0x971   :  { %v622_v5 = vadd.f32 %v605_v0, %v176_v63  ;;  %v623_v4 = vadd.f32 %v618_v1, %v205_v2  ;;  %v2374_v63 = vld [vmem:[#allocation6 + $0x54] sm:$0xf0]  ;;  %v2373_v0 = vld [vmem:[#allocation6 + $0x54] sm:$0xf]  ;;  %v2185_v2 = vld [vmem:[#allocation6 + $0x58] sm:$0xf0] }
 0x972   :  { %v2873_v1 = vor.u32 %v2374_v63, %v2183_v62 }
 0x973   :  { %2445 = vtanh.f32 %v622_v5  ;;  %v2175_v5 = vld [vmem:[#allocation6 + $0x40] sm:$0xf] }
 0x974   :  { %2447 = vtanh.f32 %v623_v4  ;;  %v2372_v4 = vld [vmem:[#allocation6 + $0x44] sm:$0xf0] }
 0x978   :  { %v607_v10 = vpop.f32.mrf.mxu2  ;;  %v620_v11 = vpop.f32.mrf.mxu3 }
 0x979   :  { %v2446_v40 = vpop.eup %2445  ;;  %v2875_v10 = vor.u32 %v2373_v0, %v2185_v2  ;;  %v2371_v11 = vld [vmem:[#allocation6 + $0x44] sm:$0xf] }
 0x97a   :  { %v626_v44 = vmul.f32 0.5, %v2446_v40  ;;  %v2448_v48 = vpop.eup %2447  ;;  %v2177_v40 = vld [vmem:[#allocation6 + $0x48] sm:$0xf0] }
 0x97b   :  { %v628_v25 = vmul.f32 0.5, %v2448_v48  ;;  %v2882_v12 = vor.u32 %v2371_v11, %v2177_v40 }
 0x97c   :  { %v627_v47 = vadd.f32 0.5, %v626_v44  ;;  %v2878_v44 = vor.u32 %v2372_v4, %v2175_v5 }
 0x97d   :  { %v629_v33 = vadd.f32 0.5, %v628_v25 }
 0x97e   :  { %v631_v53 = vmul.f32 %v2448_v48, %v627_v47  ;;  %v630_v20 = vmul.f32 %v627_v47, %v2811_v16 }
 0x980   :  { %633 = vrot.lane.b32.xlu2 %v631_v53, %s2609_s11  ;;  %v808_v7 = vpop.f32.mrf.mxu2  ;;  %v837_v54 = vpop.f32.mrf.mxu3 }
 0x981   :  { %v809_v14 = vadd.f32 %v808_v7, %v2830_v6  ;;  %v838_v59 = vadd.f32 %v837_v54, %v2832_v13 }
 0x983   :  { %2449 = vtanh.f32 %v809_v14  ;;  %v178_v14 = vadd.f32 %v2802_v8, %v2659_v26 }
 0x984   :  { %2451 = vtanh.f32 %v838_v59 }
 0x988   :  { %v839_v8 = vpop.f32.mrf.mxu3 }
 0x989   :  { %v2450_v15 = vpop.eup %2449 }
 0x98a   :  { %v886_v60 = vmul.f32 0.5, %v2450_v15  ;;  %v2452_v18 = vpop.eup %2451 }
 0x98b   :  { %v888_v36 = vmul.f32 0.5, %v2452_v18 }
 0x98c   :  { %v887_v17 = vadd.f32 0.5, %v886_v60  ;;  %v207_v60 = vadd.f32 %v2804_v9, %v2661_v27 }
 0x98d   :  { %v889_v37 = vadd.f32 0.5, %v888_v36 }
 0x98e   :  { %v891_v19 = vmul.f32 %v2452_v18, %v887_v17  ;;  %v890_v16 = vmul.f32 0.0, %v887_v17 }
 0x990   :  { %893 = vrot.lane.b32.xlu0 %v891_v19, %s2609_s11 }
 0x9da   :  { %v634_v21 = vpop.permute.xlu2 %633 }
 0x9db   :  { %v2839_v24 = vadd.f32 %v634_v21, %v630_v20 }
 0x9dd   :  { %2453 = vtanh.f32 %v2839_v24 }
 0x9e3   :  { %v2454_v28 = vpop.eup %2453 }
 0x9e4   :  { %v638_v29 = vmul.f32 %v2454_v28, %v629_v33 }
 0x9e6   :  { %v2842_v30 = vpack.c.bf16 %v638_v29, %v638_v29  ;;  %v810_v29 = vpop.f32.mrf.mxu2 }
 0x9e8   :  { %v647_v31 = vunpack.c.l.b16 %v2842_v30 }
 0x9ea   :  { %v648_v32 = vpack.c.b16 %v647_v31, %v647_v31  ;;  %v811_v31 = vadd.f32 %v810_v29, %v2830_v6 }
 0x9ec   :  { %649 = vrot.lane.b32.xlu1 %v648_v32, %s2609_s11  ;;  %v840_v32 = vadd.f32 %v839_v8, %v2832_v13 }
 0x9f4   :  { %409 = vrot.lane.b32.xlu1 %v2753_v3, %s2609_s11  ;;  %v2199_v3 = vld [vmem:[#allocation6 + $0x70] sm:$0xf] }
 0x9f5   :  { %v2857_v49 = vor.u32 %v2378_v45, %v2199_v3 }
 0x9f7   :  { %958 = vmatpush.bf16.msrb.mxu0 %v2857_v49  ;;  %1190 = vmatpush.bf16.msra.mxu2 %v2857_v49 }
 0x9fb   :  { %959 = vmatpush.bf16.msrb.mxu0 %v2862_v58  ;;  %1191 = vmatpush.bf16.msra.mxu2 %v2862_v58 }
 0x9ff   :  { %960 = vmatpush.bf16.msrb.mxu0 %v2873_v1  ;;  %1192 = vmatpush.bf16.msra.mxu2 %v2873_v1 }
 0xa02   :  { %v894_v34 = vpop.permute.xlu0 %893 }
 0xa03   :  { %v2848_v35 = vadd.f32 %v894_v34, %v890_v16  ;;  %961 = vmatpush.bf16.msrb.mxu0 %v2878_v44  ;;  %1193 = vmatpush.bf16.msra.mxu2 %v2878_v44 }
 0xa05   :  { %2455 = vtanh.f32 %v2848_v35 }
 0xa07   :  { %1306 = vmatpush.bf16.msrb.mxu2 %v2857_v49 }
 0xa0b   :  { %v2456_v38 = vpop.eup %2455  ;;  %1307 = vmatpush.bf16.msrb.mxu2 %v2862_v58 }
 0xa0c   :  { %v898_v39 = vmul.f32 %v2456_v38, %v889_v37 }
 0xa0e   :  { %v2851_v41 = vpack.c.bf16 %v898_v39, %v898_v39 }
 0xa0f   :  { %1308 = vmatpush.bf16.msrb.mxu2 %v2873_v1 }
 0xa10   :  { %v907_v42 = vunpack.c.l.b16 %v2851_v41 }
 0xa12   :  { %v908_v43 = vpack.c.b16 %v907_v42, %v907_v42 }
 0xa13   :  { %1309 = vmatpush.bf16.msrb.mxu2 %v2878_v44 }
 0xa14   :  { %909 = vrot.lane.b32.xlu2 %v908_v43, %s2609_s11 }
 0xa1c   :  { %467 = vrot.lane.b32.xlu2 %v2775_v23, %s2609_s11  ;;  %v2866_v23 = vor.u32 %v2375_v56, %v2193_v57 }
 0xa1e   :  { %972 = vmatpush.bf16.msrb.mxu1 %v2866_v23  ;;  %1204 = vmatpush.bf16.msra.mxu3 %v2866_v23 }
 0xa22   :  { %973 = vmatpush.bf16.msrb.mxu1 %v2875_v10  ;;  %1205 = vmatpush.bf16.msra.mxu3 %v2875_v10 }
 0xa26   :  { %974 = vmatpush.bf16.msrb.mxu1 %v2882_v12  ;;  %1206 = vmatpush.bf16.msra.mxu3 %v2882_v12 }
 0xa2a   :  { %1319 = vmatpush.bf16.msrb.mxu3 %v2859_v55 }
 0xa2e   :  { %1320 = vmatpush.bf16.msrb.mxu3 %v2866_v23 }
 0xa32   :  { %1321 = vmatpush.bf16.msrb.mxu3 %v2875_v10 }
 0xa36   :  { %1322 = vmatpush.bf16.msrb.mxu3 %v2882_v12 }
 0xa5e   :  { %v650_v47 = vpop.permute.xlu1 %649 }
 0xa5f   :  { %2114 = vmatmul.msk.bf16.vlgmr.msra.gmra.mxu0 %vm138_vm0, %v650_v47  ;;  %2115 = vmatmul.msk.bf16.vlgmr.msra.gmra.mxu1 %vm138_vm0, %v650_v47 }
 0xa60   :  { %1016 = vmatpush.bf16.msra.mxu0 %v2857_v49  ;;  %1029 = vmatpush.bf16.msra.mxu1 %v2859_v55 }
 0xa64   :  { %1017 = vmatpush.bf16.msra.mxu0 %v2862_v58  ;;  %1030 = vmatpush.bf16.msra.mxu1 %v2866_v23 }
 0xa66   :  { %v410_v48 = vpop.permute.xlu1 %409 }
 0xa67   :  { %412 = vst.msk [vmem:[#allocation2 + $0x8] sm:$0xf] %vm255_vm1, %v410_v48 }
 0xa68   :  { %1018 = vmatpush.bf16.msra.mxu0 %v2873_v1  ;;  %1031 = vmatpush.bf16.msra.mxu1 %v2875_v10 }
 0xa6c   :  { %1019 = vmatpush.bf16.msra.mxu0 %v2878_v44  ;;  %1032 = vmatpush.bf16.msra.mxu1 %v2882_v12 }
 0xa6e   :  { %v910_v53 = vpop.permute.xlu2 %909 }
 0xa6f   :  { %2205 = vmatmul.msk.bf16.vlgmr.msrb.gmra.mxu0 %vm138_vm0, %v910_v53  ;;  %2206 = vmatmul.msk.bf16.vlgmr.msrb.gmra.mxu1 %vm138_vm0, %v910_v53 }
 0xa70   :  { %1074 = vmatpush.bf16.msrb.mxu0 %v2857_v49  ;;  %1087 = vmatpush.bf16.msrb.mxu1 %v2859_v55 }
 0xa74   :  { %1075 = vmatpush.bf16.msrb.mxu0 %v2862_v58  ;;  %1088 = vmatpush.bf16.msrb.mxu1 %v2866_v23 }
 0xa76   :  { %v468_v7 = vpop.permute.xlu2 %467 }
 0xa77   :  { %470 = vst.msk [vmem:[#allocation2 + $0xc] sm:$0xf] %vm255_vm1, %v468_v7 }
 0xa78   :  { %1076 = vmatpush.bf16.msrb.mxu0 %v2873_v1  ;;  %1089 = vmatpush.bf16.msrb.mxu1 %v2875_v10 }
 0xa7c   :  { %1077 = vmatpush.bf16.msrb.mxu0 %v2878_v44  ;;  %1090 = vmatpush.bf16.msrb.mxu1 %v2882_v12 }
 0xa7e   :  { %v2360_v54 = vld [vmem:[#allocation2 + $0x8] sm:$0xff] }
 0xa7f   :  { %2166 = vmatmul.msk.bf16.gmra.mxu2 %vm138_vm0, %v2360_v54  ;;  %2170 = vmatmul.msk.bf16.gmra.mxu3 %vm138_vm0, %v2360_v54 }
 0xadc   :  { %v663_v59 = vpop.f32.mrf.mxu0  ;;  %v676_v15 = vpop.f32.mrf.mxu1 }
 0xadd   :  { %v680_v17 = vadd.f32 %v663_v59, %v178_v14  ;;  %v681_v18 = vadd.f32 %v676_v15, %v207_v60 }
 0xadf   :  { %2457 = vtanh.f32 %v680_v17 }
 0xae0   :  { %2459 = vtanh.f32 %v681_v18 }
 0xae4   :  { %v665_v19 = vpop.f32.mrf.mxu0  ;;  %v678_v20 = vpop.f32.mrf.mxu1 }
 0xae5   :  { %v2458_v21 = vpop.eup %2457 }
 0xae6   :  { %v684_v25 = vmul.f32 0.5, %v2458_v21  ;;  %v2927_v28 = vpop.eup %2459 }
 0xae8   :  { %v2925_v33 = vadd.f32 0.5, %v684_v25 }
 0xaea   :  { %v689_v26 = vmul.f32 %v2927_v28, %v2925_v33 }
 0xaec   :  { %v963_v27 = vpop.f32.mrf.mxu0  ;;  %v976_v9 = vpop.f32.mrf.mxu1 }
 0xaed   :  { %v980_v16 = vadd.f32 %v963_v27, %v811_v31  ;;  %v981_v34 = vadd.f32 %v976_v9, %v840_v32 }
 0xaef   :  { %2461 = vtanh.f32 %v980_v16 }
 0xaf0   :  { %2463 = vtanh.f32 %v981_v34  ;;  %v686_v34 = vmul.f32 0.5, %v2927_v28 }
 0xaf4   :  { %v965_v36 = vpop.f32.mrf.mxu0  ;;  %v978_v37 = vpop.f32.mrf.mxu1 }
 0xaf5   :  { %v2462_v38 = vpop.eup %2461  ;;  %v687_v36 = vadd.f32 0.5, %v686_v34 }
 0xaf6   :  { %v984_v39 = vmul.f32 0.5, %v2462_v38  ;;  %v2464_v43 = vpop.eup %2463 }
 0xaf7   :  { %v986_v51 = vmul.f32 0.5, %v2464_v43 }
 0xaf8   :  { %v985_v42 = vadd.f32 0.5, %v984_v39 }
 0xaf9   :  { %v987_v52 = vadd.f32 0.5, %v986_v51 }
 0xafa   :  { %v989_v3 = vmul.f32 %v2464_v43, %v985_v42  ;;  %v988_v45 = vmul.f32 %v985_v42, %v2848_v35 }
 0xafc   :  { %991 = vrot.lane.b32.xlu0 %v989_v3, %s2609_s11 }
 0xb02   :  { %v813_v35 = vpop.f32.mrf.mxu2  ;;  %v842_v5 = vpop.f32.mrf.mxu3 }
 0xb03   :  { %v814_v4 = vadd.f32 %v813_v35, %v2830_v6  ;;  %v843_v47 = vadd.f32 %v842_v5, %v2832_v13 }
 0xb6e   :  { %v992_v46 = vpop.permute.xlu0 %991 }
 0xb6f   :  { %v994_v50 = vadd.f32 %v992_v46, %v988_v45 }
 0xb71   :  { %2465 = vtanh.f32 %v994_v50 }
 0xb77   :  { %v2466_v56 = vpop.eup %2465 }
 0xb78   :  { %v996_v57 = vmul.f32 %v2466_v56, %v987_v52 }
 0xb7a   :  { %v2935_v62 = vpack.c.bf16 %v996_v57, %v996_v57 }
 0xb7c   :  { %v1005_v63 = vunpack.c.l.b16 %v2935_v62 }
 0xb7e   :  { %v1006_v0 = vpack.c.b16 %v1005_v63, %v1005_v63 }
 0xb80   :  { %1007 = vrot.lane.b32.xlu0 %v1006_v0, %s2609_s11 }
 0xbf2   :  { %v1008_v2 = vpop.permute.xlu0 %1007 }
 0xbf3   :  { %2207 = vmatmul.msk.bf16.vlgmr.msra.gmra.mxu0 %vm138_vm0, %v1008_v2  ;;  %2208 = vmatmul.msk.bf16.vlgmr.msra.gmra.mxu1 %vm138_vm0, %v1008_v2 }
 0xbf4   :  { %1132 = vmatpush.bf16.msra.mxu0 %v2857_v49  ;;  %1145 = vmatpush.bf16.msra.mxu1 %v2859_v55 }
 0xbf8   :  { %1133 = vmatpush.bf16.msra.mxu0 %v2862_v58  ;;  %1146 = vmatpush.bf16.msra.mxu1 %v2866_v23 }
 0xbfc   :  { %1134 = vmatpush.bf16.msra.mxu0 %v2873_v1  ;;  %1147 = vmatpush.bf16.msra.mxu1 %v2875_v10 }
 0xc00   :  { %1135 = vmatpush.bf16.msra.mxu0 %v2878_v44  ;;  %1148 = vmatpush.bf16.msra.mxu1 %v2882_v12 }
 0xc70   :  { %v1021_v11 = vpop.f32.mrf.mxu0  ;;  %v1034_v40 = vpop.f32.mrf.mxu1 }
 0xc71   :  { %v1038_v48 = vadd.f32 %v1021_v11, %v814_v4  ;;  %v1039_v53 = vadd.f32 %v1034_v40, %v843_v47 }
 0xc73   :  { %2467 = vtanh.f32 %v1038_v48 }
 0xc74   :  { %2469 = vtanh.f32 %v1039_v53 }
 0xc78   :  { %v1023_v7 = vpop.f32.mrf.mxu0  ;;  %v1036_v54 = vpop.f32.mrf.mxu1 }
 0xc79   :  { %v2468_v14 = vpop.eup %2467 }
 0xc7a   :  { %v1042_v59 = vmul.f32 0.5, %v2468_v14  ;;  %v2470_v60 = vpop.eup %2469 }
 0xc7b   :  { %v1044_v21 = vmul.f32 0.5, %v2470_v60 }
 0xc7c   :  { %v1043_v15 = vadd.f32 0.5, %v1042_v59 }
 0xc7d   :  { %v1045_v25 = vadd.f32 0.5, %v1044_v21 }
 0xc7e   :  { %v1047_v17 = vmul.f32 %v2470_v60, %v1043_v15  ;;  %v1046_v18 = vmul.f32 %v1043_v15, %v994_v50 }
 0xc80   :  { %1049 = vrot.lane.b32.xlu1 %v1047_v17, %s2609_s11 }
 0xc88   :  { %525 = vrot.lane.b32.xlu1 %v2789_v61, %s2609_s11  ;;  %v688_v61 = vmul.f32 %v2925_v33, %v2839_v24 }
 0xc90   :  { %691 = vrot.lane.b32.xlu1 %v689_v26, %s2609_s11 }
 0xcf2   :  { %v1050_v19 = vpop.permute.xlu1 %1049 }
 0xcf3   :  { %v1052_v20 = vadd.f32 %v1050_v19, %v1046_v18 }
 0xcf5   :  { %2471 = vtanh.f32 %v1052_v20 }
 0xcfa   :  { %v526_v29 = vpop.permute.xlu1 %525 }
 0xcfb   :  { %v2472_v8 = vpop.eup %2471  ;;  %528 = vst.msk [vmem:[#allocation2 + $0x10] sm:$0xf] %vm255_vm1, %v526_v29 }
 0xcfc   :  { %v1054_v31 = vmul.f32 %v2472_v8, %v1045_v25 }
 0xcfe   :  { %v2956_v27 = vpack.c.bf16 %v1054_v31, %v1054_v31 }
 0xd00   :  { %v1063_v9 = vunpack.c.l.b16 %v2956_v27 }
 0xd02   :  { %v692_v32 = vpop.permute.xlu1 %691  ;;  %v1064_v26 = vpack.c.b16 %v1063_v9, %v1063_v9 }
 0xd03   :  { %v694_v16 = vadd.f32 %v692_v32, %v688_v61 }
 0xd04   :  { %1065 = vrot.lane.b32.xlu2 %v1064_v26, %s2609_s11 }
 0xd05   :  { %2473 = vtanh.f32 %v694_v16 }
 0xd0b   :  { %v2474_v37 = vpop.eup %2473 }
 0xd0c   :  { %583 = vrot.lane.b32.xlu2 %v2815_v22, %s2609_s11  ;;  %v696_v38 = vmul.f32 %v2474_v37, %v687_v36 }
 0xd0e   :  { %v697_v39 = vpack.c.bf16 %v696_v38, %v696_v38 }
 0xd10   :  { %699 = vrot.lane.b32.xlu1 %v697_v39, %s2609_s11 }
 0xd5e   :  { %v1066_v42 = vpop.permute.xlu2 %1065 }
 0xd5f   :  { %2209 = vmatmul.msk.bf16.vlgmr.msrb.gmra.mxu0 %vm138_vm0, %v1066_v42  ;;  %2210 = vmatmul.msk.bf16.vlgmr.msrb.gmra.mxu1 %vm138_vm0, %v1066_v42 }
 0xd60   :  { %1248 = vmatpush.bf16.msrb.mxu0 %v2857_v49  ;;  %1261 = vmatpush.bf16.msrb.mxu1 %v2859_v55  ;;  %v815_v55 = vpop.f32.mrf.mxu2 }
 0xd64   :  { %1249 = vmatpush.bf16.msrb.mxu0 %v2862_v58  ;;  %1262 = vmatpush.bf16.msrb.mxu1 %v2866_v23  ;;  %v844_v58 = vpop.f32.mrf.mxu3  ;;  %v816_v23 = vadd.f32 %v815_v55, %v2830_v6 }
 0xd66   :  { %v584_v24 = vpop.permute.xlu2 %583 }
 0xd67   :  { %586 = vst.msk [vmem:[#allocation2 + $0x14] sm:$0xf] %vm255_vm1, %v584_v24 }
 0xd68   :  { %1250 = vmatpush.bf16.msrb.mxu0 %v2873_v1  ;;  %1263 = vmatpush.bf16.msrb.mxu1 %v2875_v10  ;;  %v845_v10 = vadd.f32 %v844_v58, %v2832_v13 }
 0xd6c   :  { %1251 = vmatpush.bf16.msrb.mxu0 %v2878_v44  ;;  %1264 = vmatpush.bf16.msrb.mxu1 %v2882_v12 }
 0xd6e   :  { %v2361_v22 = vld [vmem:[#allocation2 + $0x10] sm:$0xff] }
 0xd6f   :  { %2167 = vmatmul.msk.bf16.gmra.mxu2 %vm138_vm0, %v2361_v22  ;;  %2171 = vmatmul.msk.bf16.gmra.mxu3 %vm138_vm0, %v2361_v22 }
 0xd82   :  { %v700_v49 = vpop.permute.xlu1 %699 }
 0xd83   :  { %702 = vst.msk [vmem:[#allocation2 + $0x1c] sm:$0xf] %vm255_vm1, %v700_v49 }
 0xddc   :  { %v1079_v33 = vpop.f32.mrf.mxu0  ;;  %v1092_v1 = vpop.f32.mrf.mxu1 }
 0xddd   :  { %v1096_v28 = vadd.f32 %v1079_v33, %v816_v23  ;;  %v1097_v44 = vadd.f32 %v1092_v1, %v845_v10 }
 0xddf   :  { %2475 = vtanh.f32 %v1096_v28 }
 0xde0   :  { %2477 = vtanh.f32 %v1097_v44 }
 0xde4   :  { %v1081_v12 = vpop.f32.mrf.mxu0  ;;  %v1094_v43 = vpop.f32.mrf.mxu1 }
 0xde5   :  { %v2476_v3 = vpop.eup %2475 }
 0xde6   :  { %v1100_v45 = vmul.f32 0.5, %v2476_v3  ;;  %v2478_v50 = vpop.eup %2477 }
 0xde7   :  { %v1102_v63 = vmul.f32 0.5, %v2478_v50 }
 0xde8   :  { %v1101_v46 = vadd.f32 0.5, %v1100_v45 }
 0xde9   :  { %v1103_v0 = vadd.f32 0.5, %v1102_v63 }
 0xdea   :  { %v1105_v51 = vmul.f32 %v2478_v50, %v1101_v46  ;;  %v1104_v52 = vmul.f32 %v1101_v46, %v1052_v20 }
 0xdec   :  { %1107 = vrot.lane.b32.xlu0 %v1105_v51, %s2609_s11 }
 0xdf2   :  { %v818_v53 = vpop.f32.mrf.mxu2  ;;  %v847_v7 = vpop.f32.mrf.mxu3 }
 0xdf3   :  { %v819_v54 = vadd.f32 %v818_v53, %v2830_v6 }
 0xdfa   :  { %v820_v42 = vpop.f32.mrf.mxu2  ;;  %v849_v24 = vpop.f32.mrf.mxu3 }
 0xdfb   :  { %v850_v1 = vadd.f32 %v849_v24, %v2832_v13 }
 0xe5e   :  { %v1108_v56 = vpop.permute.xlu0 %1107 }
 0xe5f   :  { %v1110_v57 = vadd.f32 %v1108_v56, %v1104_v52 }
 0xe61   :  { %2479 = vtanh.f32 %v1110_v57 }
 0xe67   :  { %v2480_v2 = vpop.eup %2479 }
 0xe68   :  { %v1112_v35 = vmul.f32 %v2480_v2, %v1103_v0 }
 0xe6a   :  { %v2983_v5 = vpack.c.bf16 %v1112_v35, %v1112_v35 }
 0xe6c   :  { %v1121_v4 = vunpack.c.l.b16 %v2983_v5 }
 0xe6e   :  { %v1122_v11 = vpack.c.b16 %v1121_v4, %v1121_v4 }
 0xe70   :  { %1123 = vrot.lane.b32.xlu0 %v1122_v11, %s2609_s11 }
 0xe78   :  { %641 = vrot.lane.b32.xlu0 %v2842_v30, %s2609_s11  ;;  %v848_v30 = vadd.f32 %v847_v7, %v2832_v13  ;;  %v2264_v7 = vld [vmem:[#allocation4 + $0xb8] sm:$0xf0] }
 0xee2   :  { %v1124_v40 = vpop.permute.xlu0 %1123 }
 0xee3   :  { %2211 = vmatmul.msk.bf16.vlgmr.msra.gmra.mxu0 %vm138_vm0, %v1124_v40  ;;  %2212 = vmatmul.msk.bf16.vlgmr.msra.gmra.mxu1 %vm138_vm0, %v1124_v40 }
 0xeea   :  { %v642_v47 = vpop.permute.xlu0 %641 }
 0xeeb   :  { %644 = vst.msk [vmem:[#allocation2 + $0x18] sm:$0xf] %vm255_vm1, %v642_v47  ;;  %v2390_v47 = vld [vmem:[#allocation4 + $0xb4] sm:$0xf0] }
 0xef2   :  { %v2362_v48 = vld [vmem:[#allocation2 + $0x18] sm:$0xff] }
 0xef3   :  { %2168 = vmatmul.msk.bf16.gmra.mxu2 %vm138_vm0, %v2362_v48  ;;  %2172 = vmatmul.msk.bf16.gmra.mxu3 %vm138_vm0, %v2362_v48  ;;  %v2389_v48 = vld [vmem:[#allocation4 + $0xb4] sm:$0xf] }
 0xf60   :  { %v1137_v14 = vpop.f32.mrf.mxu0  ;;  %v1150_v59 = vpop.f32.mrf.mxu1 }
 0xf61   :  { %v1154_v15 = vadd.f32 %v1137_v14, %v819_v54  ;;  %v1155_v60 = vadd.f32 %v1150_v59, %v848_v30  ;;  %v2254_v54 = vld [vmem:[#allocation4 + $0xa0] sm:$0xf]  ;;  %v2388_v14 = vld [vmem:[#allocation4 + $0xa4] sm:$0xf0]  ;;  %v2267_v59 = vor.u32 %v2389_v48, %v2264_v7  ;;  %v2387_v30 = vld [vmem:[#allocation4 + $0xa4] sm:$0xf] }
 0xf63   :  { %2481 = vtanh.f32 %v1154_v15  ;;  %v2256_v15 = vld [vmem:[#allocation4 + $0xa8] sm:$0xf0]  ;;  %1480 = vmatpush.bf16.msra.mxu1 %v2267_v59 }
 0xf64   :  { %2483 = vtanh.f32 %v1155_v60  ;;  %v2255_v60 = vor.u32 %v2388_v14, %v2254_v54 }
 0xf68   :  { %v1139_v17 = vpop.f32.mrf.mxu0  ;;  %v1152_v18 = vpop.f32.mrf.mxu1 }
 0xf69   :  { %v2482_v19 = vpop.eup %2481  ;;  %v2259_v17 = vor.u32 %v2387_v30, %v2256_v15  ;;  %v2246_v18 = vld [vmem:[#allocation4 + $0x90] sm:$0xf] }
 0xf6a   :  { %v1158_v20 = vmul.f32 0.5, %v2482_v19  ;;  %v2484_v25 = vpop.eup %2483  ;;  %v2386_v19 = vld [vmem:[#allocation4 + $0x94] sm:$0xf0] }
 0xf6b   :  { %v1160_v61 = vmul.f32 0.5, %v2484_v25  ;;  %1481 = vmatpush.bf16.msra.mxu1 %v2259_v17 }
 0xf6c   :  { %v1159_v21 = vadd.f32 0.5, %v1158_v20  ;;  %v2385_v20 = vld [vmem:[#allocation4 + $0x94] sm:$0xf] }
 0xf6d   :  { %v1161_v32 = vadd.f32 0.5, %v1160_v61  ;;  %v2240_v61 = vld [vmem:[#allocation4 + $0x88] sm:$0xf0] }
 0xf6e   :  { %v1163_v29 = vmul.f32 %v2484_v25, %v1159_v21  ;;  %v1162_v8 = vmul.f32 %v1159_v21, %v1110_v57  ;;  %v2248_v21 = vld [vmem:[#allocation4 + $0x98] sm:$0xf0]  ;;  %v2247_v25 = vor.u32 %v2386_v19, %v2246_v18  ;;  %v2302_v19 = vld [vmem:[#allocation6 + $0xb0] sm:$0xf] }
 0xf70   :  { %1165 = vrot.lane.b32.xlu2 %v1163_v29, %s2609_s11  ;;  %v2251_v29 = vor.u32 %v2385_v20, %v2248_v21  ;;  %v2398_v20 = vld [vmem:[#allocation6 + $0xb4] sm:$0xf0]  ;;  %v2397_v21 = vld [vmem:[#allocation6 + $0xb4] sm:$0xf] }
 0xf72   :  { %1482 = vmatpush.bf16.msra.mxu1 %v2251_v29  ;;  %v2304_v29 = vld [vmem:[#allocation6 + $0xb8] sm:$0xf0] }
 0xf76   :  { %v3006_v22 = vpop.f32.mrf.mxu2  ;;  %v3008_v49 = vpop.f32.mrf.mxu3 }
 0xf7e   :  { %v3010_v55 = vpop.f32.mrf.mxu2  ;;  %v3012_v58 = vpop.f32.mrf.mxu3 }
 0xfca   :  { %v1166_v31 = vpop.permute.xlu2 %1165 }
 0xfcb   :  { %v1168_v9 = vadd.f32 %v1166_v31, %v1162_v8  ;;  %v2238_v8 = vld [vmem:[#allocation4 + $0x80] sm:$0xf]  ;;  %v2384_v31 = vld [vmem:[#allocation4 + $0x84] sm:$0xf0] }
 0xfcd   :  { %2485 = vtanh.f32 %v1168_v9 }
 0xfd3   :  { %v2486_v26 = vpop.eup %2485 }
 0xfd4   :  { %v1170_v16 = vmul.f32 %v2486_v26, %v1161_v32  ;;  %v2239_v32 = vor.u32 %v2384_v31, %v2238_v8  ;;  %v2294_v8 = vld [vmem:[#allocation6 + $0xa0] sm:$0xf]  ;;  %v2396_v31 = vld [vmem:[#allocation6 + $0xa4] sm:$0xf0] }
 0xfd6   :  { %v2997_v34 = vpack.c.bf16 %v1170_v16, %v1170_v16 }
 0xfd8   :  { %v1179_v36 = vunpack.c.l.b16 %v2997_v34 }
 0xfda   :  { %v1180_v37 = vpack.c.b16 %v1179_v36, %v1179_v36 }
 0xfdc   :  { %1181 = vrot.lane.b32.xlu2 %v1180_v37, %s2609_s11  ;;  %v824_v37 = vadd.f32 %v3006_v22, %v2830_v6 }
 0xfe4   :  { %901 = vrot.lane.b32.xlu2 %v2851_v41, %s2609_s11  ;;  %v821_v41 = vadd.f32 %v820_v42, %v2830_v6  ;;  %v853_v42 = vadd.f32 %v3008_v49, %v2832_v13 }
0x1036   :  { %v1182_v38 = vpop.permute.xlu2 %1181 }
0x1037   :  { %2213 = vmatmul.msk.bf16.vlgmr.msra.gmra.mxu2 %vm138_vm0, %v1182_v38  ;;  %2214 = vmatmul.msk.bf16.vlgmr.msra.gmra.mxu3 %vm138_vm0, %v1182_v38 }
0x103e   :  { %v902_v39 = vpop.permute.xlu2 %901 }
0x103f   :  { %904 = vst.msk [vmem:[#allocation2] sm:$0xf] %vm255_vm1, %v902_v39 }
0x10ba   :  { %v1195_v23 = vpop.f32.mrf.mxu2  ;;  %v1208_v33 = vpop.f32.mrf.mxu3 }
0x10bb   :  { %v1212_v10 = vadd.f32 %v1195_v23, %v821_v41  ;;  %v1213_v28 = vadd.f32 %v1208_v33, %v850_v1 }
0x10bd   :  { %2487 = vtanh.f32 %v1212_v10 }
0x10be   :  { %2489 = vtanh.f32 %v1213_v28  ;;  %v2219_v28 = vld [vmem:[%s3234_s3 + $0x4] sm:$0x3] }
0x10bf   :  { %v3038_v22 = vperm.slane %v2219_v28, 0 }
0x10c2   :  { %v1197_v44 = vpop.f32.mrf.mxu2  ;;  %v1210_v12 = vpop.f32.mrf.mxu3 }
0x10c3   :  { %v2488_v43 = vpop.eup %2487 }
0x10c4   :  { %v1216_v3 = vmul.f32 0.5, %v2488_v43  ;;  %v2490_v46 = vpop.eup %2489 }
0x10c5   :  { %v1218_v57 = vmul.f32 0.5, %v2490_v46 }
0x10c6   :  { %v1217_v45 = vadd.f32 0.5, %v1216_v3  ;;  %v3040_v3 = vperm.slane %v2219_v28, 1 }
0x10c7   :  { %v1219_v63 = vadd.f32 0.5, %v1218_v57 }
0x10c8   :  { %v1221_v50 = vmul.f32 %v2490_v46, %v1217_v45  ;;  %v1220_v51 = vmul.f32 %v1217_v45, %v1168_v9  ;;  %v2383_v9 = vld [vmem:[#allocation4 + $0x84] sm:$0xf] }
0x10c9   :  { %v2243_v26 = vor.u32 %v2383_v9, %v2240_v61  ;;  %v3064_v9 = vor.u32 %v2397_v21, %v2304_v29  ;;  %v2395_v61 = vld [vmem:[#allocation6 + $0xa4] sm:$0xf] }
0x10ca   :  { %1223 = vrot.lane.b32.xlu0 %v1221_v50, %s2609_s11 }
0x10cb   :  { %1483 = vmatpush.bf16.msra.mxu1 %v2243_v26  ;;  %1613 = vmatpush.bf16.msra.mxu3 %v3064_v9  ;;  %v2286_v26 = vld [vmem:[#allocation6 + $0x90] sm:$0xf] }
0x10d2   :  { %999 = vrot.lane.b32.xlu0 %v2935_v62, %s2609_s11  ;;  %v2262_v62 = vld [vmem:[#allocation4 + $0xb0] sm:$0xf] }
0x10d3   :  { %v2263_v53 = vor.u32 %v2390_v47, %v2262_v62 }
0x10d5   :  { %1451 = vmatpush.bf16.msra.mxu0 %v2263_v53 }
0x10d9   :  { %1452 = vmatpush.bf16.msra.mxu0 %v2255_v60 }
0x10dd   :  { %1453 = vmatpush.bf16.msra.mxu0 %v2247_v25  ;;  %v3062_v25 = vor.u32 %v2398_v20, %v2302_v19 }
0x10df   :  { %1600 = vmatpush.bf16.msra.mxu2 %v3062_v25 }
0x10e1   :  { %1454 = vmatpush.bf16.msra.mxu0 %v2239_v32  ;;  %v3067_v32 = vor.u32 %v2396_v31, %v2294_v8 }
0x10e3   :  { %1601 = vmatpush.bf16.msra.mxu2 %v3067_v32 }
0x113c   :  { %v1224_v52 = vpop.permute.xlu0 %1223 }
0x113d   :  { %v3019_v56 = vadd.f32 %v1224_v52, %v1220_v51 }
0x113f   :  { %2491 = vtanh.f32 %v3019_v56 }
0x1144   :  { %v1000_v0 = vpop.permute.xlu0 %999 }
0x1145   :  { %v2492_v2 = vpop.eup %2491  ;;  %1002 = vst.msk [vmem:[#allocation2 + $0x4] sm:$0xf] %vm255_vm1, %v1000_v0 }
0x1146   :  { %v1228_v35 = vmul.f32 %v2492_v2, %v1219_v63 }
0x1148   :  { %v3023_v4 = vpack.c.bf16 %v1228_v35, %v1228_v35 }
0x114a   :  { %v1237_v11 = vunpack.c.l.b16 %v3023_v4 }
0x114c   :  { %v1238_v40 = vpack.c.b16 %v1237_v11, %v1237_v11  ;;  %v2379_v36 = vld [vmem:[#allocation2] sm:$0xff] }
0x114e   :  { %1239 = vrot.lane.b32.xlu1 %v1238_v40, %s2609_s11 }
0x11c0   :  { %v1240_v16 = vpop.permute.xlu1 %1239 }
0x11c1   :  { %2215 = vmatmul.msk.bf16.vlgmr.msrb.gmra.mxu0 %vm138_vm0, %v1240_v16  ;;  %2216 = vmatmul.msk.bf16.vlgmr.msrb.gmra.mxu1 %vm138_vm0, %v1240_v16  ;;  %v2394_v16 = vld [vmem:[#allocation6 + $0x94] sm:$0xf0] }
0x11c2   :  { %1808 = vmatpush.bf16.msrb.mxu0 %v3062_v25  ;;  %1821 = vmatpush.bf16.msrb.mxu1 %v3064_v9 }
0x11c6   :  { %1809 = vmatpush.bf16.msrb.mxu0 %v3067_v32 }
0x11d1   :  { %2268 = vmatmul.msk.bf16.vlgmr.msra.gmra.mxu0 %vm138_vm0, %v2379_v36  ;;  %2272 = vmatmul.msk.bf16.vlgmr.msra.gmra.mxu1 %vm138_vm0, %v2379_v36  ;;  %v2393_v36 = vld [vmem:[#allocation6 + $0x94] sm:$0xf] }
0x123e   :  { %v1253_v38 = vpop.f32.mrf.mxu0  ;;  %v1266_v39 = vpop.f32.mrf.mxu1 }
0x123f   :  { %v1270_v24 = vadd.f32 %v1253_v38, %v824_v37  ;;  %v1271_v41 = vadd.f32 %v1266_v39, %v853_v42  ;;  %v3078_v37 = vor.u32 %v2394_v16, %v2286_v26  ;;  %v2288_v38 = vld [vmem:[#allocation6 + $0x98] sm:$0xf0]  ;;  %v2278_v39 = vld [vmem:[#allocation6 + $0x80] sm:$0xf]  ;;  %v2392_v42 = vld [vmem:[#allocation6 + $0x84] sm:$0xf0] }
0x1241   :  { %2493 = vtanh.f32 %v1270_v24  ;;  %v3080_v24 = vor.u32 %v2393_v36, %v2288_v38  ;;  %1602 = vmatpush.bf16.msra.mxu2 %v3078_v37  ;;  %1810 = vmatpush.bf16.msrb.mxu0 %v3078_v37 }
0x1242   :  { %2495 = vtanh.f32 %v1271_v41  ;;  %v2391_v41 = vld [vmem:[#allocation6 + $0x84] sm:$0xf] }
0x1246   :  { %v1255_v23 = vpop.f32.mrf.mxu0  ;;  %v1268_v33 = vpop.f32.mrf.mxu1 }
0x1247   :  { %v2494_v1 = vpop.eup %2493  ;;  %v2280_v23 = vld [vmem:[#allocation6 + $0x88] sm:$0xf0]  ;;  %v3083_v33 = vor.u32 %v2392_v42, %v2278_v39 }
0x1248   :  { %v1274_v10 = vmul.f32 0.5, %v2494_v1  ;;  %v2496_v12 = vpop.eup %2495  ;;  %v3087_v1 = vor.u32 %v2391_v41, %v2280_v23 }
0x1249   :  { %v1276_v14 = vmul.f32 0.5, %v2496_v12  ;;  %1603 = vmatpush.bf16.msra.mxu2 %v3083_v33  ;;  %1811 = vmatpush.bf16.msrb.mxu0 %v3083_v33 }
0x124a   :  { %v1275_v44 = vadd.f32 0.5, %v1274_v10 }
0x124b   :  { %v1277_v30 = vadd.f32 0.5, %v1276_v14 }
0x124c   :  { %v1279_v43 = vmul.f32 %v2496_v12, %v1275_v44  ;;  %v1278_v62 = vmul.f32 %v1275_v44, %v3019_v56 }
0x124d   :  { %1912 = vmatpush.bf16.msra.mxu0 %v3062_v25 }
0x124e   :  { %1281 = vrot.lane.b32.xlu1 %v1279_v43, %s2609_s11  ;;  %v1456_v49 = vpop.f32.mrf.mxu0  ;;  %v1485_v45 = vpop.f32.mrf.mxu1 }
0x124f   :  { %v1457_v46 = vadd.f32 %v1456_v49, %v3038_v22  ;;  %v1486_v50 = vadd.f32 %v1485_v45, %v3040_v3  ;;  %v826_v49 = vadd.f32 %v3010_v55, %v2830_v6 }
0x1251   :  { %2497 = vtanh.f32 %v1457_v46  ;;  %1913 = vmatpush.bf16.msra.mxu0 %v3067_v32 }
0x1252   :  { %2499 = vtanh.f32 %v1486_v50  ;;  %v855_v50 = vadd.f32 %v3012_v58, %v2832_v13 }
0x1255   :  { %1914 = vmatpush.bf16.msra.mxu0 %v3078_v37 }
0x1257   :  { %v2498_v51 = vpop.eup %2497 }
0x1258   :  { %v1534_v52 = vmul.f32 0.5, %v2498_v51  ;;  %v2500_v63 = vpop.eup %2499 }
0x1259   :  { %v1536_v40 = vmul.f32 0.5, %v2500_v63  ;;  %1915 = vmatpush.bf16.msra.mxu0 %v3083_v33 }
0x125a   :  { %v1535_v57 = vadd.f32 0.5, %v1534_v52 }
0x125b   :  { %v1537_v48 = vadd.f32 0.5, %v1536_v40 }
0x125c   :  { %v1539_v0 = vmul.f32 %v2500_v63, %v1535_v57  ;;  %v1538_v2 = vmul.f32 0.0, %v1535_v57 }
0x125e   :  { %1541 = vrot.lane.b32.xlu2 %v1539_v0, %s2609_s11 }
0x12b8   :  { %v1542_v35 = vpop.permute.xlu2 %1541 }
0x12b9   :  { %v3046_v11 = vadd.f32 %v1542_v35, %v1538_v2  ;;  %v1458_v35 = vpop.f32.mrf.mxu0 }
0x12ba   :  { %v1459_v55 = vadd.f32 %v1458_v35, %v3038_v22 }
0x12bb   :  { %2501 = vtanh.f32 %v3046_v11 }
0x12c0   :  { %v1282_v47 = vpop.permute.xlu1 %1281 }
0x12c1   :  { %v2502_v53 = vpop.eup %2501  ;;  %v3050_v7 = vadd.f32 %v1282_v47, %v1278_v62  ;;  %v1487_v47 = vpop.f32.mrf.mxu1 }
0x12c2   :  { %v1546_v54 = vmul.f32 %v2502_v53, %v1537_v48  ;;  %v1488_v48 = vadd.f32 %v1487_v47, %v3040_v3 }
0x12c3   :  { %2503 = vtanh.f32 %v3050_v7 }
0x12c4   :  { %v1547_v59 = vpack.c.bf16 %v1546_v54, %v1546_v54 }
0x12c6   :  { %1551 = vrot.lane.b32.xlu1 %v1547_v59, %s2609_s11 }
0x12c9   :  { %v2504_v15 = vpop.eup %2503 }
0x12ca   :  { %v1286_v60 = vmul.f32 %v2504_v15, %v1277_v30 }
0x12cc   :  { %v3054_v17 = vpack.c.bf16 %v1286_v60, %v1286_v60 }
0x12ce   :  { %1115 = vrot.lane.b32.xlu1 %v2983_v5, %s2609_s11  ;;  %v1295_v56 = vunpack.c.l.b16 %v3054_v17  ;;  %v2296_v5 = vld [vmem:[#allocation6 + $0xa8] sm:$0xf0] }
0x12d0   :  { %v1296_v18 = vpack.c.b16 %v1295_v56, %v1295_v56 }
0x12d2   :  { %1297 = vrot.lane.b32.xlu0 %v1296_v18, %s2609_s11 }
0x12da   :  { %1057 = vrot.lane.b32.xlu0 %v2956_v27, %s2609_s11  ;;  %v3071_v27 = vor.u32 %v2395_v61, %v2296_v5 }
0x12dc   :  { %1614 = vmatpush.bf16.msra.mxu3 %v3071_v27  ;;  %1822 = vmatpush.bf16.msrb.mxu1 %v3071_v27 }
0x12e0   :  { %1615 = vmatpush.bf16.msra.mxu3 %v3080_v24  ;;  %1823 = vmatpush.bf16.msrb.mxu1 %v3080_v24 }
0x12e4   :  { %1616 = vmatpush.bf16.msra.mxu3 %v3087_v1  ;;  %1824 = vmatpush.bf16.msrb.mxu1 %v3087_v1 }
0x12e8   :  { %1925 = vmatpush.bf16.msra.mxu1 %v3064_v9 }
0x12ec   :  { %1926 = vmatpush.bf16.msra.mxu1 %v3071_v27 }
0x12f0   :  { %1927 = vmatpush.bf16.msra.mxu1 %v3080_v24 }
0x12f4   :  { %1928 = vmatpush.bf16.msra.mxu1 %v3087_v1 }
0x1338   :  { %v1552_v10 = vpop.permute.xlu1 %1551 }
0x1340   :  { %v1116_v28 = vpop.permute.xlu1 %1115 }
0x1341   :  { %1118 = vst.msk [vmem:[#allocation2 + $0xc] sm:$0xf] %vm255_vm1, %v1116_v28 }
0x1344   :  { %v1298_v44 = vpop.permute.xlu0 %1297 }
0x1345   :  { %2217 = vmatmul.msk.bf16.vlgmr.msrb.gmra.mxu2 %vm138_vm0, %v1298_v44  ;;  %2218 = vmatmul.msk.bf16.vlgmr.msrb.gmra.mxu3 %vm138_vm0, %v1298_v44 }
0x1346   :  { %1652 = vmatpush.bf16.msrb.mxu2 %v3062_v25  ;;  %1665 = vmatpush.bf16.msrb.mxu3 %v3064_v9 }
0x134a   :  { %1653 = vmatpush.bf16.msrb.mxu2 %v3067_v32  ;;  %1666 = vmatpush.bf16.msrb.mxu3 %v3071_v27 }
0x134c   :  { %v1058_v12 = vpop.permute.xlu0 %1057 }
0x134d   :  { %1060 = vst.msk [vmem:[#allocation2 + $0x8] sm:$0xf] %vm255_vm1, %v1058_v12 }
0x134e   :  { %1654 = vmatpush.bf16.msrb.mxu2 %v3078_v37  ;;  %1667 = vmatpush.bf16.msrb.mxu3 %v3080_v24 }
0x1352   :  { %1655 = vmatpush.bf16.msrb.mxu2 %v3083_v33  ;;  %1668 = vmatpush.bf16.msrb.mxu3 %v3087_v1 }
0x1354   :  { %v2380_v43 = vld [vmem:[#allocation2 + $0x8] sm:$0xff] }
0x1355   :  { %2308 = vmatmul.msk.bf16.vlgmr.msra.gmra.mxu2 %vm138_vm0, %v1552_v10  ;;  %2309 = vmatmul.msk.bf16.vlgmr.msra.gmra.mxu3 %vm138_vm0, %v1552_v10 }
0x1356   :  { %2269 = vmatmul.msk.bf16.gmra.mxu0 %vm138_vm0, %v2380_v43  ;;  %2273 = vmatmul.msk.bf16.gmra.mxu1 %vm138_vm0, %v2380_v43 }
0x1357   :  { %1704 = vmatpush.bf16.msra.mxu2 %v3062_v25  ;;  %1717 = vmatpush.bf16.msra.mxu3 %v3064_v9 }
0x135b   :  { %1705 = vmatpush.bf16.msra.mxu2 %v3067_v32  ;;  %1718 = vmatpush.bf16.msra.mxu3 %v3071_v27 }
0x135f   :  { %1706 = vmatpush.bf16.msra.mxu2 %v3078_v37  ;;  %1719 = vmatpush.bf16.msra.mxu3 %v3080_v24 }
0x1363   :  { %1707 = vmatpush.bf16.msra.mxu2 %v3083_v33  ;;  %1720 = vmatpush.bf16.msra.mxu3 %v3087_v1 }
0x13c8   :  { %v1311_v45 = vpop.f32.mrf.mxu2  ;;  %v1324_v46 = vpop.f32.mrf.mxu3 }
0x13c9   :  { %v1328_v51 = vadd.f32 %v1311_v45, %v826_v49  ;;  %v1329_v52 = vadd.f32 %v1324_v46, %v855_v50 }
0x13cb   :  { %2505 = vtanh.f32 %v1328_v51 }
0x13cc   :  { %2507 = vtanh.f32 %v1329_v52 }
0x13d0   :  { %v1313_v57 = vpop.f32.mrf.mxu2  ;;  %v1326_v63 = vpop.f32.mrf.mxu3 }
0x13d1   :  { %v2506_v0 = vpop.eup %2505 }
0x13d2   :  { %v1332_v2 = vmul.f32 0.5, %v2506_v0  ;;  %v3132_v62 = vpop.eup %2507 }
0x13d3   :  { %v1490_v16 = vpop.f32.mrf.mxu1 }
0x13d4   :  { %v3130_v40 = vadd.f32 0.5, %v1332_v2  ;;  %v1491_v42 = vadd.f32 %v1490_v16, %v3040_v3 }
0x13d6   :  { %v1337_v6 = vmul.f32 %v3132_v62, %v3130_v40  ;;  %v1336_v47 = vmul.f32 %v3130_v40, %v3050_v7 }
0x13d8   :  { %v1605_v13 = vpop.f32.mrf.mxu2  ;;  %v1618_v58 = vpop.f32.mrf.mxu3 }
0x13d9   :  { %v1622_v53 = vadd.f32 %v1605_v13, %v1459_v55  ;;  %v1623_v54 = vadd.f32 %v1618_v58, %v1488_v48 }
0x13db   :  { %2509 = vtanh.f32 %v1622_v53 }
0x13dc   :  { %2511 = vtanh.f32 %v1623_v54 }
0x13e0   :  { %v1607_v14 = vpop.f32.mrf.mxu2  ;;  %v1620_v59 = vpop.f32.mrf.mxu3 }
0x13e1   :  { %v2510_v30 = vpop.eup %2509 }
0x13e2   :  { %v1626_v15 = vmul.f32 0.5, %v2510_v30  ;;  %v2512_v56 = vpop.eup %2511 }
0x13e3   :  { %v1628_v29 = vmul.f32 0.5, %v2512_v56 }
0x13e4   :  { %v1627_v60 = vadd.f32 0.5, %v1626_v15 }
0x13e5   :  { %v1629_v8 = vadd.f32 0.5, %v1628_v29 }
0x13e6   :  { %v1631_v18 = vmul.f32 %v2512_v56, %v1627_v60  ;;  %v1630_v19 = vmul.f32 %v1627_v60, %v3046_v11  ;;  %v1461_v11 = vpop.f32.mrf.mxu0 }
0x13e7   :  { %v1462_v36 = vadd.f32 %v1461_v11, %v3038_v22 }
0x13e8   :  { %1633 = vrot.lane.b32.xlu2 %v1631_v18, %s2609_s11 }
0x1442   :  { %v1634_v20 = vpop.permute.xlu2 %1633 }
0x1443   :  { %v1636_v21 = vadd.f32 %v1634_v20, %v1630_v19 }
0x1445   :  { %2513 = vtanh.f32 %v1636_v21 }
0x144b   :  { %v2514_v31 = vpop.eup %2513 }
0x144c   :  { %v1638_v61 = vmul.f32 %v2514_v31, %v1629_v8 }
0x144e   :  { %v1639_v5 = vpack.c.bf16 %v1638_v61, %v1638_v61 }
0x1450   :  { %1643 = vrot.lane.b32.xlu2 %v1639_v5, %s2609_s11 }
0x14aa   :  { %v1644_v26 = vpop.permute.xlu2 %1643 }
0x14ab   :  { %2310 = vmatmul.msk.bf16.vlgmr.msrb.gmra.mxu2 %vm138_vm0, %v1644_v26  ;;  %2311 = vmatmul.msk.bf16.vlgmr.msrb.gmra.mxu3 %vm138_vm0, %v1644_v26 }
0x14ac   :  { %1756 = vmatpush.bf16.msrb.mxu2 %v3062_v25  ;;  %1769 = vmatpush.bf16.msrb.mxu3 %v3064_v9 }
0x14b0   :  { %1757 = vmatpush.bf16.msrb.mxu2 %v3067_v32  ;;  %1770 = vmatpush.bf16.msrb.mxu3 %v3071_v27 }
0x14b4   :  { %1758 = vmatpush.bf16.msrb.mxu2 %v3078_v37  ;;  %1771 = vmatpush.bf16.msrb.mxu3 %v3080_v24 }
0x14b8   :  { %1759 = vmatpush.bf16.msrb.mxu2 %v3083_v33  ;;  %1772 = vmatpush.bf16.msrb.mxu3 %v3087_v1 }
0x152e   :  { %v1657_v38 = vpop.f32.mrf.mxu2  ;;  %v1670_v39 = vpop.f32.mrf.mxu3 }
0x152f   :  { %v1674_v41 = vadd.f32 %v1657_v38, %v1462_v36  ;;  %v1675_v23 = vadd.f32 %v1670_v39, %v1491_v42 }
0x1531   :  { %2515 = vtanh.f32 %v1674_v41 }
0x1532   :  { %2517 = vtanh.f32 %v1675_v23 }
0x1536   :  { %v1659_v10 = vpop.f32.mrf.mxu2  ;;  %v1672_v28 = vpop.f32.mrf.mxu3 }
0x1537   :  { %v2516_v44 = vpop.eup %2515 }
0x1538   :  { %v1678_v12 = vmul.f32 0.5, %v2516_v44  ;;  %v2518_v49 = vpop.eup %2517 }
0x1539   :  { %v1680_v52 = vmul.f32 0.5, %v2518_v49 }
0x153a   :  { %v1679_v43 = vadd.f32 0.5, %v1678_v12 }
0x153b   :  { %v1681_v63 = vadd.f32 0.5, %v1680_v52 }
0x153c   :  { %v1683_v45 = vmul.f32 %v2518_v49, %v1679_v43  ;;  %v1682_v46 = vmul.f32 %v1679_v43, %v1636_v21 }
0x153e   :  { %1685 = vrot.lane.b32.xlu0 %v1683_v45, %s2609_s11 }
0x1546   :  { %1173 = vrot.lane.b32.xlu0 %v2997_v34, %s2609_s11 }
0x154e   :  { %1339 = vrot.lane.b32.xlu0 %v1337_v6, %s2609_s11  ;;  %v1334_v6 = vmul.f32 0.5, %v3132_v62 }
0x1550   :  { %v1335_v13 = vadd.f32 0.5, %v1334_v6 }
0x15b0   :  { %v1686_v50 = vpop.permute.xlu0 %1685 }
0x15b1   :  { %v1688_v51 = vadd.f32 %v1686_v50, %v1682_v46 }
0x15b3   :  { %2519 = vtanh.f32 %v1688_v51 }
0x15b8   :  { %v1174_v57 = vpop.permute.xlu0 %1173 }
0x15b9   :  { %v2520_v0 = vpop.eup %2519  ;;  %1176 = vst.msk [vmem:[#allocation2 + $0x10] sm:$0xf] %vm255_vm1, %v1174_v57 }
0x15ba   :  { %v1690_v2 = vmul.f32 %v2520_v0, %v1681_v63 }
0x15bc   :  { %v1691_v35 = vpack.c.bf16 %v1690_v2, %v1690_v2 }
0x15be   :  { %1695 = vrot.lane.b32.xlu1 %v1691_v35, %s2609_s11 }
0x15c0   :  { %v1340_v34 = vpop.permute.xlu0 %1339 }
0x15c1   :  { %v1342_v55 = vadd.f32 %v1340_v34, %v1336_v47 }
0x15c3   :  { %2521 = vtanh.f32 %v1342_v55 }
0x15c6   :  { %1231 = vrot.lane.b32.xlu1 %v3023_v4, %s2609_s11 }
0x15c9   :  { %v2522_v58 = vpop.eup %2521 }
0x15ca   :  { %v1344_v48 = vmul.f32 %v2522_v58, %v1335_v13 }
0x15cc   :  { %v1345_v53 = vpack.c.bf16 %v1344_v48, %v1344_v48 }
0x15ce   :  { %1347 = vrot.lane.b32.xlu0 %v1345_v53, %s2609_s11 }
0x1630   :  { %v1696_v54 = vpop.permute.xlu1 %1695 }
0x1631   :  { %2312 = vmatmul.msk.bf16.vlgmr.msra.gmra.mxu2 %vm138_vm0, %v1696_v54  ;;  %2313 = vmatmul.msk.bf16.vlgmr.msra.gmra.mxu3 %vm138_vm0, %v1696_v54 }
0x1632   :  { %1860 = vmatpush.bf16.msra.mxu2 %v3062_v25  ;;  %1873 = vmatpush.bf16.msra.mxu3 %v3064_v9  ;;  %v1463_v25 = vpop.f32.mrf.mxu0  ;;  %v1492_v9 = vpop.f32.mrf.mxu1 }
0x1636   :  { %1861 = vmatpush.bf16.msra.mxu2 %v3067_v32  ;;  %1874 = vmatpush.bf16.msra.mxu3 %v3071_v27  ;;  %v1464_v32 = vadd.f32 %v1463_v25, %v3038_v22 }
0x1638   :  { %v1232_v4 = vpop.permute.xlu1 %1231 }
0x1639   :  { %1234 = vst.msk [vmem:[#allocation2 + $0x14] sm:$0xf] %vm255_vm1, %v1232_v4 }
0x163a   :  { %1862 = vmatpush.bf16.msra.mxu2 %v3078_v37  ;;  %1875 = vmatpush.bf16.msra.mxu3 %v3080_v24  ;;  %v1493_v24 = vadd.f32 %v1492_v9, %v3040_v3 }
0x163e   :  { %1863 = vmatpush.bf16.msra.mxu2 %v3083_v33  ;;  %1876 = vmatpush.bf16.msra.mxu3 %v3087_v1 }
0x1640   :  { %v1348_v7 = vpop.permute.xlu0 %1347  ;;  %v2381_v40 = vld [vmem:[#allocation2 + $0x10] sm:$0xff] }
0x1641   :  { %1350 = vst.msk [vmem:[#allocation2 + $0x1c] sm:$0xf] %vm255_vm1, %v1348_v7  ;;  %2270 = vmatmul.msk.bf16.gmra.mxu0 %vm138_vm0, %v2381_v40  ;;  %2274 = vmatmul.msk.bf16.gmra.mxu1 %vm138_vm0, %v2381_v40 }
0x16b4   :  { %v1709_v27 = vpop.f32.mrf.mxu2  ;;  %v1722_v37 = vpop.f32.mrf.mxu3 }
0x16b5   :  { %v1726_v62 = vadd.f32 %v1709_v27, %v1464_v32  ;;  %v1727_v33 = vadd.f32 %v1722_v37, %v1493_v24 }
0x16b7   :  { %2523 = vtanh.f32 %v1726_v62 }
0x16b8   :  { %2525 = vtanh.f32 %v1727_v33 }
0x16bc   :  { %v1711_v1 = vpop.f32.mrf.mxu2  ;;  %v1724_v14 = vpop.f32.mrf.mxu3 }
0x16bd   :  { %v2524_v59 = vpop.eup %2523 }
0x16be   :  { %v1730_v30 = vmul.f32 0.5, %v2524_v59  ;;  %v2526_v60 = vpop.eup %2525  ;;  %v1466_v16 = vpop.f32.mrf.mxu0 }
0x16bf   :  { %v1732_v21 = vmul.f32 0.5, %v2526_v60  ;;  %v1495_v36 = vpop.f32.mrf.mxu1  ;;  %v1467_v38 = vadd.f32 %v1466_v16, %v3038_v22 }
0x16c0   :  { %v1731_v15 = vadd.f32 0.5, %v1730_v30 }
0x16c1   :  { %v1733_v29 = vadd.f32 0.5, %v1732_v21 }
0x16c2   :  { %v1735_v56 = vmul.f32 %v2526_v60, %v1731_v15  ;;  %v1734_v18 = vmul.f32 %v1731_v15, %v1688_v51 }
0x16c4   :  { %1737 = vrot.lane.b32.xlu2 %v1735_v56, %s2609_s11 }
0x16c6   :  { %v1468_v47 = vpop.f32.mrf.mxu0 }
0x16c7   :  { %v1497_v34 = vpop.f32.mrf.mxu1  ;;  %v1469_v48 = vadd.f32 %v1468_v47, %v3038_v22 }
0x16c8   :  { %v1498_v4 = vadd.f32 %v1497_v34, %v3040_v3  ;;  %v2400_v34 = vld [vmem:[%s3235_s4 + $0x8] sm:$0xff] }
0x171e   :  { %v1738_v19 = vpop.permute.xlu2 %1737 }
0x171f   :  { %v1740_v20 = vadd.f32 %v1738_v19, %v1734_v18 }
0x1721   :  { %2527 = vtanh.f32 %v1740_v20 }
0x1727   :  { %v2528_v8 = vpop.eup %2527 }
0x1728   :  { %v1742_v31 = vmul.f32 %v2528_v8, %v1733_v29 }
0x172a   :  { %v1743_v61 = vpack.c.bf16 %v1742_v31, %v1742_v31 }
0x172c   :  { %1747 = vrot.lane.b32.xlu2 %v1743_v61, %s2609_s11 }
0x1734   :  { %1289 = vrot.lane.b32.xlu2 %v3054_v17, %s2609_s11  ;;  %v1496_v17 = vadd.f32 %v1495_v36, %v3040_v3 }
0x1786   :  { %v1748_v5 = vpop.permute.xlu2 %1747 }
0x1787   :  { %2314 = vmatmul.msk.bf16.vlgmr.msrb.gmra.mxu2 %vm138_vm0, %v1748_v5  ;;  %2315 = vmatmul.msk.bf16.vlgmr.msrb.gmra.mxu3 %vm138_vm0, %v1748_v5 }
0x178e   :  { %v1290_v26 = vpop.permute.xlu2 %1289 }
0x178f   :  { %1292 = vst.msk [vmem:[#allocation2 + $0x18] sm:$0xf] %vm255_vm1, %v1290_v26 }
0x1796   :  { %v2382_v11 = vld [vmem:[#allocation2 + $0x18] sm:$0xff] }
0x1797   :  { %2271 = vmatmul.msk.bf16.gmra.mxu0 %vm138_vm0, %v2382_v11  ;;  %2275 = vmatmul.msk.bf16.gmra.mxu1 %vm138_vm0, %v2382_v11 }
0x180a   :  { %v1761_v39 = vpop.f32.mrf.mxu2  ;;  %v1774_v42 = vpop.f32.mrf.mxu3 }
0x180b   :  { %v1778_v41 = vadd.f32 %v1761_v39, %v1467_v38  ;;  %v1779_v23 = vadd.f32 %v1774_v42, %v1496_v17 }
0x180d   :  { %2529 = vtanh.f32 %v1778_v41 }
0x180e   :  { %2531 = vtanh.f32 %v1779_v23 }
0x1812   :  { %v1763_v10 = vpop.f32.mrf.mxu2  ;;  %v1776_v28 = vpop.f32.mrf.mxu3 }
0x1813   :  { %v2530_v44 = vpop.eup %2529 }
0x1814   :  { %v1782_v12 = vmul.f32 0.5, %v2530_v44  ;;  %v2532_v49 = vpop.eup %2531  ;;  %v1471_v55 = vpop.f32.mrf.mxu0 }
0x1815   :  { %v1784_v52 = vmul.f32 0.5, %v2532_v49  ;;  %v1500_v6 = vpop.f32.mrf.mxu1  ;;  %v1472_v19 = vadd.f32 %v1471_v55, %v3038_v22  ;;  %v2399_v55 = vld [vmem:[%s3235_s4] sm:$0xff] }
0x1816   :  { %v1783_v43 = vadd.f32 0.5, %v1782_v12  ;;  %v1501_v29 = vadd.f32 %v1500_v6, %v3040_v3 }
0x1817   :  { %v1785_v57 = vadd.f32 0.5, %v1784_v52 }
0x1818   :  { %v1787_v45 = vmul.f32 %v2532_v49, %v1783_v43  ;;  %v1786_v46 = vmul.f32 %v1783_v43, %v1740_v20 }
0x181a   :  { %1789 = vrot.lane.b32.xlu1 %v1787_v45, %s2609_s11 }
0x181c   :  { %v1473_v13 = vpop.f32.mrf.mxu0 }
0x181d   :  { %v1502_v58 = vpop.f32.mrf.mxu1  ;;  %v1474_v43 = vadd.f32 %v1473_v13, %v3038_v22  ;;  %v2402_v22 = vld [vmem:[%s3235_s4 + $0x18] sm:$0xff] }
0x181e   :  { %1998 = vmatpush.bf16.msrb.mxu2 %v2402_v22 }
0x188c   :  { %v1790_v50 = vpop.permute.xlu1 %1789 }
0x188d   :  { %v1792_v51 = vadd.f32 %v1790_v50, %v1786_v46  ;;  %v1503_v46 = vadd.f32 %v1502_v58, %v3040_v3  ;;  %v2401_v3 = vld [vmem:[%s3235_s4 + $0x10] sm:$0xff] }
0x188e   :  { %1999 = vmatpush.bf16.msrb.mxu2 %v2401_v3 }
0x188f   :  { %2533 = vtanh.f32 %v1792_v51 }
0x1892   :  { %2000 = vmatpush.bf16.msrb.mxu2 %v2400_v34 }
0x1895   :  { %v2534_v63 = vpop.eup %2533 }
0x1896   :  { %v1794_v0 = vmul.f32 %v2534_v63, %v1785_v57  ;;  %2001 = vmatpush.bf16.msrb.mxu2 %v2399_v55 }
0x1898   :  { %v1795_v2 = vpack.c.bf16 %v1794_v0, %v1794_v0 }
0x189a   :  { %1799 = vrot.lane.b32.xlu1 %v1795_v2, %s2609_s11 }
0x190c   :  { %v1800_v35 = vpop.permute.xlu1 %1799 }
0x190d   :  { %2316 = vmatmul.msk.bf16.vlgmr.msrb.gmra.mxu0 %vm138_vm0, %v1800_v35  ;;  %2317 = vmatmul.msk.bf16.vlgmr.msrb.gmra.mxu1 %vm138_vm0, %v1800_v35 }
0x198a   :  { %v1813_v53 = vpop.f32.mrf.mxu0  ;;  %v1826_v54 = vpop.f32.mrf.mxu1 }
0x198b   :  { %v1830_v7 = vadd.f32 %v1813_v53, %v1469_v48  ;;  %v1831_v40 = vadd.f32 %v1826_v54, %v1498_v4 }
0x198d   :  { %2535 = vtanh.f32 %v1830_v7 }
0x198e   :  { %2537 = vtanh.f32 %v1831_v40 }
0x1992   :  { %v1815_v25 = vpop.f32.mrf.mxu0  ;;  %v1828_v9 = vpop.f32.mrf.mxu1 }
0x1993   :  { %v2536_v32 = vpop.eup %2535  ;;  %v2408_v25 = vld [vmem:[%s3236_s5] ss:$0 sm:$0xff] }
0x1994   :  { %v1834_v27 = vmul.f32 0.5, %v2536_v32  ;;  %v2538_v24 = vpop.eup %2537 }
0x1995   :  { %v1836_v59 = vmul.f32 0.5, %v2538_v24 }
0x1996   :  { %v1835_v37 = vadd.f32 0.5, %v1834_v27 }
0x1997   :  { %v1837_v30 = vadd.f32 0.5, %v1836_v59 }
0x1998   :  { %v1839_v62 = vmul.f32 %v2538_v24, %v1835_v37  ;;  %v1838_v33 = vmul.f32 %v1835_v37, %v1792_v51 }
0x199a   :  { %1841 = vrot.lane.b32.xlu2 %v1839_v62, %s2609_s11 }
0x19f4   :  { %v1842_v1 = vpop.permute.xlu2 %1841 }
0x19f5   :  { %v1844_v14 = vadd.f32 %v1842_v1, %v1838_v33 }
0x19f7   :  { %2539 = vtanh.f32 %v1844_v14 }
0x19fd   :  { %v2540_v15 = vpop.eup %2539 }
0x19fe   :  { %v1846_v60 = vmul.f32 %v2540_v15, %v1837_v30 }
0x1a00   :  { %v1847_v56 = vpack.c.bf16 %v1846_v60, %v1846_v60 }
0x1a02   :  { %1851 = vrot.lane.b32.xlu0 %v1847_v56, %s2609_s11 }
0x1a74   :  { %v1852_v18 = vpop.permute.xlu0 %1851 }
0x1a75   :  { %2318 = vmatmul.msk.bf16.vlgmr.msra.gmra.mxu2 %vm138_vm0, %v1852_v18  ;;  %2319 = vmatmul.msk.bf16.vlgmr.msra.gmra.mxu3 %vm138_vm0, %v1852_v18 }
0x1af8   :  { %v1865_v20 = vpop.f32.mrf.mxu2  ;;  %v1878_v21 = vpop.f32.mrf.mxu3 }
0x1af9   :  { %v1882_v8 = vadd.f32 %v1865_v20, %v1472_v19  ;;  %v1883_v31 = vadd.f32 %v1878_v21, %v1501_v29 }
0x1afb   :  { %2541 = vtanh.f32 %v1882_v8 }
0x1afc   :  { %2543 = vtanh.f32 %v1883_v31 }
0x1b00   :  { %v1867_v61 = vpop.f32.mrf.mxu2  ;;  %v1880_v5 = vpop.f32.mrf.mxu3 }
0x1b01   :  { %v2542_v26 = vpop.eup %2541 }
0x1b02   :  { %v1886_v11 = vmul.f32 0.5, %v2542_v26  ;;  %v2544_v36 = vpop.eup %2543 }
0x1b03   :  { %v1888_v41 = vmul.f32 0.5, %v2544_v36 }
0x1b04   :  { %v1887_v16 = vadd.f32 0.5, %v1886_v11 }
0x1b05   :  { %v1889_v23 = vadd.f32 0.5, %v1888_v41 }
0x1b06   :  { %v1891_v38 = vmul.f32 %v2544_v36, %v1887_v16  ;;  %v1890_v39 = vmul.f32 %v1887_v16, %v1844_v14 }
0x1b08   :  { %1893 = vrot.lane.b32.xlu1 %v1891_v38, %s2609_s11 }
0x1b7a   :  { %v1894_v42 = vpop.permute.xlu1 %1893 }
0x1b7b   :  { %v1896_v17 = vadd.f32 %v1894_v42, %v1890_v39 }
0x1b7d   :  { %2545 = vtanh.f32 %v1896_v17 }
0x1b83   :  { %v2546_v10 = vpop.eup %2545 }
0x1b84   :  { %v1898_v28 = vmul.f32 %v2546_v10, %v1889_v23 }
0x1b86   :  { %v1899_v44 = vpack.c.bf16 %v1898_v28, %v1898_v28 }
0x1b88   :  { %1903 = vrot.lane.b32.xlu2 %v1899_v44, %s2609_s11 }
0x1be2   :  { %v1904_v12 = vpop.permute.xlu2 %1903 }
0x1be3   :  { %2320 = vmatmul.msk.bf16.vlgmr.msra.gmra.mxu0 %vm138_vm0, %v1904_v12  ;;  %2321 = vmatmul.msk.bf16.vlgmr.msra.gmra.mxu1 %vm138_vm0, %v1904_v12 }
0x1c60   :  { %v1917_v49 = vpop.f32.mrf.mxu0  ;;  %v1930_v45 = vpop.f32.mrf.mxu1 }
0x1c61   :  { %v1934_v50 = vadd.f32 %v1917_v49, %v1474_v43  ;;  %v1935_v51 = vadd.f32 %v1930_v45, %v1503_v46 }
0x1c63   :  { %2547 = vtanh.f32 %v1934_v50 }
0x1c64   :  { %2549 = vtanh.f32 %v1935_v51 }
0x1c68   :  { %v1919_v52 = vpop.f32.mrf.mxu0  ;;  %v1932_v57 = vpop.f32.mrf.mxu1 }
0x1c69   :  { %v2548_v63 = vpop.eup %2547 }
0x1c6a   :  { %v1938_v0 = vmul.f32 0.5, %v2548_v63  ;;  %v2550_v35 = vpop.eup %2549 }
0x1c6b   :  { %v1940_v48 = vmul.f32 0.5, %v2550_v35 }
0x1c6c   :  { %v1939_v2 = vadd.f32 0.5, %v1938_v0 }
0x1c6d   :  { %v1941_v53 = vadd.f32 0.5, %v1940_v48 }
0x1c6e   :  { %v1943_v47 = vmul.f32 %v2550_v35, %v1939_v2  ;;  %v1942_v6 = vmul.f32 %v1939_v2, %v1896_v17 }
0x1c70   :  { %1945 = vrot.lane.b32.xlu0 %v1943_v47, %s2609_s11 }
0x1ce2   :  { %v1946_v13 = vpop.permute.xlu0 %1945 }
0x1ce3   :  { %v1948_v58 = vadd.f32 %v1946_v13, %v1942_v6 }
0x1ce5   :  { %2551 = vtanh.f32 %v1948_v58 }
0x1ceb   :  { %v2552_v54 = vpop.eup %2551 }
0x1cec   :  { %v1950_v4 = vmul.f32 %v2552_v54, %v1941_v53 }
0x1cee   :  { %v1951_v7 = vpack.c.bf16 %v1950_v4, %v1950_v4 }
0x1cf0   :  { %1965 = vrot.lane.b32.xlu1 %v1951_v7, %s2609_s11 }
0x1d62   :  { %v1966_v40 = vpop.permute.xlu1 %1965 }
0x1d63   :  { %2338 = vmatmul.msk.bf16.vlgmr.msrb.gmra.mxu2 %vm138_vm0, %v1966_v40 }
0x1de6   :  { %v2003_v9 = vpop.f32.mrf.mxu2 }
0x1de7   :  { %v2004_v32 = vadd.f32 %v2408_v25, %v2003_v9 }
0x1de9   :  { %2007 = vst [vmem:[%s3237_s6] sm:$0xff] %v2004_v32 }
0x1dee   :  { %v2005_v27 = vpop.f32.mrf.mxu2 }
0x1def   :  { %2012 = vsyncpa [#allocation5], 1 }
0x1df0   :  { %2013 = vsyncpa [#allocation7], 1 }

</bundles_post_ra>
